<compile_context>
chip_gen: v6e
topology: v6e:2x2x1
jax: 0.10.0
libtpu: 0.0.40
codegen_flags: <defaults>
</compile_context>

<pallas_src>
import functools
import math

import numpy as np

import jax
import jax.numpy as jnp
from jax.experimental import pallas as pl
from jax.experimental.pallas import tpu as pltpu


def _mha_kernel(xq_ref, xkv_ref,
                wq_ref, bq_ref,
                wk_ref, bk_ref,
                wv_ref, bv_ref,
                wo_ref, bo_ref,
                o_ref,
                qh_scr, kh_scr, vh_scr,
                *, n_heads, head_dim, kv_len, kv_chunk,
                compute_dtype, approx_recip):
    f32 = jnp.float32
    cdt = compute_dtype
    H, hd = n_heads, head_dim

    # ---- K/V projection + head relayout: ONCE per batch.  The query-tile grid
    # axis is "arbitrary", so program_id(1) == 0 exactly when the batch block
    # changes; kh_scr/vh_scr persist across the remaining query tiles.
    @pl.when(pl.program_id(1) == 0)
    def _project_kv():
        xkv = xkv_ref[0]                                              # (Lk, D)
        k = jnp.dot(xkv, wk_ref[...], preferred_element_type=f32) + bk_ref[0]
        v = jnp.dot(xkv, wv_ref[...], preferred_element_type=f32) + bv_ref[0]
        for h in range(H):
            sl = slice(h * hd, (h + 1) * hd)
            kh_scr[h] = k[:, sl].astype(cdt)
            vh_scr[h] = v[:, sl].astype(cdt)

    # ---- Q projection for this query tile.  The 1/sqrt(head_dim) softmax
    # scale is folded into Wq / bq at prepare_params() time.
    q = jnp.dot(xq_ref[0], wq_ref[...], preferred_element_type=f32) + bq_ref[0]
    for h in range(H):
        qh_scr[h] = q[:, h * hd:(h + 1) * hd].astype(cdt)
    qh = qh_scr[...]                                                  # (H,tq,hd)
    tq = qh.shape[1]

    # ---- Attention over kv chunks with an online (flash-style) softmax, so
    # the live score/prob tensors are bounded to (H, tq, kv_chunk) f32.
    n_chunks = kv_len // kv_chunk

    def chunk(c):
        ks = kh_scr[:, c * kv_chunk:(c + 1) * kv_chunk, :]
        vs = vh_scr[:, c * kv_chunk:(c + 1) * kv_chunk, :]
        s = jnp.einsum('hqd,hkd->hqk', qh, ks, preferred_element_type=f32)
        return s, vs

    s0, v0 = chunk(0)
    m = jnp.max(s0, axis=-1, keepdims=True)
    p = jnp.exp(s0 - m)
    l = jnp.sum(p, axis=-1, keepdims=True)
    acc = jnp.einsum('hqk,hkd->hqd', p.astype(cdt), v0,
                     preferred_element_type=f32)
    for c in range(1, n_chunks):
        s, vs = chunk(c)
        m_new = jnp.maximum(m, jnp.max(s, axis=-1, keepdims=True))
        alpha = jnp.exp(m - m_new)
        p = jnp.exp(s - m_new)
        l = alpha * l + jnp.sum(p, axis=-1, keepdims=True)
        acc = alpha * acc + jnp.einsum('hqk,hkd->hqd', p.astype(cdt), vs,
                                       preferred_element_type=f32)
        m = m_new

    # Softmax normalisation via an EUP reciprocal + multiply (no division).
    ctx = (acc * pl.reciprocal(l, approx=approx_recip)).astype(cdt)   # (H,tq,hd)

    # ---- Output projection with the head concatenation folded in:
    #   out = sum_h ctx[h] @ Wo[h]  (+ bo once).  Same MXU work as one K=D dot.
    d_out = wo_ref.shape[-1]
    out = jnp.zeros((tq, d_out), f32)
    for h in range(H):
        out = out + jnp.dot(ctx[h], wo_ref[h], preferred_element_type=f32)
    out = out + bo_ref[0]
    o_ref[0] = out.astype(o_ref.dtype)


def prepare_params(params, n_heads, compute_dtype=jnp.bfloat16):
    """One-time parameter packing (call ONCE, not per forward).

    Transposes the torch-layout (out_features, in_features) weights, folds the
    1/sqrt(head_dim) scale into Wq/bq, reshapes Wo to (H, head_dim, D) so the
    head concat folds into the output projection, and casts MXU operands to
    `compute_dtype` (biases stay f32: they are added after f32 accumulation).
    """
    wq, bq, wk, bk, wv, bv, wo, bo = params
    D = wq.shape[0]
    assert D % n_heads == 0
    hd = D // n_heads
    scale = 1.0 / math.sqrt(hd)
    cdt = compute_dtype
    wq_t = (wq.T * scale).astype(cdt)
    wk_t = wk.T.astype(cdt)
    wv_t = wv.T.astype(cdt)
    wo_h = wo.T.reshape(n_heads, hd, D).astype(cdt)
    bq2 = (bq * scale).reshape(1, D).astype(jnp.float32)
    bk2 = bk.reshape(1, D).astype(jnp.float32)
    bv2 = bv.reshape(1, D).astype(jnp.float32)
    bo2 = bo.reshape(1, D).astype(jnp.float32)
    return (wq_t, bq2, wk_t, bk2, wv_t, bv2, wo_h, bo2)


def _pick_tile(extent, candidates=(512, 256, 128)):
    for t in candidates:
        if extent % t == 0:
            return t
    return extent   # small / ragged extents: use the full dimension


def _shrink_tile(t, extent, candidates=(256, 128)):
    for c in candidates:
        if c < t and extent % c == 0:
            return c
    return t


def _vmem_capacity_bytes():
    try:
        return int(pltpu.get_tpu_info().vmem_capacity_bytes)
    except Exception:
        return 64 * 1024 * 1024   # conservative (v7x-sized) fallback


def multi_head_attention(q, kv, prepared_params, n_heads, *,
                         approx_softmax=True, single_buffer_weights=True,
                         q_tile=None, kv_chunk=None):
    """q: (B, Lq, D); kv: (B, Lk, D) or None (self-attention).

    `prepared_params` must come from prepare_params() (packed once, not per
    call).  Accumulation and softmax statistics are always f32; MXU operands
    use the dtype the params were prepared with (bf16 fast path / f32 exact).
    """
    if kv is None:
        kv = q
    B, Lq, D = q.shape
    Lk = kv.shape[1]
    assert D % n_heads == 0
    hd = D // n_heads
    wq_t, bq2, wk_t, bk2, wv_t, bv2, wo_h, bo2 = prepared_params
    cdt = wq_t.dtype
    out_dtype = q.dtype

    xq = q.astype(cdt)
    xkv = kv.astype(cdt)

    # ---- Generation-aware VMEM budget: ~85% of physical VMEM
    # (≈54 MiB on v7x's 64 MiB, ≈109 MiB on v5e/v6e's 128 MiB).
    vmem_cap = int(0.85 * _vmem_capacity_bytes())
    cdt_b = np.dtype(cdt).itemsize
    out_b = np.dtype(out_dtype).itemsize
    hd_phys = -(-hd // 128) * 128        # lane padding of the minor scratch dim

    def footprint(tq, tk):
        f = 0
        f += 2 * tq * D * cdt_b                              # xq block (x2 buf)
        f += 2 * Lk * D * cdt_b                              # xkv block (x2 buf)
        f += 2 * tq * D * out_b                              # out block (x2 buf)
        f += 2 * (3 * D * D + n_heads * hd * D) * cdt_b      # weights (conservative x2)
        f += 2 * 4 * D * 4                                   # biases (f32)
        f += n_heads * tq * hd_phys * cdt_b                  # qh scratch
        f += 2 * n_heads * Lk * hd_phys * cdt_b              # kh + vh scratch
        f += 3 * n_heads * tq * tk * 4                       # s / p temporaries (+slack)
        f += 2 * n_heads * tq * hd_phys * 4                  # online-softmax acc + ctx
        f += 2 * tq * D * 4                                  # output accumulation temps
        return f

    tq = q_tile if q_tile is not None else _pick_tile(Lq)
    tk = kv_chunk if kv_chunk is not None else _pick_tile(Lk)
    assert Lq % tq == 0 and Lk % tk == 0
    if q_tile is None and kv_chunk is None:
        while footprint(tq, tk) > vmem_cap:
            ntq = _shrink_tile(tq, Lq)
            if ntq != tq:
                tq = ntq
                continue
            ntk = _shrink_tile(tk, Lk)
            if ntk != tk:
                tk = ntk
                continue
            break   # cannot shrink further; let the compiler decide

    vmem_limit = int(min(max(int(1.25 * footprint(tq, tk)), 16 * 1024 * 1024),
                         vmem_cap))

    kernel = functools.partial(
        _mha_kernel, n_heads=n_heads, head_dim=hd, kv_len=Lk, kv_chunk=tk,
        compute_dtype=cdt, approx_recip=approx_softmax)

    def build(single_buffer):
        # Grid-invariant weights/biases: never re-fetched (constant block
        # index); single-buffering halves their VMEM footprint when supported.
        if single_buffer:
            def inv(shape, imap):
                return pl.BlockSpec(shape, imap, pipeline_mode=pl.Buffered(1))
        else:
            def inv(shape, imap):
                return pl.BlockSpec(shape, imap)

        w_spec = inv((D, D), lambda b, i: (0, 0))
        b_spec = inv((1, D), lambda b, i: (0, 0))
        wo_spec = inv((n_heads, hd, D), lambda b, i: (0, 0, 0))

        return pl.pallas_call(
            kernel,
            out_shape=jax.ShapeDtypeStruct((B, Lq, D), out_dtype),
            grid=(B, Lq // tq),
            in_specs=[
                pl.BlockSpec((1, tq, D), lambda b, i: (b, i, 0)),   # queries
                pl.BlockSpec((1, Lk, D), lambda b, i: (b, 0, 0)),   # keys/values
                w_spec, b_spec,     # w_q (scale folded), b_q (scale folded)
                w_spec, b_spec,     # w_k, b_k
                w_spec, b_spec,     # w_v, b_v
                wo_spec, b_spec,    # w_o packed as (H, head_dim, D), b_o
            ],
            out_specs=pl.BlockSpec((1, tq, D), lambda b, i: (b, i, 0)),
            scratch_shapes=[
                pltpu.VMEM((n_heads, tq, hd), cdt),   # q, heads-leading
                pltpu.VMEM((n_heads, Lk, hd), cdt),   # k, persistent per batch
                pltpu.VMEM((n_heads, Lk, hd), cdt),   # v, persistent per batch
            ],
            compiler_params=pltpu.CompilerParams(
                # Batch axis shards across TensorCores; the query-tile axis is
                # "arbitrary" so the per-batch K/V projection (pl.when on
                # program_id(1) == 0) runs before the tiles that reuse it.
                dimension_semantics=("parallel", "arbitrary"),
                vmem_limit_bytes=vmem_limit),
        )

    args = (xq, xkv, wq_t, bq2, wk_t, bk2, wv_t, bv2, wo_h, bo2)
    if single_buffer_weights:
        try:
            return build(True)(*args)
        except Exception:
            # pipeline_mode=pl.Buffered(1) not supported on this jax build:
            # fall back to default (double-buffered) weight specs.
            pass
    return build(False)(*args)


def _reference(q, kv, params, n_heads):
    """Pure-JAX reference mirroring the PyTorch module (eval mode)."""
    if kv is None:
        kv = q
    B, Lq, D = q.shape
    Lk = kv.shape[1]
    hd = D // n_heads
    wq, bq, wk, bk, wv, bv, wo, bo = params

    Q = q @ wq.T + bq
    K = kv @ wk.T + bk
    V = kv @ wv.T + bv
    Q = Q.reshape(B, Lq, n_heads, hd).transpose(0, 2, 1, 3)
    K = K.reshape(B, Lk, n_heads, hd).transpose(0, 2, 1, 3)
    V = V.reshape(B, Lk, n_heads, hd).transpose(0, 2, 1, 3)
    scores = jnp.einsum('bhld,bhmd->bhlm', Q, K) / math.sqrt(hd)
    attn = jax.nn.softmax(scores, axis=-1)
    ctx = jnp.einsum('bhlm,bhmd->bhld', attn, V)
    ctx = ctx.transpose(0, 2, 1, 3).reshape(B, Lq, D)
    return ctx @ wo.T + bo


def _init_params(key, qkv_dim):
    bound = 1.0 / math.sqrt(qkv_dim)
    keys = jax.random.split(key, 8)

    def u(k, shape):
        return jax.random.uniform(k, shape, jnp.float32, -bound, bound)

    wq = u(keys[0], (qkv_dim, qkv_dim)); bq = u(keys[1], (qkv_dim,))
    wk = u(keys[2], (qkv_dim, qkv_dim)); bk = u(keys[3], (qkv_dim,))
    wv = u(keys[4], (qkv_dim, qkv_dim)); bv = u(keys[5], (qkv_dim,))
    wo = u(keys[6], (qkv_dim, qkv_dim)); bo = u(keys[7], (qkv_dim,))
    return (wq, bq, wk, bk, wv, bv, wo, bo)


if __name__ == "__main__":
    key = jax.random.PRNGKey(0)
    k_x, k_p, k_kv = jax.random.split(key, 3)

    # --- Case 1: self-attention (B=2, L=8, D=32, 8 heads -> head_dim=4).
    B, L, D = 2, 8, 32
    n_heads = 8
    x = jax.random.normal(k_x, (B, L, D), jnp.float32)
    params = _init_params(k_p, D)
    ref = _reference(x, None, params, n_heads)

    # Exact path: f32 MXU operands + exact reciprocal (tight numerical check).
    prep_f32 = prepare_params(params, n_heads, compute_dtype=jnp.float32)
    out_exact = jax.block_until_ready(
        multi_head_attention(x, None, prep_f32, n_heads, approx_softmax=False))
    assert out_exact.shape == (B, L, D)
    err = jnp.max(jnp.abs(out_exact - ref))
    assert jnp.allclose(out_exact, ref, atol=1e-4, rtol=1e-4), (
        f"f32 max abs diff = {err}")

    # Default fast path: bf16 MXU operands + approximate EUP reciprocal.
    prep_bf16 = prepare_params(params, n_heads, compute_dtype=jnp.bfloat16)
    out_fast = jax.block_until_ready(
        multi_head_attention(x, None, prep_bf16, n_heads))
    assert out_fast.shape == (B, L, D)
    diff = jnp.max(jnp.abs(out_fast.astype(jnp.float32) - ref))
    assert jnp.allclose(out_fast.astype(jnp.float32), ref,
                        atol=7e-2, rtol=7e-2), f"bf16 max abs diff = {diff}"

    # --- Case 2: cross-attention with multiple query tiles and kv chunks,
    # exercising the once-per-batch K/V projection (pl.when + persistent
    # scratch) and the online-softmax chunk loop.
    B2, Lq2, Lk2 = 2, 16, 16
    xq2 = jax.random.normal(k_x, (B2, Lq2, D), jnp.float32)
    xkv2 = jax.random.normal(k_kv, (B2, Lk2, D), jnp.float32)
    ref2 = _reference(xq2, xkv2, params, n_heads)
    out2 = jax.block_until_ready(
        multi_head_attention(xq2, xkv2, prep_f32, n_heads,
                             approx_softmax=False, q_tile=8, kv_chunk=8))
    err2 = jnp.max(jnp.abs(out2 - ref2))
    assert jnp.allclose(out2, ref2, atol=1e-4, rtol=1e-4), (
        f"case2 max abs diff = {err2}")

    print("KERNEL_OK")
</pallas_src>

<mosaic_0001>
module attributes {stable_mosaic.version = 11 : i64} {
  func.func @_mha_kernel(%arg0: i32, %arg1: i32, %arg2: memref<1x8x32xf32, #tpu.memory_space<vmem>>, %arg3: memref<1x8x32xf32, #tpu.memory_space<vmem>>, %arg4: memref<32x32xf32, #tpu.memory_space<vmem>>, %arg5: memref<1x32xf32, #tpu.memory_space<vmem>>, %arg6: memref<32x32xf32, #tpu.memory_space<vmem>>, %arg7: memref<1x32xf32, #tpu.memory_space<vmem>>, %arg8: memref<32x32xf32, #tpu.memory_space<vmem>>, %arg9: memref<1x32xf32, #tpu.memory_space<vmem>>, %arg10: memref<8x4x32xf32, #tpu.memory_space<vmem>>, %arg11: memref<1x32xf32, #tpu.memory_space<vmem>>, %arg12: memref<1x8x32xf32, #tpu.memory_space<vmem>>, %arg13: memref<8x8x4xf32, #tpu.memory_space<vmem>>, %arg14: memref<8x8x4xf32, #tpu.memory_space<vmem>>, %arg15: memref<8x8x4xf32, #tpu.memory_space<vmem>>) attributes {dimension_semantics = [#tpu.dimension_semantics<parallel>, #tpu.dimension_semantics<arbitrary>], iteration_bounds = array<i64: 2, 1>, scalar_prefetch = 0 : i64, scratch_operands = 3 : i64, tpu.core_type = #tpu.core_type<tc>, window_params = [{transform_indices = @transform_0, window_bounds = array<i64: 1, 8, 32>}, {transform_indices = @transform_1, window_bounds = array<i64: 1, 8, 32>}, {pipeline_mode = #tpu.pipeline_mode<synchronous>, transform_indices = @transform_2, window_bounds = array<i64: 32, 32>}, {pipeline_mode = #tpu.pipeline_mode<synchronous>, transform_indices = @transform_3, window_bounds = array<i64: 1, 32>}, {pipeline_mode = #tpu.pipeline_mode<synchronous>, transform_indices = @transform_4, window_bounds = array<i64: 32, 32>}, {pipeline_mode = #tpu.pipeline_mode<synchronous>, transform_indices = @transform_5, window_bounds = array<i64: 1, 32>}, {pipeline_mode = #tpu.pipeline_mode<synchronous>, transform_indices = @transform_6, window_bounds = array<i64: 32, 32>}, {pipeline_mode = #tpu.pipeline_mode<synchronous>, transform_indices = @transform_7, window_bounds = array<i64: 1, 32>}, {pipeline_mode = #tpu.pipeline_mode<synchronous>, transform_indices = @transform_8, window_bounds = array<i64: 8, 4, 32>}, {pipeline_mode = #tpu.pipeline_mode<synchronous>, transform_indices = @transform_9, window_bounds = array<i64: 1, 32>}, {transform_indices = @transform_10, window_bounds = array<i64: 1, 8, 32>}]} {
    %c0_i32 = arith.constant 0 : i32
    %0 = arith.cmpi eq, %arg1, %c0_i32 : i32
    %1 = arith.extui %0 : i1 to i32
    %c0_i32_0 = arith.constant 0 : i32
    %2 = arith.cmpi ne, %1, %c0_i32_0 : i32
    scf.if %2 {
      %c0_75 = arith.constant 0 : index
      %c0_76 = arith.constant 0 : index
      %c0_77 = arith.constant 0 : index
      %116 = vector.load %arg3[%c0_75, %c0_76, %c0_77] : memref<1x8x32xf32, #tpu.memory_space<vmem>>, vector<1x8x32xf32>
      %117 = vector.shape_cast %116 : vector<1x8x32xf32> to vector<8x32xf32>
      %c0_78 = arith.constant 0 : index
      %c0_79 = arith.constant 0 : index
      %118 = vector.load %arg6[%c0_78, %c0_79] : memref<32x32xf32, #tpu.memory_space<vmem>>, vector<32x32xf32>
      %cst_80 = arith.constant dense<0.000000e+00> : vector<8x32xf32>
      %119 = tpu.matmul %117, %118, %cst_80 {dimension_numbers = #tpu.dot_dimension_numbers<[1], [0], [0], [1], [0, 0, 1, 1], [], []>} : vector<8x32xf32>, vector<32x32xf32>, vector<8x32xf32> -> vector<8x32xf32>
      %c0_81 = arith.constant 0 : index
      %c0_82 = arith.constant 0 : index
      %120 = vector.load %arg7[%c0_81, %c0_82] : memref<1x32xf32, #tpu.memory_space<vmem>>, vector<1x32xf32>
      %121 = vector.shape_cast %120 : vector<1x32xf32> to vector<32xf32>
      %122 = vector.shape_cast %121 : vector<32xf32> to vector<1x32xf32>
      %123 = vector.broadcast %122 : vector<1x32xf32> to vector<8x32xf32>
      %124 = arith.addf %119, %123 : vector<8x32xf32>
      %c0_83 = arith.constant 0 : index
      %c0_84 = arith.constant 0 : index
      %125 = vector.load %arg8[%c0_83, %c0_84] : memref<32x32xf32, #tpu.memory_space<vmem>>, vector<32x32xf32>
      %cst_85 = arith.constant dense<0.000000e+00> : vector<8x32xf32>
      %126 = tpu.matmul %117, %125, %cst_85 {dimension_numbers = #tpu.dot_dimension_numbers<[1], [0], [0], [1], [0, 0, 1, 1], [], []>} : vector<8x32xf32>, vector<32x32xf32>, vector<8x32xf32> -> vector<8x32xf32>
      %c0_86 = arith.constant 0 : index
      %c0_87 = arith.constant 0 : index
      %127 = vector.load %arg9[%c0_86, %c0_87] : memref<1x32xf32, #tpu.memory_space<vmem>>, vector<1x32xf32>
      %128 = vector.shape_cast %127 : vector<1x32xf32> to vector<32xf32>
      %129 = vector.shape_cast %128 : vector<32xf32> to vector<1x32xf32>
      %130 = vector.broadcast %129 : vector<1x32xf32> to vector<8x32xf32>
      %131 = arith.addf %126, %130 : vector<8x32xf32>
      %132 = vector.extract_strided_slice %124 {offsets = [0, 0], sizes = [8, 4], strides = [1, 1]} : vector<8x32xf32> to vector<8x4xf32>
      %c0_88 = arith.constant 0 : index
      %c0_89 = arith.constant 0 : index
      %c0_90 = arith.constant 0 : index
      %133 = vector.load %arg14[%c0_88, %c0_89, %c0_90] : memref<8x8x4xf32, #tpu.memory_space<vmem>>, vector<1x8x4xf32>
      %134 = vector.shape_cast %133 : vector<1x8x4xf32> to vector<8x4xf32>
      %135 = vector.shape_cast %132 : vector<8x4xf32> to vector<1x8x4xf32>
      tpu.vector_store %arg14[%c0_88, %c0_89, %c0_90], %135 {strides = array<i32>} : memref<8x8x4xf32, #tpu.memory_space<vmem>>, vector<1x8x4xf32>,
      %136 = vector.extract_strided_slice %131 {offsets = [0, 0], sizes = [8, 4], strides = [1, 1]} : vector<8x32xf32> to vector<8x4xf32>
      %c0_91 = arith.constant 0 : index
      %c0_92 = arith.constant 0 : index
      %c0_93 = arith.constant 0 : index
      %137 = vector.load %arg15[%c0_91, %c0_92, %c0_93] : memref<8x8x4xf32, #tpu.memory_space<vmem>>, vector<1x8x4xf32>
      %138 = vector.shape_cast %137 : vector<1x8x4xf32> to vector<8x4xf32>
      %139 = vector.shape_cast %136 : vector<8x4xf32> to vector<1x8x4xf32>
      tpu.vector_store %arg15[%c0_91, %c0_92, %c0_93], %139 {strides = array<i32>} : memref<8x8x4xf32, #tpu.memory_space<vmem>>, vector<1x8x4xf32>,
      %140 = vector.extract_strided_slice %124 {offsets = [0, 4], sizes = [8, 4], strides = [1, 1]} : vector<8x32xf32> to vector<8x4xf32>
      %c1_94 = arith.constant 1 : index
      %c0_95 = arith.constant 0 : index
      %c0_96 = arith.constant 0 : index
      %141 = vector.load %arg14[%c1_94, %c0_95, %c0_96] : memref<8x8x4xf32, #tpu.memory_space<vmem>>, vector<1x8x4xf32>
      %142 = vector.shape_cast %141 : vector<1x8x4xf32> to vector<8x4xf32>
      %143 = vector.shape_cast %140 : vector<8x4xf32> to vector<1x8x4xf32>
      tpu.vector_store %arg14[%c1_94, %c0_95, %c0_96], %143 {strides = array<i32>} : memref<8x8x4xf32, #tpu.memory_space<vmem>>, vector<1x8x4xf32>,
      %144 = vector.extract_strided_slice %131 {offsets = [0, 4], sizes = [8, 4], strides = [1, 1]} : vector<8x32xf32> to vector<8x4xf32>
      %c1_97 = arith.constant 1 : index
      %c0_98 = arith.constant 0 : index
      %c0_99 = arith.constant 0 : index
      %145 = vector.load %arg15[%c1_97, %c0_98, %c0_99] : memref<8x8x4xf32, #tpu.memory_space<vmem>>, vector<1x8x4xf32>
      %146 = vector.shape_cast %145 : vector<1x8x4xf32> to vector<8x4xf32>
      %147 = vector.shape_cast %144 : vector<8x4xf32> to vector<1x8x4xf32>
      tpu.vector_store %arg15[%c1_97, %c0_98, %c0_99], %147 {strides = array<i32>} : memref<8x8x4xf32, #tpu.memory_space<vmem>>, vector<1x8x4xf32>,
      %148 = vector.extract_strided_slice %124 {offsets = [0, 8], sizes = [8, 4], strides = [1, 1]} : vector<8x32xf32> to vector<8x4xf32>
      %c2_100 = arith.constant 2 : index
      %c0_101 = arith.constant 0 : index
      %c0_102 = arith.constant 0 : index
      %149 = vector.load %arg14[%c2_100, %c0_101, %c0_102] : memref<8x8x4xf32, #tpu.memory_space<vmem>>, vector<1x8x4xf32>
      %150 = vector.shape_cast %149 : vector<1x8x4xf32> to vector<8x4xf32>
      %151 = vector.shape_cast %148 : vector<8x4xf32> to vector<1x8x4xf32>
      tpu.vector_store %arg14[%c2_100, %c0_101, %c0_102], %151 {strides = array<i32>} : memref<8x8x4xf32, #tpu.memory_space<vmem>>, vector<1x8x4xf32>,
      %152 = vector.extract_strided_slice %131 {offsets = [0, 8], sizes = [8, 4], strides = [1, 1]} : vector<8x32xf32> to vector<8x4xf32>
      %c2_103 = arith.constant 2 : index
      %c0_104 = arith.constant 0 : index
      %c0_105 = arith.constant 0 : index
      %153 = vector.load %arg15[%c2_103, %c0_104, %c0_105] : memref<8x8x4xf32, #tpu.memory_space<vmem>>, vector<1x8x4xf32>
      %154 = vector.shape_cast %153 : vector<1x8x4xf32> to vector<8x4xf32>
      %155 = vector.shape_cast %152 : vector<8x4xf32> to vector<1x8x4xf32>
      tpu.vector_store %arg15[%c2_103, %c0_104, %c0_105], %155 {strides = array<i32>} : memref<8x8x4xf32, #tpu.memory_space<vmem>>, vector<1x8x4xf32>,
      %156 = vector.extract_strided_slice %124 {offsets = [0, 12], sizes = [8, 4], strides = [1, 1]} : vector<8x32xf32> to vector<8x4xf32>
      %c3_106 = arith.constant 3 : index
      %c0_107 = arith.constant 0 : index
      %c0_108 = arith.constant 0 : index
      %157 = vector.load %arg14[%c3_106, %c0_107, %c0_108] : memref<8x8x4xf32, #tpu.memory_space<vmem>>, vector<1x8x4xf32>
      %158 = vector.shape_cast %157 : vector<1x8x4xf32> to vector<8x4xf32>
      %159 = vector.shape_cast %156 : vector<8x4xf32> to vector<1x8x4xf32>
      tpu.vector_store %arg14[%c3_106, %c0_107, %c0_108], %159 {strides = array<i32>} : memref<8x8x4xf32, #tpu.memory_space<vmem>>, vector<1x8x4xf32>,
      %160 = vector.extract_strided_slice %131 {offsets = [0, 12], sizes = [8, 4], strides = [1, 1]} : vector<8x32xf32> to vector<8x4xf32>
      %c3_109 = arith.constant 3 : index
      %c0_110 = arith.constant 0 : index
      %c0_111 = arith.constant 0 : index
      %161 = vector.load %arg15[%c3_109, %c0_110, %c0_111] : memref<8x8x4xf32, #tpu.memory_space<vmem>>, vector<1x8x4xf32>
      %162 = vector.shape_cast %161 : vector<1x8x4xf32> to vector<8x4xf32>
      %163 = vector.shape_cast %160 : vector<8x4xf32> to vector<1x8x4xf32>
      tpu.vector_store %arg15[%c3_109, %c0_110, %c0_111], %163 {strides = array<i32>} : memref<8x8x4xf32, #tpu.memory_space<vmem>>, vector<1x8x4xf32>,
      %164 = vector.extract_strided_slice %124 {offsets = [0, 16], sizes = [8, 4], strides = [1, 1]} : vector<8x32xf32> to vector<8x4xf32>
      %c4_112 = arith.constant 4 : index
      %c0_113 = arith.constant 0 : index
      %c0_114 = arith.constant 0 : index
      %165 = vector.load %arg14[%c4_112, %c0_113, %c0_114] : memref<8x8x4xf32, #tpu.memory_space<vmem>>, vector<1x8x4xf32>
      %166 = vector.shape_cast %165 : vector<1x8x4xf32> to vector<8x4xf32>
      %167 = vector.shape_cast %164 : vector<8x4xf32> to vector<1x8x4xf32>
      tpu.vector_store %arg14[%c4_112, %c0_113, %c0_114], %167 {strides = array<i32>} : memref<8x8x4xf32, #tpu.memory_space<vmem>>, vector<1x8x4xf32>,
      %168 = vector.extract_strided_slice %131 {offsets = [0, 16], sizes = [8, 4], strides = [1, 1]} : vector<8x32xf32> to vector<8x4xf32>
      %c4_115 = arith.constant 4 : index
      %c0_116 = arith.constant 0 : index
      %c0_117 = arith.constant 0 : index
      %169 = vector.load %arg15[%c4_115, %c0_116, %c0_117] : memref<8x8x4xf32, #tpu.memory_space<vmem>>, vector<1x8x4xf32>
      %170 = vector.shape_cast %169 : vector<1x8x4xf32> to vector<8x4xf32>
      %171 = vector.shape_cast %168 : vector<8x4xf32> to vector<1x8x4xf32>
      tpu.vector_store %arg15[%c4_115, %c0_116, %c0_117], %171 {strides = array<i32>} : memref<8x8x4xf32, #tpu.memory_space<vmem>>, vector<1x8x4xf32>,
      %172 = vector.extract_strided_slice %124 {offsets = [0, 20], sizes = [8, 4], strides = [1, 1]} : vector<8x32xf32> to vector<8x4xf32>
      %c5_118 = arith.constant 5 : index
      %c0_119 = arith.constant 0 : index
      %c0_120 = arith.constant 0 : index
      %173 = vector.load %arg14[%c5_118, %c0_119, %c0_120] : memref<8x8x4xf32, #tpu.memory_space<vmem>>, vector<1x8x4xf32>
      %174 = vector.shape_cast %173 : vector<1x8x4xf32> to vector<8x4xf32>
      %175 = vector.shape_cast %172 : vector<8x4xf32> to vector<1x8x4xf32>
      tpu.vector_store %arg14[%c5_118, %c0_119, %c0_120], %175 {strides = array<i32>} : memref<8x8x4xf32, #tpu.memory_space<vmem>>, vector<1x8x4xf32>,
      %176 = vector.extract_strided_slice %131 {offsets = [0, 20], sizes = [8, 4], strides = [1, 1]} : vector<8x32xf32> to vector<8x4xf32>
      %c5_121 = arith.constant 5 : index
      %c0_122 = arith.constant 0 : index
      %c0_123 = arith.constant 0 : index
      %177 = vector.load %arg15[%c5_121, %c0_122, %c0_123] : memref<8x8x4xf32, #tpu.memory_space<vmem>>, vector<1x8x4xf32>
      %178 = vector.shape_cast %177 : vector<1x8x4xf32> to vector<8x4xf32>
      %179 = vector.shape_cast %176 : vector<8x4xf32> to vector<1x8x4xf32>
      tpu.vector_store %arg15[%c5_121, %c0_122, %c0_123], %179 {strides = array<i32>} : memref<8x8x4xf32, #tpu.memory_space<vmem>>, vector<1x8x4xf32>,
      %180 = vector.extract_strided_slice %124 {offsets = [0, 24], sizes = [8, 4], strides = [1, 1]} : vector<8x32xf32> to vector<8x4xf32>
      %c6_124 = arith.constant 6 : index
      %c0_125 = arith.constant 0 : index
      %c0_126 = arith.constant 0 : index
      %181 = vector.load %arg14[%c6_124, %c0_125, %c0_126] : memref<8x8x4xf32, #tpu.memory_space<vmem>>, vector<1x8x4xf32>
      %182 = vector.shape_cast %181 : vector<1x8x4xf32> to vector<8x4xf32>
      %183 = vector.shape_cast %180 : vector<8x4xf32> to vector<1x8x4xf32>
      tpu.vector_store %arg14[%c6_124, %c0_125, %c0_126], %183 {strides = array<i32>} : memref<8x8x4xf32, #tpu.memory_space<vmem>>, vector<1x8x4xf32>,
      %184 = vector.extract_strided_slice %131 {offsets = [0, 24], sizes = [8, 4], strides = [1, 1]} : vector<8x32xf32> to vector<8x4xf32>
      %c6_127 = arith.constant 6 : index
      %c0_128 = arith.constant 0 : index
      %c0_129 = arith.constant 0 : index
      %185 = vector.load %arg15[%c6_127, %c0_128, %c0_129] : memref<8x8x4xf32, #tpu.memory_space<vmem>>, vector<1x8x4xf32>
      %186 = vector.shape_cast %185 : vector<1x8x4xf32> to vector<8x4xf32>
      %187 = vector.shape_cast %184 : vector<8x4xf32> to vector<1x8x4xf32>
      tpu.vector_store %arg15[%c6_127, %c0_128, %c0_129], %187 {strides = array<i32>} : memref<8x8x4xf32, #tpu.memory_space<vmem>>, vector<1x8x4xf32>,
      %188 = vector.extract_strided_slice %124 {offsets = [0, 28], sizes = [8, 4], strides = [1, 1]} : vector<8x32xf32> to vector<8x4xf32>
      %c7_130 = arith.constant 7 : index
      %c0_131 = arith.constant 0 : index
      %c0_132 = arith.constant 0 : index
      %189 = vector.load %arg14[%c7_130, %c0_131, %c0_132] : memref<8x8x4xf32, #tpu.memory_space<vmem>>, vector<1x8x4xf32>
      %190 = vector.shape_cast %189 : vector<1x8x4xf32> to vector<8x4xf32>
      %191 = vector.shape_cast %188 : vector<8x4xf32> to vector<1x8x4xf32>
      tpu.vector_store %arg14[%c7_130, %c0_131, %c0_132], %191 {strides = array<i32>} : memref<8x8x4xf32, #tpu.memory_space<vmem>>, vector<1x8x4xf32>,
      %192 = vector.extract_strided_slice %131 {offsets = [0, 28], sizes = [8, 4], strides = [1, 1]} : vector<8x32xf32> to vector<8x4xf32>
      %c7_133 = arith.constant 7 : index
      %c0_134 = arith.constant 0 : index
      %c0_135 = arith.constant 0 : index
      %193 = vector.load %arg15[%c7_133, %c0_134, %c0_135] : memref<8x8x4xf32, #tpu.memory_space<vmem>>, vector<1x8x4xf32>
      %194 = vector.shape_cast %193 : vector<1x8x4xf32> to vector<8x4xf32>
      %195 = vector.shape_cast %192 : vector<8x4xf32> to vector<1x8x4xf32>
      tpu.vector_store %arg15[%c7_133, %c0_134, %c0_135], %195 {strides = array<i32>} : memref<8x8x4xf32, #tpu.memory_space<vmem>>, vector<1x8x4xf32>,
    } else {
    }
    %c0 = arith.constant 0 : index
    %c0_1 = arith.constant 0 : index
    %c0_2 = arith.constant 0 : index
    %3 = vector.load %arg2[%c0, %c0_1, %c0_2] : memref<1x8x32xf32, #tpu.memory_space<vmem>>, vector<1x8x32xf32>
    %4 = vector.shape_cast %3 : vector<1x8x32xf32> to vector<8x32xf32>
    %c0_3 = arith.constant 0 : index
    %c0_4 = arith.constant 0 : index
    %5 = vector.load %arg4[%c0_3, %c0_4] : memref<32x32xf32, #tpu.memory_space<vmem>>, vector<32x32xf32>
    %cst = arith.constant dense<0.000000e+00> : vector<8x32xf32>
    %6 = tpu.matmul %4, %5, %cst {dimension_numbers = #tpu.dot_dimension_numbers<[1], [0], [0], [1], [0, 0, 1, 1], [], []>} : vector<8x32xf32>, vector<32x32xf32>, vector<8x32xf32> -> vector<8x32xf32>
    %c0_5 = arith.constant 0 : index
    %c0_6 = arith.constant 0 : index
    %7 = vector.load %arg5[%c0_5, %c0_6] : memref<1x32xf32, #tpu.memory_space<vmem>>, vector<1x32xf32>
    %8 = vector.shape_cast %7 : vector<1x32xf32> to vector<32xf32>
    %9 = vector.shape_cast %8 : vector<32xf32> to vector<1x32xf32>
    %10 = vector.broadcast %9 : vector<1x32xf32> to vector<8x32xf32>
    %11 = arith.addf %6, %10 : vector<8x32xf32>
    %12 = vector.extract_strided_slice %11 {offsets = [0, 0], sizes = [8, 4], strides = [1, 1]} : vector<8x32xf32> to vector<8x4xf32>
    %c0_7 = arith.constant 0 : index
    %c0_8 = arith.constant 0 : index
    %c0_9 = arith.constant 0 : index
    %13 = vector.load %arg13[%c0_7, %c0_8, %c0_9] : memref<8x8x4xf32, #tpu.memory_space<vmem>>, vector<1x8x4xf32>
    %14 = vector.shape_cast %13 : vector<1x8x4xf32> to vector<8x4xf32>
    %15 = vector.shape_cast %12 : vector<8x4xf32> to vector<1x8x4xf32>
    tpu.vector_store %arg13[%c0_7, %c0_8, %c0_9], %15 {strides = array<i32>} : memref<8x8x4xf32, #tpu.memory_space<vmem>>, vector<1x8x4xf32>,
    %16 = vector.extract_strided_slice %11 {offsets = [0, 4], sizes = [8, 4], strides = [1, 1]} : vector<8x32xf32> to vector<8x4xf32>
    %c1 = arith.constant 1 : index
    %c0_10 = arith.constant 0 : index
    %c0_11 = arith.constant 0 : index
    %17 = vector.load %arg13[%c1, %c0_10, %c0_11] : memref<8x8x4xf32, #tpu.memory_space<vmem>>, vector<1x8x4xf32>
    %18 = vector.shape_cast %17 : vector<1x8x4xf32> to vector<8x4xf32>
    %19 = vector.shape_cast %16 : vector<8x4xf32> to vector<1x8x4xf32>
    tpu.vector_store %arg13[%c1, %c0_10, %c0_11], %19 {strides = array<i32>} : memref<8x8x4xf32, #tpu.memory_space<vmem>>, vector<1x8x4xf32>,
    %20 = vector.extract_strided_slice %11 {offsets = [0, 8], sizes = [8, 4], strides = [1, 1]} : vector<8x32xf32> to vector<8x4xf32>
    %c2 = arith.constant 2 : index
    %c0_12 = arith.constant 0 : index
    %c0_13 = arith.constant 0 : index
    %21 = vector.load %arg13[%c2, %c0_12, %c0_13] : memref<8x8x4xf32, #tpu.memory_space<vmem>>, vector<1x8x4xf32>
    %22 = vector.shape_cast %21 : vector<1x8x4xf32> to vector<8x4xf32>
    %23 = vector.shape_cast %20 : vector<8x4xf32> to vector<1x8x4xf32>
    tpu.vector_store %arg13[%c2, %c0_12, %c0_13], %23 {strides = array<i32>} : memref<8x8x4xf32, #tpu.memory_space<vmem>>, vector<1x8x4xf32>,
    %24 = vector.extract_strided_slice %11 {offsets = [0, 12], sizes = [8, 4], strides = [1, 1]} : vector<8x32xf32> to vector<8x4xf32>
    %c3 = arith.constant 3 : index
    %c0_14 = arith.constant 0 : index
    %c0_15 = arith.constant 0 : index
    %25 = vector.load %arg13[%c3, %c0_14, %c0_15] : memref<8x8x4xf32, #tpu.memory_space<vmem>>, vector<1x8x4xf32>
    %26 = vector.shape_cast %25 : vector<1x8x4xf32> to vector<8x4xf32>
    %27 = vector.shape_cast %24 : vector<8x4xf32> to vector<1x8x4xf32>
    tpu.vector_store %arg13[%c3, %c0_14, %c0_15], %27 {strides = array<i32>} : memref<8x8x4xf32, #tpu.memory_space<vmem>>, vector<1x8x4xf32>,
    %28 = vector.extract_strided_slice %11 {offsets = [0, 16], sizes = [8, 4], strides = [1, 1]} : vector<8x32xf32> to vector<8x4xf32>
    %c4 = arith.constant 4 : index
    %c0_16 = arith.constant 0 : index
    %c0_17 = arith.constant 0 : index
    %29 = vector.load %arg13[%c4, %c0_16, %c0_17] : memref<8x8x4xf32, #tpu.memory_space<vmem>>, vector<1x8x4xf32>
    %30 = vector.shape_cast %29 : vector<1x8x4xf32> to vector<8x4xf32>
    %31 = vector.shape_cast %28 : vector<8x4xf32> to vector<1x8x4xf32>
    tpu.vector_store %arg13[%c4, %c0_16, %c0_17], %31 {strides = array<i32>} : memref<8x8x4xf32, #tpu.memory_space<vmem>>, vector<1x8x4xf32>,
    %32 = vector.extract_strided_slice %11 {offsets = [0, 20], sizes = [8, 4], strides = [1, 1]} : vector<8x32xf32> to vector<8x4xf32>
    %c5 = arith.constant 5 : index
    %c0_18 = arith.constant 0 : index
    %c0_19 = arith.constant 0 : index
    %33 = vector.load %arg13[%c5, %c0_18, %c0_19] : memref<8x8x4xf32, #tpu.memory_space<vmem>>, vector<1x8x4xf32>
    %34 = vector.shape_cast %33 : vector<1x8x4xf32> to vector<8x4xf32>
    %35 = vector.shape_cast %32 : vector<8x4xf32> to vector<1x8x4xf32>
    tpu.vector_store %arg13[%c5, %c0_18, %c0_19], %35 {strides = array<i32>} : memref<8x8x4xf32, #tpu.memory_space<vmem>>, vector<1x8x4xf32>,
    %36 = vector.extract_strided_slice %11 {offsets = [0, 24], sizes = [8, 4], strides = [1, 1]} : vector<8x32xf32> to vector<8x4xf32>
    %c6 = arith.constant 6 : index
    %c0_20 = arith.constant 0 : index
    %c0_21 = arith.constant 0 : index
    %37 = vector.load %arg13[%c6, %c0_20, %c0_21] : memref<8x8x4xf32, #tpu.memory_space<vmem>>, vector<1x8x4xf32>
    %38 = vector.shape_cast %37 : vector<1x8x4xf32> to vector<8x4xf32>
    %39 = vector.shape_cast %36 : vector<8x4xf32> to vector<1x8x4xf32>
    tpu.vector_store %arg13[%c6, %c0_20, %c0_21], %39 {strides = array<i32>} : memref<8x8x4xf32, #tpu.memory_space<vmem>>, vector<1x8x4xf32>,
    %40 = vector.extract_strided_slice %11 {offsets = [0, 28], sizes = [8, 4], strides = [1, 1]} : vector<8x32xf32> to vector<8x4xf32>
    %c7 = arith.constant 7 : index
    %c0_22 = arith.constant 0 : index
    %c0_23 = arith.constant 0 : index
    %41 = vector.load %arg13[%c7, %c0_22, %c0_23] : memref<8x8x4xf32, #tpu.memory_space<vmem>>, vector<1x8x4xf32>
    %42 = vector.shape_cast %41 : vector<1x8x4xf32> to vector<8x4xf32>
    %43 = vector.shape_cast %40 : vector<8x4xf32> to vector<1x8x4xf32>
    tpu.vector_store %arg13[%c7, %c0_22, %c0_23], %43 {strides = array<i32>} : memref<8x8x4xf32, #tpu.memory_space<vmem>>, vector<1x8x4xf32>,
    %c0_24 = arith.constant 0 : index
    %c0_25 = arith.constant 0 : index
    %c0_26 = arith.constant 0 : index
    %44 = vector.load %arg13[%c0_24, %c0_25, %c0_26] : memref<8x8x4xf32, #tpu.memory_space<vmem>>, vector<8x8x4xf32>
    %c0_27 = arith.constant 0 : index
    %c0_28 = arith.constant 0 : index
    %c0_29 = arith.constant 0 : index
    %45 = vector.load %arg14[%c0_27, %c0_28, %c0_29] : memref<8x8x4xf32, #tpu.memory_space<vmem>>, vector<8x8x4xf32>
    %c0_30 = arith.constant 0 : index
    %c0_31 = arith.constant 0 : index
    %c0_32 = arith.constant 0 : index
    %46 = vector.load %arg15[%c0_30, %c0_31, %c0_32] : memref<8x8x4xf32, #tpu.memory_space<vmem>>, vector<8x8x4xf32>
    "tpu.trace_start"() <{level = 10 : i32, message = "hqd,hkd->hqk"}> : () -> ()
    %cst_33 = arith.constant dense<0.000000e+00> : vector<8x8x8xf32>
    %47 = tpu.matmul %44, %45, %cst_33 {dimension_numbers = #tpu.dot_dimension_numbers<[2], [2], [1], [1], [0, 0, 0, 1, 1, 1], [0], [0]>} : vector<8x8x4xf32>, vector<8x8x4xf32>, vector<8x8x8xf32> -> vector<8x8x8xf32>
    "tpu.trace_stop"() : () -> ()
    %cst_34 = arith.constant dense<0xFF800000> : vector<8x8xf32>
    %48 = vector.multi_reduction <maximumf>, %47, %cst_34 [2] : vector<8x8x8xf32> to vector<8x8xf32>
    %49 = vector.shape_cast %48 : vector<8x8xf32> to vector<8x8x1xf32>
    %50 = vector.broadcast %49 : vector<8x8x1xf32> to vector<8x8x8xf32>
    %51 = arith.subf %47, %50 : vector<8x8x8xf32>
    %52 = math.exp %51 : vector<8x8x8xf32>
    %cst_35 = arith.constant dense<0.000000e+00> : vector<8x8xf32>
    %53 = vector.multi_reduction <add>, %52, %cst_35 [2] : vector<8x8x8xf32> to vector<8x8xf32>
    %54 = vector.shape_cast %53 : vector<8x8xf32> to vector<8x8x1xf32>
    "tpu.trace_start"() <{level = 10 : i32, message = "hqk,hkd->hqd"}> : () -> ()
    %cst_36 = arith.constant dense<0.000000e+00> : vector<8x8x4xf32>
    %55 = tpu.matmul %52, %46, %cst_36 {dimension_numbers = #tpu.dot_dimension_numbers<[2], [1], [1], [2], [0, 0, 0, 1, 1, 2], [0], [0]>} : vector<8x8x8xf32>, vector<8x8x4xf32>, vector<8x8x4xf32> -> vector<8x8x4xf32>
    "tpu.trace_stop"() : () -> ()
    %56 = tpu.reciprocal %54 : vector<8x8x1xf32> -> vector<8x8x1xf32>
    %57 = vector.broadcast %56 : vector<8x8x1xf32> to vector<8x8x4xf32>
    %58 = arith.mulf %55, %57 : vector<8x8x4xf32>
    %cst_37 = arith.constant 0.000000e+00 : f32
    %59 = vector.broadcast %cst_37 : f32 to vector<8x32xf32>
    %60 = vector.extract_strided_slice %58 {offsets = [0, 0, 0], sizes = [1, 8, 4], strides = [1, 1, 1]} : vector<8x8x4xf32> to vector<1x8x4xf32>
    %61 = vector.shape_cast %60 : vector<1x8x4xf32> to vector<8x4xf32>
    %c0_38 = arith.constant 0 : index
    %c0_39 = arith.constant 0 : index
    %c0_40 = arith.constant 0 : index
    %62 = vector.load %arg10[%c0_38, %c0_39, %c0_40] : memref<8x4x32xf32, #tpu.memory_space<vmem>>, vector<1x4x32xf32>
    %63 = vector.shape_cast %62 : vector<1x4x32xf32> to vector<4x32xf32>
    %cst_41 = arith.constant dense<0.000000e+00> : vector<8x32xf32>
    %64 = tpu.matmul %61, %63, %cst_41 {dimension_numbers = #tpu.dot_dimension_numbers<[1], [0], [0], [1], [0, 0, 1, 1], [], []>} : vector<8x4xf32>, vector<4x32xf32>, vector<8x32xf32> -> vector<8x32xf32>
    %65 = arith.addf %59, %64 : vector<8x32xf32>
    %66 = vector.extract_strided_slice %58 {offsets = [1, 0, 0], sizes = [1, 8, 4], strides = [1, 1, 1]} : vector<8x8x4xf32> to vector<1x8x4xf32>
    %67 = vector.shape_cast %66 : vector<1x8x4xf32> to vector<8x4xf32>
    %c1_42 = arith.constant 1 : index
    %c0_43 = arith.constant 0 : index
    %c0_44 = arith.constant 0 : index
    %68 = vector.load %arg10[%c1_42, %c0_43, %c0_44] : memref<8x4x32xf32, #tpu.memory_space<vmem>>, vector<1x4x32xf32>
    %69 = vector.shape_cast %68 : vector<1x4x32xf32> to vector<4x32xf32>
    %cst_45 = arith.constant dense<0.000000e+00> : vector<8x32xf32>
    %70 = tpu.matmul %67, %69, %cst_45 {dimension_numbers = #tpu.dot_dimension_numbers<[1], [0], [0], [1], [0, 0, 1, 1], [], []>} : vector<8x4xf32>, vector<4x32xf32>, vector<8x32xf32> -> vector<8x32xf32>
    %71 = arith.addf %65, %70 : vector<8x32xf32>
    %72 = vector.extract_strided_slice %58 {offsets = [2, 0, 0], sizes = [1, 8, 4], strides = [1, 1, 1]} : vector<8x8x4xf32> to vector<1x8x4xf32>
    %73 = vector.shape_cast %72 : vector<1x8x4xf32> to vector<8x4xf32>
    %c2_46 = arith.constant 2 : index
    %c0_47 = arith.constant 0 : index
    %c0_48 = arith.constant 0 : index
    %74 = vector.load %arg10[%c2_46, %c0_47, %c0_48] : memref<8x4x32xf32, #tpu.memory_space<vmem>>, vector<1x4x32xf32>
    %75 = vector.shape_cast %74 : vector<1x4x32xf32> to vector<4x32xf32>
    %cst_49 = arith.constant dense<0.000000e+00> : vector<8x32xf32>
    %76 = tpu.matmul %73, %75, %cst_49 {dimension_numbers = #tpu.dot_dimension_numbers<[1], [0], [0], [1], [0, 0, 1, 1], [], []>} : vector<8x4xf32>, vector<4x32xf32>, vector<8x32xf32> -> vector<8x32xf32>
    %77 = arith.addf %71, %76 : vector<8x32xf32>
    %78 = vector.extract_strided_slice %58 {offsets = [3, 0, 0], sizes = [1, 8, 4], strides = [1, 1, 1]} : vector<8x8x4xf32> to vector<1x8x4xf32>
    %79 = vector.shape_cast %78 : vector<1x8x4xf32> to vector<8x4xf32>
    %c3_50 = arith.constant 3 : index
    %c0_51 = arith.constant 0 : index
    %c0_52 = arith.constant 0 : index
    %80 = vector.load %arg10[%c3_50, %c0_51, %c0_52] : memref<8x4x32xf32, #tpu.memory_space<vmem>>, vector<1x4x32xf32>
    %81 = vector.shape_cast %80 : vector<1x4x32xf32> to vector<4x32xf32>
    %cst_53 = arith.constant dense<0.000000e+00> : vector<8x32xf32>
    %82 = tpu.matmul %79, %81, %cst_53 {dimension_numbers = #tpu.dot_dimension_numbers<[1], [0], [0], [1], [0, 0, 1, 1], [], []>} : vector<8x4xf32>, vector<4x32xf32>, vector<8x32xf32> -> vector<8x32xf32>
    %83 = arith.addf %77, %82 : vector<8x32xf32>
    %84 = vector.extract_strided_slice %58 {offsets = [4, 0, 0], sizes = [1, 8, 4], strides = [1, 1, 1]} : vector<8x8x4xf32> to vector<1x8x4xf32>
    %85 = vector.shape_cast %84 : vector<1x8x4xf32> to vector<8x4xf32>
    %c4_54 = arith.constant 4 : index
    %c0_55 = arith.constant 0 : index
    %c0_56 = arith.constant 0 : index
    %86 = vector.load %arg10[%c4_54, %c0_55, %c0_56] : memref<8x4x32xf32, #tpu.memory_space<vmem>>, vector<1x4x32xf32>
    %87 = vector.shape_cast %86 : vector<1x4x32xf32> to vector<4x32xf32>
    %cst_57 = arith.constant dense<0.000000e+00> : vector<8x32xf32>
    %88 = tpu.matmul %85, %87, %cst_57 {dimension_numbers = #tpu.dot_dimension_numbers<[1], [0], [0], [1], [0, 0, 1, 1], [], []>} : vector<8x4xf32>, vector<4x32xf32>, vector<8x32xf32> -> vector<8x32xf32>
    %89 = arith.addf %83, %88 : vector<8x32xf32>
    %90 = vector.extract_strided_slice %58 {offsets = [5, 0, 0], sizes = [1, 8, 4], strides = [1, 1, 1]} : vector<8x8x4xf32> to vector<1x8x4xf32>
    %91 = vector.shape_cast %90 : vector<1x8x4xf32> to vector<8x4xf32>
    %c5_58 = arith.constant 5 : index
    %c0_59 = arith.constant 0 : index
    %c0_60 = arith.constant 0 : index
    %92 = vector.load %arg10[%c5_58, %c0_59, %c0_60] : memref<8x4x32xf32, #tpu.memory_space<vmem>>, vector<1x4x32xf32>
    %93 = vector.shape_cast %92 : vector<1x4x32xf32> to vector<4x32xf32>
    %cst_61 = arith.constant dense<0.000000e+00> : vector<8x32xf32>
    %94 = tpu.matmul %91, %93, %cst_61 {dimension_numbers = #tpu.dot_dimension_numbers<[1], [0], [0], [1], [0, 0, 1, 1], [], []>} : vector<8x4xf32>, vector<4x32xf32>, vector<8x32xf32> -> vector<8x32xf32>
    %95 = arith.addf %89, %94 : vector<8x32xf32>
    %96 = vector.extract_strided_slice %58 {offsets = [6, 0, 0], sizes = [1, 8, 4], strides = [1, 1, 1]} : vector<8x8x4xf32> to vector<1x8x4xf32>
    %97 = vector.shape_cast %96 : vector<1x8x4xf32> to vector<8x4xf32>
    %c6_62 = arith.constant 6 : index
    %c0_63 = arith.constant 0 : index
    %c0_64 = arith.constant 0 : index
    %98 = vector.load %arg10[%c6_62, %c0_63, %c0_64] : memref<8x4x32xf32, #tpu.memory_space<vmem>>, vector<1x4x32xf32>
    %99 = vector.shape_cast %98 : vector<1x4x32xf32> to vector<4x32xf32>
    %cst_65 = arith.constant dense<0.000000e+00> : vector<8x32xf32>
    %100 = tpu.matmul %97, %99, %cst_65 {dimension_numbers = #tpu.dot_dimension_numbers<[1], [0], [0], [1], [0, 0, 1, 1], [], []>} : vector<8x4xf32>, vector<4x32xf32>, vector<8x32xf32> -> vector<8x32xf32>
    %101 = arith.addf %95, %100 : vector<8x32xf32>
    %102 = vector.extract_strided_slice %58 {offsets = [7, 0, 0], sizes = [1, 8, 4], strides = [1, 1, 1]} : vector<8x8x4xf32> to vector<1x8x4xf32>
    %103 = vector.shape_cast %102 : vector<1x8x4xf32> to vector<8x4xf32>
    %c7_66 = arith.constant 7 : index
    %c0_67 = arith.constant 0 : index
    %c0_68 = arith.constant 0 : index
    %104 = vector.load %arg10[%c7_66, %c0_67, %c0_68] : memref<8x4x32xf32, #tpu.memory_space<vmem>>, vector<1x4x32xf32>
    %105 = vector.shape_cast %104 : vector<1x4x32xf32> to vector<4x32xf32>
    %cst_69 = arith.constant dense<0.000000e+00> : vector<8x32xf32>
    %106 = tpu.matmul %103, %105, %cst_69 {dimension_numbers = #tpu.dot_dimension_numbers<[1], [0], [0], [1], [0, 0, 1, 1], [], []>} : vector<8x4xf32>, vector<4x32xf32>, vector<8x32xf32> -> vector<8x32xf32>
    %107 = arith.addf %101, %106 : vector<8x32xf32>
    %c0_70 = arith.constant 0 : index
    %c0_71 = arith.constant 0 : index
    %108 = vector.load %arg11[%c0_70, %c0_71] : memref<1x32xf32, #tpu.memory_space<vmem>>, vector<1x32xf32>
    %109 = vector.shape_cast %108 : vector<1x32xf32> to vector<32xf32>
    %110 = vector.shape_cast %109 : vector<32xf32> to vector<1x32xf32>
    %111 = vector.broadcast %110 : vector<1x32xf32> to vector<8x32xf32>
    %112 = arith.addf %107, %111 : vector<8x32xf32>
    %c0_72 = arith.constant 0 : index
    %c0_73 = arith.constant 0 : index
    %c0_74 = arith.constant 0 : index
    %113 = vector.load %arg12[%c0_72, %c0_73, %c0_74] : memref<1x8x32xf32, #tpu.memory_space<vmem>>, vector<1x8x32xf32>
    %114 = vector.shape_cast %113 : vector<1x8x32xf32> to vector<8x32xf32>
    %115 = vector.shape_cast %112 : vector<8x32xf32> to vector<1x8x32xf32>
    tpu.vector_store %arg12[%c0_72, %c0_73, %c0_74], %115 {strides = array<i32>} : memref<1x8x32xf32, #tpu.memory_space<vmem>>, vector<1x8x32xf32>,
    return
  }
  func.func @transform_0(%arg0: i32, %arg1: i32) -> (i32, i32, i32) {
    %c0_i32 = arith.constant 0 : i32
    %c0_i32_0 = arith.constant 0 : i32
    return %arg0, %arg1, %c0_i32 : i32, i32, i32
  }
  func.func @transform_1(%arg0: i32, %arg1: i32) -> (i32, i32, i32) {
    %c0_i32 = arith.constant 0 : i32
    %c0_i32_0 = arith.constant 0 : i32
    %c0_i32_1 = arith.constant 0 : i32
    return %arg0, %c0_i32, %c0_i32_0 : i32, i32, i32
  }
  func.func @transform_2(%arg0: i32, %arg1: i32) -> (i32, i32) {
    %c0_i32 = arith.constant 0 : i32
    %c0_i32_0 = arith.constant 0 : i32
    %c0_i32_1 = arith.constant 0 : i32
    return %c0_i32, %c0_i32_0 : i32, i32
  }
  func.func @transform_3(%arg0: i32, %arg1: i32) -> (i32, i32) {
    %c0_i32 = arith.constant 0 : i32
    %c0_i32_0 = arith.constant 0 : i32
    %c0_i32_1 = arith.constant 0 : i32
    return %c0_i32, %c0_i32_0 : i32, i32
  }
  func.func @transform_4(%arg0: i32, %arg1: i32) -> (i32, i32) {
    %c0_i32 = arith.constant 0 : i32
    %c0_i32_0 = arith.constant 0 : i32
    %c0_i32_1 = arith.constant 0 : i32
    return %c0_i32, %c0_i32_0 : i32, i32
  }
  func.func @transform_5(%arg0: i32, %arg1: i32) -> (i32, i32) {
    %c0_i32 = arith.constant 0 : i32
    %c0_i32_0 = arith.constant 0 : i32
    %c0_i32_1 = arith.constant 0 : i32
    return %c0_i32, %c0_i32_0 : i32, i32
  }
  func.func @transform_6(%arg0: i32, %arg1: i32) -> (i32, i32) {
    %c0_i32 = arith.constant 0 : i32
    %c0_i32_0 = arith.constant 0 : i32
    %c0_i32_1 = arith.constant 0 : i32
    return %c0_i32, %c0_i32_0 : i32, i32
  }
  func.func @transform_7(%arg0: i32, %arg1: i32) -> (i32, i32) {
    %c0_i32 = arith.constant 0 : i32
    %c0_i32_0 = arith.constant 0 : i32
    %c0_i32_1 = arith.constant 0 : i32
    return %c0_i32, %c0_i32_0 : i32, i32
  }
  func.func @transform_8(%arg0: i32, %arg1: i32) -> (i32, i32, i32) {
    %c0_i32 = arith.constant 0 : i32
    %c0_i32_0 = arith.constant 0 : i32
    %c0_i32_1 = arith.constant 0 : i32
    %c0_i32_2 = arith.constant 0 : i32
    return %c0_i32, %c0_i32_0, %c0_i32_1 : i32, i32, i32
  }
  func.func @transform_9(%arg0: i32, %arg1: i32) -> (i32, i32) {
    %c0_i32 = arith.constant 0 : i32
    %c0_i32_0 = arith.constant 0 : i32
    %c0_i32_1 = arith.constant 0 : i32
    return %c0_i32, %c0_i32_0 : i32, i32
  }
  func.func @transform_10(%arg0: i32, %arg1: i32) -> (i32, i32, i32) {
    %c0_i32 = arith.constant 0 : i32
    %c0_i32_0 = arith.constant 0 : i32
    return %arg0, %arg1, %c0_i32 : i32, i32, i32
  }
}

module attributes {stable_mosaic.version = 11 : i64} {
  func.func @_mha_kernel(%arg0: i32, %arg1: i32, %arg2: memref<1x8x32xf32, #tpu.memory_space<vmem>>, %arg3: memref<1x8x32xf32, #tpu.memory_space<vmem>>, %arg4: memref<32x32xf32, #tpu.memory_space<vmem>>, %arg5: memref<1x32xf32, #tpu.memory_space<vmem>>, %arg6: memref<32x32xf32, #tpu.memory_space<vmem>>, %arg7: memref<1x32xf32, #tpu.memory_space<vmem>>, %arg8: memref<32x32xf32, #tpu.memory_space<vmem>>, %arg9: memref<1x32xf32, #tpu.memory_space<vmem>>, %arg10: memref<8x4x32xf32, #tpu.memory_space<vmem>>, %arg11: memref<1x32xf32, #tpu.memory_space<vmem>>, %arg12: memref<1x8x32xf32, #tpu.memory_space<vmem>>, %arg13: memref<8x8x4xf32, #tpu.memory_space<vmem>>, %arg14: memref<8x8x4xf32, #tpu.memory_space<vmem>>, %arg15: memref<8x8x4xf32, #tpu.memory_space<vmem>>) attributes {dimension_semantics = [#tpu.dimension_semantics<parallel>, #tpu.dimension_semantics<arbitrary>], iteration_bounds = array<i64: 2, 1>, scalar_prefetch = 0 : i64, scratch_operands = 3 : i64, tpu.core_type = #tpu.core_type<tc>, window_params = [{transform_indices = @transform_0, window_bounds = array<i64: 1, 8, 32>}, {transform_indices = @transform_1, window_bounds = array<i64: 1, 8, 32>}, {pipeline_mode = #tpu.pipeline_mode<synchronous>, transform_indices = @transform_2, window_bounds = array<i64: 32, 32>}, {pipeline_mode = #tpu.pipeline_mode<synchronous>, transform_indices = @transform_3, window_bounds = array<i64: 1, 32>}, {pipeline_mode = #tpu.pipeline_mode<synchronous>, transform_indices = @transform_4, window_bounds = array<i64: 32, 32>}, {pipeline_mode = #tpu.pipeline_mode<synchronous>, transform_indices = @transform_5, window_bounds = array<i64: 1, 32>}, {pipeline_mode = #tpu.pipeline_mode<synchronous>, transform_indices = @transform_6, window_bounds = array<i64: 32, 32>}, {pipeline_mode = #tpu.pipeline_mode<synchronous>, transform_indices = @transform_7, window_bounds = array<i64: 1, 32>}, {pipeline_mode = #tpu.pipeline_mode<synchronous>, transform_indices = @transform_8, window_bounds = array<i64: 8, 4, 32>}, {pipeline_mode = #tpu.pipeline_mode<synchronous>, transform_indices = @transform_9, window_bounds = array<i64: 1, 32>}, {transform_indices = @transform_10, window_bounds = array<i64: 1, 8, 32>}]} {
    %c0_i32 = arith.constant 0 : i32
    %0 = arith.cmpi eq, %arg1, %c0_i32 : i32
    %1 = arith.extui %0 : i1 to i32
    %c0_i32_0 = arith.constant 0 : i32
    %2 = arith.cmpi ne, %1, %c0_i32_0 : i32
    scf.if %2 {
      %c0_75 = arith.constant 0 : index
      %c0_76 = arith.constant 0 : index
      %c0_77 = arith.constant 0 : index
      %116 = vector.load %arg3[%c0_75, %c0_76, %c0_77] : memref<1x8x32xf32, #tpu.memory_space<vmem>>, vector<1x8x32xf32>
      %117 = vector.shape_cast %116 : vector<1x8x32xf32> to vector<8x32xf32>
      %c0_78 = arith.constant 0 : index
      %c0_79 = arith.constant 0 : index
      %118 = vector.load %arg6[%c0_78, %c0_79] : memref<32x32xf32, #tpu.memory_space<vmem>>, vector<32x32xf32>
      %cst_80 = arith.constant dense<0.000000e+00> : vector<8x32xf32>
      %119 = tpu.matmul %117, %118, %cst_80 {dimension_numbers = #tpu.dot_dimension_numbers<[1], [0], [0], [1], [0, 0, 1, 1], [], []>} : vector<8x32xf32>, vector<32x32xf32>, vector<8x32xf32> -> vector<8x32xf32>
      %c0_81 = arith.constant 0 : index
      %c0_82 = arith.constant 0 : index
      %120 = vector.load %arg7[%c0_81, %c0_82] : memref<1x32xf32, #tpu.memory_space<vmem>>, vector<1x32xf32>
      %121 = vector.shape_cast %120 : vector<1x32xf32> to vector<32xf32>
      %122 = vector.shape_cast %121 : vector<32xf32> to vector<1x32xf32>
      %123 = vector.broadcast %122 : vector<1x32xf32> to vector<8x32xf32>
      %124 = arith.addf %119, %123 : vector<8x32xf32>
      %c0_83 = arith.constant 0 : index
      %c0_84 = arith.constant 0 : index
      %125 = vector.load %arg8[%c0_83, %c0_84] : memref<32x32xf32, #tpu.memory_space<vmem>>, vector<32x32xf32>
      %cst_85 = arith.constant dense<0.000000e+00> : vector<8x32xf32>
      %126 = tpu.matmul %117, %125, %cst_85 {dimension_numbers = #tpu.dot_dimension_numbers<[1], [0], [0], [1], [0, 0, 1, 1], [], []>} : vector<8x32xf32>, vector<32x32xf32>, vector<8x32xf32> -> vector<8x32xf32>
      %c0_86 = arith.constant 0 : index
      %c0_87 = arith.constant 0 : index
      %127 = vector.load %arg9[%c0_86, %c0_87] : memref<1x32xf32, #tpu.memory_space<vmem>>, vector<1x32xf32>
      %128 = vector.shape_cast %127 : vector<1x32xf32> to vector<32xf32>
      %129 = vector.shape_cast %128 : vector<32xf32> to vector<1x32xf32>
      %130 = vector.broadcast %129 : vector<1x32xf32> to vector<8x32xf32>
      %131 = arith.addf %126, %130 : vector<8x32xf32>
      %132 = vector.extract_strided_slice %124 {offsets = [0, 0], sizes = [8, 4], strides = [1, 1]} : vector<8x32xf32> to vector<8x4xf32>
      %c0_88 = arith.constant 0 : index
      %c0_89 = arith.constant 0 : index
      %c0_90 = arith.constant 0 : index
      %133 = vector.load %arg14[%c0_88, %c0_89, %c0_90] : memref<8x8x4xf32, #tpu.memory_space<vmem>>, vector<1x8x4xf32>
      %134 = vector.shape_cast %133 : vector<1x8x4xf32> to vector<8x4xf32>
      %135 = vector.shape_cast %132 : vector<8x4xf32> to vector<1x8x4xf32>
      tpu.vector_store %arg14[%c0_88, %c0_89, %c0_90], %135 {strides = array<i32>} : memref<8x8x4xf32, #tpu.memory_space<vmem>>, vector<1x8x4xf32>,
      %136 = vector.extract_strided_slice %131 {offsets = [0, 0], sizes = [8, 4], strides = [1, 1]} : vector<8x32xf32> to vector<8x4xf32>
      %c0_91 = arith.constant 0 : index
      %c0_92 = arith.constant 0 : index
      %c0_93 = arith.constant 0 : index
      %137 = vector.load %arg15[%c0_91, %c0_92, %c0_93] : memref<8x8x4xf32, #tpu.memory_space<vmem>>, vector<1x8x4xf32>
      %138 = vector.shape_cast %137 : vector<1x8x4xf32> to vector<8x4xf32>
      %139 = vector.shape_cast %136 : vector<8x4xf32> to vector<1x8x4xf32>
      tpu.vector_store %arg15[%c0_91, %c0_92, %c0_93], %139 {strides = array<i32>} : memref<8x8x4xf32, #tpu.memory_space<vmem>>, vector<1x8x4xf32>,
      %140 = vector.extract_strided_slice %124 {offsets = [0, 4], sizes = [8, 4], strides = [1, 1]} : vector<8x32xf32> to vector<8x4xf32>
      %c1_94 = arith.constant 1 : index
      %c0_95 = arith.constant 0 : index
      %c0_96 = arith.constant 0 : index
      %141 = vector.load %arg14[%c1_94, %c0_95, %c0_96] : memref<8x8x4xf32, #tpu.memory_space<vmem>>, vector<1x8x4xf32>
      %142 = vector.shape_cast %141 : vector<1x8x4xf32> to vector<8x4xf32>
      %143 = vector.shape_cast %140 : vector<8x4xf32> to vector<1x8x4xf32>
      tpu.vector_store %arg14[%c1_94, %c0_95, %c0_96], %143 {strides = array<i32>} : memref<8x8x4xf32, #tpu.memory_space<vmem>>, vector<1x8x4xf32>,
      %144 = vector.extract_strided_slice %131 {offsets = [0, 4], sizes = [8, 4], strides = [1, 1]} : vector<8x32xf32> to vector<8x4xf32>
      %c1_97 = arith.constant 1 : index
      %c0_98 = arith.constant 0 : index
      %c0_99 = arith.constant 0 : index
      %145 = vector.load %arg15[%c1_97, %c0_98, %c0_99] : memref<8x8x4xf32, #tpu.memory_space<vmem>>, vector<1x8x4xf32>
      %146 = vector.shape_cast %145 : vector<1x8x4xf32> to vector<8x4xf32>
      %147 = vector.shape_cast %144 : vector<8x4xf32> to vector<1x8x4xf32>
      tpu.vector_store %arg15[%c1_97, %c0_98, %c0_99], %147 {strides = array<i32>} : memref<8x8x4xf32, #tpu.memory_space<vmem>>, vector<1x8x4xf32>,
      %148 = vector.extract_strided_slice %124 {offsets = [0, 8], sizes = [8, 4], strides = [1, 1]} : vector<8x32xf32> to vector<8x4xf32>
      %c2_100 = arith.constant 2 : index
      %c0_101 = arith.constant 0 : index
      %c0_102 = arith.constant 0 : index
      %149 = vector.load %arg14[%c2_100, %c0_101, %c0_102] : memref<8x8x4xf32, #tpu.memory_space<vmem>>, vector<1x8x4xf32>
      %150 = vector.shape_cast %149 : vector<1x8x4xf32> to vector<8x4xf32>
      %151 = vector.shape_cast %148 : vector<8x4xf32> to vector<1x8x4xf32>
      tpu.vector_store %arg14[%c2_100, %c0_101, %c0_102], %151 {strides = array<i32>} : memref<8x8x4xf32, #tpu.memory_space<vmem>>, vector<1x8x4xf32>,
      %152 = vector.extract_strided_slice %131 {offsets = [0, 8], sizes = [8, 4], strides = [1, 1]} : vector<8x32xf32> to vector<8x4xf32>
      %c2_103 = arith.constant 2 : index
      %c0_104 = arith.constant 0 : index
      %c0_105 = arith.constant 0 : index
      %153 = vector.load %arg15[%c2_103, %c0_104, %c0_105] : memref<8x8x4xf32, #tpu.memory_space<vmem>>, vector<1x8x4xf32>
      %154 = vector.shape_cast %153 : vector<1x8x4xf32> to vector<8x4xf32>
      %155 = vector.shape_cast %152 : vector<8x4xf32> to vector<1x8x4xf32>
      tpu.vector_store %arg15[%c2_103, %c0_104, %c0_105], %155 {strides = array<i32>} : memref<8x8x4xf32, #tpu.memory_space<vmem>>, vector<1x8x4xf32>,
      %156 = vector.extract_strided_slice %124 {offsets = [0, 12], sizes = [8, 4], strides = [1, 1]} : vector<8x32xf32> to vector<8x4xf32>
      %c3_106 = arith.constant 3 : index
      %c0_107 = arith.constant 0 : index
      %c0_108 = arith.constant 0 : index
      %157 = vector.load %arg14[%c3_106, %c0_107, %c0_108] : memref<8x8x4xf32, #tpu.memory_space<vmem>>, vector<1x8x4xf32>
      %158 = vector.shape_cast %157 : vector<1x8x4xf32> to vector<8x4xf32>
      %159 = vector.shape_cast %156 : vector<8x4xf32> to vector<1x8x4xf32>
      tpu.vector_store %arg14[%c3_106, %c0_107, %c0_108], %159 {strides = array<i32>} : memref<8x8x4xf32, #tpu.memory_space<vmem>>, vector<1x8x4xf32>,
      %160 = vector.extract_strided_slice %131 {offsets = [0, 12], sizes = [8, 4], strides = [1, 1]} : vector<8x32xf32> to vector<8x4xf32>
      %c3_109 = arith.constant 3 : index
      %c0_110 = arith.constant 0 : index
      %c0_111 = arith.constant 0 : index
      %161 = vector.load %arg15[%c3_109, %c0_110, %c0_111] : memref<8x8x4xf32, #tpu.memory_space<vmem>>, vector<1x8x4xf32>
      %162 = vector.shape_cast %161 : vector<1x8x4xf32> to vector<8x4xf32>
      %163 = vector.shape_cast %160 : vector<8x4xf32> to vector<1x8x4xf32>
      tpu.vector_store %arg15[%c3_109, %c0_110, %c0_111], %163 {strides = array<i32>} : memref<8x8x4xf32, #tpu.memory_space<vmem>>, vector<1x8x4xf32>,
      %164 = vector.extract_strided_slice %124 {offsets = [0, 16], sizes = [8, 4], strides = [1, 1]} : vector<8x32xf32> to vector<8x4xf32>
      %c4_112 = arith.constant 4 : index
      %c0_113 = arith.constant 0 : index
      %c0_114 = arith.constant 0 : index
      %165 = vector.load %arg14[%c4_112, %c0_113, %c0_114] : memref<8x8x4xf32, #tpu.memory_space<vmem>>, vector<1x8x4xf32>
      %166 = vector.shape_cast %165 : vector<1x8x4xf32> to vector<8x4xf32>
      %167 = vector.shape_cast %164 : vector<8x4xf32> to vector<1x8x4xf32>
      tpu.vector_store %arg14[%c4_112, %c0_113, %c0_114], %167 {strides = array<i32>} : memref<8x8x4xf32, #tpu.memory_space<vmem>>, vector<1x8x4xf32>,
      %168 = vector.extract_strided_slice %131 {offsets = [0, 16], sizes = [8, 4], strides = [1, 1]} : vector<8x32xf32> to vector<8x4xf32>
      %c4_115 = arith.constant 4 : index
      %c0_116 = arith.constant 0 : index
      %c0_117 = arith.constant 0 : index
      %169 = vector.load %arg15[%c4_115, %c0_116, %c0_117] : memref<8x8x4xf32, #tpu.memory_space<vmem>>, vector<1x8x4xf32>
      %170 = vector.shape_cast %169 : vector<1x8x4xf32> to vector<8x4xf32>
      %171 = vector.shape_cast %168 : vector<8x4xf32> to vector<1x8x4xf32>
      tpu.vector_store %arg15[%c4_115, %c0_116, %c0_117], %171 {strides = array<i32>} : memref<8x8x4xf32, #tpu.memory_space<vmem>>, vector<1x8x4xf32>,
      %172 = vector.extract_strided_slice %124 {offsets = [0, 20], sizes = [8, 4], strides = [1, 1]} : vector<8x32xf32> to vector<8x4xf32>
      %c5_118 = arith.constant 5 : index
      %c0_119 = arith.constant 0 : index
      %c0_120 = arith.constant 0 : index
      %173 = vector.load %arg14[%c5_118, %c0_119, %c0_120] : memref<8x8x4xf32, #tpu.memory_space<vmem>>, vector<1x8x4xf32>
      %174 = vector.shape_cast %173 : vector<1x8x4xf32> to vector<8x4xf32>
      %175 = vector.shape_cast %172 : vector<8x4xf32> to vector<1x8x4xf32>
      tpu.vector_store %arg14[%c5_118, %c0_119, %c0_120], %175 {strides = array<i32>} : memref<8x8x4xf32, #tpu.memory_space<vmem>>, vector<1x8x4xf32>,
      %176 = vector.extract_strided_slice %131 {offsets = [0, 20], sizes = [8, 4], strides = [1, 1]} : vector<8x32xf32> to vector<8x4xf32>
      %c5_121 = arith.constant 5 : index
      %c0_122 = arith.constant 0 : index
      %c0_123 = arith.constant 0 : index
      %177 = vector.load %arg15[%c5_121, %c0_122, %c0_123] : memref<8x8x4xf32, #tpu.memory_space<vmem>>, vector<1x8x4xf32>
      %178 = vector.shape_cast %177 : vector<1x8x4xf32> to vector<8x4xf32>
      %179 = vector.shape_cast %176 : vector<8x4xf32> to vector<1x8x4xf32>
      tpu.vector_store %arg15[%c5_121, %c0_122, %c0_123], %179 {strides = array<i32>} : memref<8x8x4xf32, #tpu.memory_space<vmem>>, vector<1x8x4xf32>,
      %180 = vector.extract_strided_slice %124 {offsets = [0, 24], sizes = [8, 4], strides = [1, 1]} : vector<8x32xf32> to vector<8x4xf32>
      %c6_124 = arith.constant 6 : index
      %c0_125 = arith.constant 0 : index
      %c0_126 = arith.constant 0 : index
      %181 = vector.load %arg14[%c6_124, %c0_125, %c0_126] : memref<8x8x4xf32, #tpu.memory_space<vmem>>, vector<1x8x4xf32>
      %182 = vector.shape_cast %181 : vector<1x8x4xf32> to vector<8x4xf32>
      %183 = vector.shape_cast %180 : vector<8x4xf32> to vector<1x8x4xf32>
      tpu.vector_store %arg14[%c6_124, %c0_125, %c0_126], %183 {strides = array<i32>} : memref<8x8x4xf32, #tpu.memory_space<vmem>>, vector<1x8x4xf32>,
      %184 = vector.extract_strided_slice %131 {offsets = [0, 24], sizes = [8, 4], strides = [1, 1]} : vector<8x32xf32> to vector<8x4xf32>
      %c6_127 = arith.constant 6 : index
      %c0_128 = arith.constant 0 : index
      %c0_129 = arith.constant 0 : index
      %185 = vector.load %arg15[%c6_127, %c0_128, %c0_129] : memref<8x8x4xf32, #tpu.memory_space<vmem>>, vector<1x8x4xf32>
      %186 = vector.shape_cast %185 : vector<1x8x4xf32> to vector<8x4xf32>
      %187 = vector.shape_cast %184 : vector<8x4xf32> to vector<1x8x4xf32>
      tpu.vector_store %arg15[%c6_127, %c0_128, %c0_129], %187 {strides = array<i32>} : memref<8x8x4xf32, #tpu.memory_space<vmem>>, vector<1x8x4xf32>,
      %188 = vector.extract_strided_slice %124 {offsets = [0, 28], sizes = [8, 4], strides = [1, 1]} : vector<8x32xf32> to vector<8x4xf32>
      %c7_130 = arith.constant 7 : index
      %c0_131 = arith.constant 0 : index
      %c0_132 = arith.constant 0 : index
      %189 = vector.load %arg14[%c7_130, %c0_131, %c0_132] : memref<8x8x4xf32, #tpu.memory_space<vmem>>, vector<1x8x4xf32>
      %190 = vector.shape_cast %189 : vector<1x8x4xf32> to vector<8x4xf32>
      %191 = vector.shape_cast %188 : vector<8x4xf32> to vector<1x8x4xf32>
      tpu.vector_store %arg14[%c7_130, %c0_131, %c0_132], %191 {strides = array<i32>} : memref<8x8x4xf32, #tpu.memory_space<vmem>>, vector<1x8x4xf32>,
      %192 = vector.extract_strided_slice %131 {offsets = [0, 28], sizes = [8, 4], strides = [1, 1]} : vector<8x32xf32> to vector<8x4xf32>
      %c7_133 = arith.constant 7 : index
      %c0_134 = arith.constant 0 : index
      %c0_135 = arith.constant 0 : index
      %193 = vector.load %arg15[%c7_133, %c0_134, %c0_135] : memref<8x8x4xf32, #tpu.memory_space<vmem>>, vector<1x8x4xf32>
      %194 = vector.shape_cast %193 : vector<1x8x4xf32> to vector<8x4xf32>
      %195 = vector.shape_cast %192 : vector<8x4xf32> to vector<1x8x4xf32>
      tpu.vector_store %arg15[%c7_133, %c0_134, %c0_135], %195 {strides = array<i32>} : memref<8x8x4xf32, #tpu.memory_space<vmem>>, vector<1x8x4xf32>,
    } else {
    }
    %c0 = arith.constant 0 : index
    %c0_1 = arith.constant 0 : index
    %c0_2 = arith.constant 0 : index
    %3 = vector.load %arg2[%c0, %c0_1, %c0_2] : memref<1x8x32xf32, #tpu.memory_space<vmem>>, vector<1x8x32xf32>
    %4 = vector.shape_cast %3 : vector<1x8x32xf32> to vector<8x32xf32>
    %c0_3 = arith.constant 0 : index
    %c0_4 = arith.constant 0 : index
    %5 = vector.load %arg4[%c0_3, %c0_4] : memref<32x32xf32, #tpu.memory_space<vmem>>, vector<32x32xf32>
    %cst = arith.constant dense<0.000000e+00> : vector<8x32xf32>
    %6 = tpu.matmul %4, %5, %cst {dimension_numbers = #tpu.dot_dimension_numbers<[1], [0], [0], [1], [0, 0, 1, 1], [], []>} : vector<8x32xf32>, vector<32x32xf32>, vector<8x32xf32> -> vector<8x32xf32>
    %c0_5 = arith.constant 0 : index
    %c0_6 = arith.constant 0 : index
    %7 = vector.load %arg5[%c0_5, %c0_6] : memref<1x32xf32, #tpu.memory_space<vmem>>, vector<1x32xf32>
    %8 = vector.shape_cast %7 : vector<1x32xf32> to vector<32xf32>
    %9 = vector.shape_cast %8 : vector<32xf32> to vector<1x32xf32>
    %10 = vector.broadcast %9 : vector<1x32xf32> to vector<8x32xf32>
    %11 = arith.addf %6, %10 : vector<8x32xf32>
    %12 = vector.extract_strided_slice %11 {offsets = [0, 0], sizes = [8, 4], strides = [1, 1]} : vector<8x32xf32> to vector<8x4xf32>
    %c0_7 = arith.constant 0 : index
    %c0_8 = arith.constant 0 : index
    %c0_9 = arith.constant 0 : index
    %13 = vector.load %arg13[%c0_7, %c0_8, %c0_9] : memref<8x8x4xf32, #tpu.memory_space<vmem>>, vector<1x8x4xf32>
    %14 = vector.shape_cast %13 : vector<1x8x4xf32> to vector<8x4xf32>
    %15 = vector.shape_cast %12 : vector<8x4xf32> to vector<1x8x4xf32>
    tpu.vector_store %arg13[%c0_7, %c0_8, %c0_9], %15 {strides = array<i32>} : memref<8x8x4xf32, #tpu.memory_space<vmem>>, vector<1x8x4xf32>,
    %16 = vector.extract_strided_slice %11 {offsets = [0, 4], sizes = [8, 4], strides = [1, 1]} : vector<8x32xf32> to vector<8x4xf32>
    %c1 = arith.constant 1 : index
    %c0_10 = arith.constant 0 : index
    %c0_11 = arith.constant 0 : index
    %17 = vector.load %arg13[%c1, %c0_10, %c0_11] : memref<8x8x4xf32, #tpu.memory_space<vmem>>, vector<1x8x4xf32>
    %18 = vector.shape_cast %17 : vector<1x8x4xf32> to vector<8x4xf32>
    %19 = vector.shape_cast %16 : vector<8x4xf32> to vector<1x8x4xf32>
    tpu.vector_store %arg13[%c1, %c0_10, %c0_11], %19 {strides = array<i32>} : memref<8x8x4xf32, #tpu.memory_space<vmem>>, vector<1x8x4xf32>,
    %20 = vector.extract_strided_slice %11 {offsets = [0, 8], sizes = [8, 4], strides = [1, 1]} : vector<8x32xf32> to vector<8x4xf32>
    %c2 = arith.constant 2 : index
    %c0_12 = arith.constant 0 : index
    %c0_13 = arith.constant 0 : index
    %21 = vector.load %arg13[%c2, %c0_12, %c0_13] : memref<8x8x4xf32, #tpu.memory_space<vmem>>, vector<1x8x4xf32>
    %22 = vector.shape_cast %21 : vector<1x8x4xf32> to vector<8x4xf32>
    %23 = vector.shape_cast %20 : vector<8x4xf32> to vector<1x8x4xf32>
    tpu.vector_store %arg13[%c2, %c0_12, %c0_13], %23 {strides = array<i32>} : memref<8x8x4xf32, #tpu.memory_space<vmem>>, vector<1x8x4xf32>,
    %24 = vector.extract_strided_slice %11 {offsets = [0, 12], sizes = [8, 4], strides = [1, 1]} : vector<8x32xf32> to vector<8x4xf32>
    %c3 = arith.constant 3 : index
    %c0_14 = arith.constant 0 : index
    %c0_15 = arith.constant 0 : index
    %25 = vector.load %arg13[%c3, %c0_14, %c0_15] : memref<8x8x4xf32, #tpu.memory_space<vmem>>, vector<1x8x4xf32>
    %26 = vector.shape_cast %25 : vector<1x8x4xf32> to vector<8x4xf32>
    %27 = vector.shape_cast %24 : vector<8x4xf32> to vector<1x8x4xf32>
    tpu.vector_store %arg13[%c3, %c0_14, %c0_15], %27 {strides = array<i32>} : memref<8x8x4xf32, #tpu.memory_space<vmem>>, vector<1x8x4xf32>,
    %28 = vector.extract_strided_slice %11 {offsets = [0, 16], sizes = [8, 4], strides = [1, 1]} : vector<8x32xf32> to vector<8x4xf32>
    %c4 = arith.constant 4 : index
    %c0_16 = arith.constant 0 : index
    %c0_17 = arith.constant 0 : index
    %29 = vector.load %arg13[%c4, %c0_16, %c0_17] : memref<8x8x4xf32, #tpu.memory_space<vmem>>, vector<1x8x4xf32>
    %30 = vector.shape_cast %29 : vector<1x8x4xf32> to vector<8x4xf32>
    %31 = vector.shape_cast %28 : vector<8x4xf32> to vector<1x8x4xf32>
    tpu.vector_store %arg13[%c4, %c0_16, %c0_17], %31 {strides = array<i32>} : memref<8x8x4xf32, #tpu.memory_space<vmem>>, vector<1x8x4xf32>,
    %32 = vector.extract_strided_slice %11 {offsets = [0, 20], sizes = [8, 4], strides = [1, 1]} : vector<8x32xf32> to vector<8x4xf32>
    %c5 = arith.constant 5 : index
    %c0_18 = arith.constant 0 : index
    %c0_19 = arith.constant 0 : index
    %33 = vector.load %arg13[%c5, %c0_18, %c0_19] : memref<8x8x4xf32, #tpu.memory_space<vmem>>, vector<1x8x4xf32>
    %34 = vector.shape_cast %33 : vector<1x8x4xf32> to vector<8x4xf32>
    %35 = vector.shape_cast %32 : vector<8x4xf32> to vector<1x8x4xf32>
    tpu.vector_store %arg13[%c5, %c0_18, %c0_19], %35 {strides = array<i32>} : memref<8x8x4xf32, #tpu.memory_space<vmem>>, vector<1x8x4xf32>,
    %36 = vector.extract_strided_slice %11 {offsets = [0, 24], sizes = [8, 4], strides = [1, 1]} : vector<8x32xf32> to vector<8x4xf32>
    %c6 = arith.constant 6 : index
    %c0_20 = arith.constant 0 : index
    %c0_21 = arith.constant 0 : index
    %37 = vector.load %arg13[%c6, %c0_20, %c0_21] : memref<8x8x4xf32, #tpu.memory_space<vmem>>, vector<1x8x4xf32>
    %38 = vector.shape_cast %37 : vector<1x8x4xf32> to vector<8x4xf32>
    %39 = vector.shape_cast %36 : vector<8x4xf32> to vector<1x8x4xf32>
    tpu.vector_store %arg13[%c6, %c0_20, %c0_21], %39 {strides = array<i32>} : memref<8x8x4xf32, #tpu.memory_space<vmem>>, vector<1x8x4xf32>,
    %40 = vector.extract_strided_slice %11 {offsets = [0, 28], sizes = [8, 4], strides = [1, 1]} : vector<8x32xf32> to vector<8x4xf32>
    %c7 = arith.constant 7 : index
    %c0_22 = arith.constant 0 : index
    %c0_23 = arith.constant 0 : index
    %41 = vector.load %arg13[%c7, %c0_22, %c0_23] : memref<8x8x4xf32, #tpu.memory_space<vmem>>, vector<1x8x4xf32>
    %42 = vector.shape_cast %41 : vector<1x8x4xf32> to vector<8x4xf32>
    %43 = vector.shape_cast %40 : vector<8x4xf32> to vector<1x8x4xf32>
    tpu.vector_store %arg13[%c7, %c0_22, %c0_23], %43 {strides = array<i32>} : memref<8x8x4xf32, #tpu.memory_space<vmem>>, vector<1x8x4xf32>,
    %c0_24 = arith.constant 0 : index
    %c0_25 = arith.constant 0 : index
    %c0_26 = arith.constant 0 : index
    %44 = vector.load %arg13[%c0_24, %c0_25, %c0_26] : memref<8x8x4xf32, #tpu.memory_space<vmem>>, vector<8x8x4xf32>
    %c0_27 = arith.constant 0 : index
    %c0_28 = arith.constant 0 : index
    %c0_29 = arith.constant 0 : index
    %45 = vector.load %arg14[%c0_27, %c0_28, %c0_29] : memref<8x8x4xf32, #tpu.memory_space<vmem>>, vector<8x8x4xf32>
    %c0_30 = arith.constant 0 : index
    %c0_31 = arith.constant 0 : index
    %c0_32 = arith.constant 0 : index
    %46 = vector.load %arg15[%c0_30, %c0_31, %c0_32] : memref<8x8x4xf32, #tpu.memory_space<vmem>>, vector<8x8x4xf32>
    "tpu.trace_start"() <{level = 10 : i32, message = "hqd,hkd->hqk"}> : () -> ()
    %cst_33 = arith.constant dense<0.000000e+00> : vector<8x8x8xf32>
    %47 = tpu.matmul %44, %45, %cst_33 {dimension_numbers = #tpu.dot_dimension_numbers<[2], [2], [1], [1], [0, 0, 0, 1, 1, 1], [0], [0]>} : vector<8x8x4xf32>, vector<8x8x4xf32>, vector<8x8x8xf32> -> vector<8x8x8xf32>
    "tpu.trace_stop"() : () -> ()
    %cst_34 = arith.constant dense<0xFF800000> : vector<8x8xf32>
    %48 = vector.multi_reduction <maximumf>, %47, %cst_34 [2] : vector<8x8x8xf32> to vector<8x8xf32>
    %49 = vector.shape_cast %48 : vector<8x8xf32> to vector<8x8x1xf32>
    %50 = vector.broadcast %49 : vector<8x8x1xf32> to vector<8x8x8xf32>
    %51 = arith.subf %47, %50 : vector<8x8x8xf32>
    %52 = math.exp %51 : vector<8x8x8xf32>
    %cst_35 = arith.constant dense<0.000000e+00> : vector<8x8xf32>
    %53 = vector.multi_reduction <add>, %52, %cst_35 [2] : vector<8x8x8xf32> to vector<8x8xf32>
    %54 = vector.shape_cast %53 : vector<8x8xf32> to vector<8x8x1xf32>
    "tpu.trace_start"() <{level = 10 : i32, message = "hqk,hkd->hqd"}> : () -> ()
    %cst_36 = arith.constant dense<0.000000e+00> : vector<8x8x4xf32>
    %55 = tpu.matmul %52, %46, %cst_36 {dimension_numbers = #tpu.dot_dimension_numbers<[2], [1], [1], [2], [0, 0, 0, 1, 1, 2], [0], [0]>} : vector<8x8x8xf32>, vector<8x8x4xf32>, vector<8x8x4xf32> -> vector<8x8x4xf32>
    "tpu.trace_stop"() : () -> ()
    %56 = tpu.reciprocal %54 : vector<8x8x1xf32> -> vector<8x8x1xf32>
    %57 = vector.broadcast %56 : vector<8x8x1xf32> to vector<8x8x4xf32>
    %58 = arith.mulf %55, %57 : vector<8x8x4xf32>
    %cst_37 = arith.constant 0.000000e+00 : f32
    %59 = vector.broadcast %cst_37 : f32 to vector<8x32xf32>
    %60 = vector.extract_strided_slice %58 {offsets = [0, 0, 0], sizes = [1, 8, 4], strides = [1, 1, 1]} : vector<8x8x4xf32> to vector<1x8x4xf32>
    %61 = vector.shape_cast %60 : vector<1x8x4xf32> to vector<8x4xf32>
    %c0_38 = arith.constant 0 : index
    %c0_39 = arith.constant 0 : index
    %c0_40 = arith.constant 0 : index
    %62 = vector.load %arg10[%c0_38, %c0_39, %c0_40] : memref<8x4x32xf32, #tpu.memory_space<vmem>>, vector<1x4x32xf32>
    %63 = vector.shape_cast %62 : vector<1x4x32xf32> to vector<4x32xf32>
    %cst_41 = arith.constant dense<0.000000e+00> : vector<8x32xf32>
    %64 = tpu.matmul %61, %63, %cst_41 {dimension_numbers = #tpu.dot_dimension_numbers<[1], [0], [0], [1], [0, 0, 1, 1], [], []>} : vector<8x4xf32>, vector<4x32xf32>, vector<8x32xf32> -> vector<8x32xf32>
    %65 = arith.addf %59, %64 : vector<8x32xf32>
    %66 = vector.extract_strided_slice %58 {offsets = [1, 0, 0], sizes = [1, 8, 4], strides = [1, 1, 1]} : vector<8x8x4xf32> to vector<1x8x4xf32>
    %67 = vector.shape_cast %66 : vector<1x8x4xf32> to vector<8x4xf32>
    %c1_42 = arith.constant 1 : index
    %c0_43 = arith.constant 0 : index
    %c0_44 = arith.constant 0 : index
    %68 = vector.load %arg10[%c1_42, %c0_43, %c0_44] : memref<8x4x32xf32, #tpu.memory_space<vmem>>, vector<1x4x32xf32>
    %69 = vector.shape_cast %68 : vector<1x4x32xf32> to vector<4x32xf32>
    %cst_45 = arith.constant dense<0.000000e+00> : vector<8x32xf32>
    %70 = tpu.matmul %67, %69, %cst_45 {dimension_numbers = #tpu.dot_dimension_numbers<[1], [0], [0], [1], [0, 0, 1, 1], [], []>} : vector<8x4xf32>, vector<4x32xf32>, vector<8x32xf32> -> vector<8x32xf32>
    %71 = arith.addf %65, %70 : vector<8x32xf32>
    %72 = vector.extract_strided_slice %58 {offsets = [2, 0, 0], sizes = [1, 8, 4], strides = [1, 1, 1]} : vector<8x8x4xf32> to vector<1x8x4xf32>
    %73 = vector.shape_cast %72 : vector<1x8x4xf32> to vector<8x4xf32>
    %c2_46 = arith.constant 2 : index
    %c0_47 = arith.constant 0 : index
    %c0_48 = arith.constant 0 : index
    %74 = vector.load %arg10[%c2_46, %c0_47, %c0_48] : memref<8x4x32xf32, #tpu.memory_space<vmem>>, vector<1x4x32xf32>
    %75 = vector.shape_cast %74 : vector<1x4x32xf32> to vector<4x32xf32>
    %cst_49 = arith.constant dense<0.000000e+00> : vector<8x32xf32>
    %76 = tpu.matmul %73, %75, %cst_49 {dimension_numbers = #tpu.dot_dimension_numbers<[1], [0], [0], [1], [0, 0, 1, 1], [], []>} : vector<8x4xf32>, vector<4x32xf32>, vector<8x32xf32> -> vector<8x32xf32>
    %77 = arith.addf %71, %76 : vector<8x32xf32>
    %78 = vector.extract_strided_slice %58 {offsets = [3, 0, 0], sizes = [1, 8, 4], strides = [1, 1, 1]} : vector<8x8x4xf32> to vector<1x8x4xf32>
    %79 = vector.shape_cast %78 : vector<1x8x4xf32> to vector<8x4xf32>
    %c3_50 = arith.constant 3 : index
    %c0_51 = arith.constant 0 : index
    %c0_52 = arith.constant 0 : index
    %80 = vector.load %arg10[%c3_50, %c0_51, %c0_52] : memref<8x4x32xf32, #tpu.memory_space<vmem>>, vector<1x4x32xf32>
    %81 = vector.shape_cast %80 : vector<1x4x32xf32> to vector<4x32xf32>
    %cst_53 = arith.constant dense<0.000000e+00> : vector<8x32xf32>
    %82 = tpu.matmul %79, %81, %cst_53 {dimension_numbers = #tpu.dot_dimension_numbers<[1], [0], [0], [1], [0, 0, 1, 1], [], []>} : vector<8x4xf32>, vector<4x32xf32>, vector<8x32xf32> -> vector<8x32xf32>
    %83 = arith.addf %77, %82 : vector<8x32xf32>
    %84 = vector.extract_strided_slice %58 {offsets = [4, 0, 0], sizes = [1, 8, 4], strides = [1, 1, 1]} : vector<8x8x4xf32> to vector<1x8x4xf32>
    %85 = vector.shape_cast %84 : vector<1x8x4xf32> to vector<8x4xf32>
    %c4_54 = arith.constant 4 : index
    %c0_55 = arith.constant 0 : index
    %c0_56 = arith.constant 0 : index
    %86 = vector.load %arg10[%c4_54, %c0_55, %c0_56] : memref<8x4x32xf32, #tpu.memory_space<vmem>>, vector<1x4x32xf32>
    %87 = vector.shape_cast %86 : vector<1x4x32xf32> to vector<4x32xf32>
    %cst_57 = arith.constant dense<0.000000e+00> : vector<8x32xf32>
    %88 = tpu.matmul %85, %87, %cst_57 {dimension_numbers = #tpu.dot_dimension_numbers<[1], [0], [0], [1], [0, 0, 1, 1], [], []>} : vector<8x4xf32>, vector<4x32xf32>, vector<8x32xf32> -> vector<8x32xf32>
    %89 = arith.addf %83, %88 : vector<8x32xf32>
    %90 = vector.extract_strided_slice %58 {offsets = [5, 0, 0], sizes = [1, 8, 4], strides = [1, 1, 1]} : vector<8x8x4xf32> to vector<1x8x4xf32>
    %91 = vector.shape_cast %90 : vector<1x8x4xf32> to vector<8x4xf32>
    %c5_58 = arith.constant 5 : index
    %c0_59 = arith.constant 0 : index
    %c0_60 = arith.constant 0 : index
    %92 = vector.load %arg10[%c5_58, %c0_59, %c0_60] : memref<8x4x32xf32, #tpu.memory_space<vmem>>, vector<1x4x32xf32>
    %93 = vector.shape_cast %92 : vector<1x4x32xf32> to vector<4x32xf32>
    %cst_61 = arith.constant dense<0.000000e+00> : vector<8x32xf32>
    %94 = tpu.matmul %91, %93, %cst_61 {dimension_numbers = #tpu.dot_dimension_numbers<[1], [0], [0], [1], [0, 0, 1, 1], [], []>} : vector<8x4xf32>, vector<4x32xf32>, vector<8x32xf32> -> vector<8x32xf32>
    %95 = arith.addf %89, %94 : vector<8x32xf32>
    %96 = vector.extract_strided_slice %58 {offsets = [6, 0, 0], sizes = [1, 8, 4], strides = [1, 1, 1]} : vector<8x8x4xf32> to vector<1x8x4xf32>
    %97 = vector.shape_cast %96 : vector<1x8x4xf32> to vector<8x4xf32>
    %c6_62 = arith.constant 6 : index
    %c0_63 = arith.constant 0 : index
    %c0_64 = arith.constant 0 : index
    %98 = vector.load %arg10[%c6_62, %c0_63, %c0_64] : memref<8x4x32xf32, #tpu.memory_space<vmem>>, vector<1x4x32xf32>
    %99 = vector.shape_cast %98 : vector<1x4x32xf32> to vector<4x32xf32>
    %cst_65 = arith.constant dense<0.000000e+00> : vector<8x32xf32>
    %100 = tpu.matmul %97, %99, %cst_65 {dimension_numbers = #tpu.dot_dimension_numbers<[1], [0], [0], [1], [0, 0, 1, 1], [], []>} : vector<8x4xf32>, vector<4x32xf32>, vector<8x32xf32> -> vector<8x32xf32>
    %101 = arith.addf %95, %100 : vector<8x32xf32>
    %102 = vector.extract_strided_slice %58 {offsets = [7, 0, 0], sizes = [1, 8, 4], strides = [1, 1, 1]} : vector<8x8x4xf32> to vector<1x8x4xf32>
    %103 = vector.shape_cast %102 : vector<1x8x4xf32> to vector<8x4xf32>
    %c7_66 = arith.constant 7 : index
    %c0_67 = arith.constant 0 : index
    %c0_68 = arith.constant 0 : index
    %104 = vector.load %arg10[%c7_66, %c0_67, %c0_68] : memref<8x4x32xf32, #tpu.memory_space<vmem>>, vector<1x4x32xf32>
    %105 = vector.shape_cast %104 : vector<1x4x32xf32> to vector<4x32xf32>
    %cst_69 = arith.constant dense<0.000000e+00> : vector<8x32xf32>
    %106 = tpu.matmul %103, %105, %cst_69 {dimension_numbers = #tpu.dot_dimension_numbers<[1], [0], [0], [1], [0, 0, 1, 1], [], []>} : vector<8x4xf32>, vector<4x32xf32>, vector<8x32xf32> -> vector<8x32xf32>
    %107 = arith.addf %101, %106 : vector<8x32xf32>
    %c0_70 = arith.constant 0 : index
    %c0_71 = arith.constant 0 : index
    %108 = vector.load %arg11[%c0_70, %c0_71] : memref<1x32xf32, #tpu.memory_space<vmem>>, vector<1x32xf32>
    %109 = vector.shape_cast %108 : vector<1x32xf32> to vector<32xf32>
    %110 = vector.shape_cast %109 : vector<32xf32> to vector<1x32xf32>
    %111 = vector.broadcast %110 : vector<1x32xf32> to vector<8x32xf32>
    %112 = arith.addf %107, %111 : vector<8x32xf32>
    %c0_72 = arith.constant 0 : index
    %c0_73 = arith.constant 0 : index
    %c0_74 = arith.constant 0 : index
    %113 = vector.load %arg12[%c0_72, %c0_73, %c0_74] : memref<1x8x32xf32, #tpu.memory_space<vmem>>, vector<1x8x32xf32>
    %114 = vector.shape_cast %113 : vector<1x8x32xf32> to vector<8x32xf32>
    %115 = vector.shape_cast %112 : vector<8x32xf32> to vector<1x8x32xf32>
    tpu.vector_store %arg12[%c0_72, %c0_73, %c0_74], %115 {strides = array<i32>} : memref<1x8x32xf32, #tpu.memory_space<vmem>>, vector<1x8x32xf32>,
    return
  }
  func.func @transform_0(%arg0: i32, %arg1: i32) -> (i32, i32, i32) {
    %c0_i32 = arith.constant 0 : i32
    %c0_i32_0 = arith.constant 0 : i32
    return %arg0, %arg1, %c0_i32 : i32, i32, i32
  }
  func.func @transform_1(%arg0: i32, %arg1: i32) -> (i32, i32, i32) {
    %c0_i32 = arith.constant 0 : i32
    %c0_i32_0 = arith.constant 0 : i32
    %c0_i32_1 = arith.constant 0 : i32
    return %arg0, %c0_i32, %c0_i32_0 : i32, i32, i32
  }
  func.func @transform_2(%arg0: i32, %arg1: i32) -> (i32, i32) {
    %c0_i32 = arith.constant 0 : i32
    %c0_i32_0 = arith.constant 0 : i32
    %c0_i32_1 = arith.constant 0 : i32
    return %c0_i32, %c0_i32_0 : i32, i32
  }
  func.func @transform_3(%arg0: i32, %arg1: i32) -> (i32, i32) {
    %c0_i32 = arith.constant 0 : i32
    %c0_i32_0 = arith.constant 0 : i32
    %c0_i32_1 = arith.constant 0 : i32
    return %c0_i32, %c0_i32_0 : i32, i32
  }
  func.func @transform_4(%arg0: i32, %arg1: i32) -> (i32, i32) {
    %c0_i32 = arith.constant 0 : i32
    %c0_i32_0 = arith.constant 0 : i32
    %c0_i32_1 = arith.constant 0 : i32
    return %c0_i32, %c0_i32_0 : i32, i32
  }
  func.func @transform_5(%arg0: i32, %arg1: i32) -> (i32, i32) {
    %c0_i32 = arith.constant 0 : i32
    %c0_i32_0 = arith.constant 0 : i32
    %c0_i32_1 = arith.constant 0 : i32
    return %c0_i32, %c0_i32_0 : i32, i32
  }
  func.func @transform_6(%arg0: i32, %arg1: i32) -> (i32, i32) {
    %c0_i32 = arith.constant 0 : i32
    %c0_i32_0 = arith.constant 0 : i32
    %c0_i32_1 = arith.constant 0 : i32
    return %c0_i32, %c0_i32_0 : i32, i32
  }
  func.func @transform_7(%arg0: i32, %arg1: i32) -> (i32, i32) {
    %c0_i32 = arith.constant 0 : i32
    %c0_i32_0 = arith.constant 0 : i32
    %c0_i32_1 = arith.constant 0 : i32
    return %c0_i32, %c0_i32_0 : i32, i32
  }
  func.func @transform_8(%arg0: i32, %arg1: i32) -> (i32, i32, i32) {
    %c0_i32 = arith.constant 0 : i32
    %c0_i32_0 = arith.constant 0 : i32
    %c0_i32_1 = arith.constant 0 : i32
    %c0_i32_2 = arith.constant 0 : i32
    return %c0_i32, %c0_i32_0, %c0_i32_1 : i32, i32, i32
  }
  func.func @transform_9(%arg0: i32, %arg1: i32) -> (i32, i32) {
    %c0_i32 = arith.constant 0 : i32
    %c0_i32_0 = arith.constant 0 : i32
    %c0_i32_1 = arith.constant 0 : i32
    return %c0_i32, %c0_i32_0 : i32, i32
  }
  func.func @transform_10(%arg0: i32, %arg1: i32) -> (i32, i32, i32) {
    %c0_i32 = arith.constant 0 : i32
    %c0_i32_0 = arith.constant 0 : i32
    return %arg0, %arg1, %c0_i32 : i32, i32, i32
  }
}

</mosaic_0001>

<bundles_post_ra>
// kernel: tpu_custom_call.1
= control target key start
LH: loop header
LB: loop body
LE: loop exit
PB: predicated region body
PF: predicated region fallthrough
CT: control target
= control target key end

     0   :  { %s4164_s0 = inlined_call_operand.hbm [shape: f32[2,8,32], index: 0, kind: input, shape index: {}]   ;;  %s4165_s1 = inlined_call_operand.hbm [shape: f32[2,8,32], index: 1, kind: input, shape index: {}]   ;;  %s4166_s2 = inlined_call_operand.hbm [shape: f32[32,32], index: 2, kind: input, shape index: {}]   ;;  %s4167_s3 = inlined_call_operand.vmem [shape: f32[1,32], index: 3, kind: input, shape index: {}]   ;;  %s4168_s4 = inlined_call_operand.hbm [shape: f32[32,32], index: 4, kind: input, shape index: {}]   ;;  %s4169_s5 = inlined_call_operand.vmem [shape: f32[1,32], index: 5, kind: input, shape index: {}]   ;;  %s4170_s6 = inlined_call_operand.hbm [shape: f32[32,32], index: 6, kind: input, shape index: {}]   ;;  %s4171_s7 = inlined_call_operand.vmem [shape: f32[1,32], index: 7, kind: input, shape index: {}]   ;;  %s4172_s8 = inlined_call_operand.hbm [shape: f32[8,4,32], index: 8, kind: input, shape index: {}]   ;;  %s4173_s9 = inlined_call_operand.vmem [shape: f32[1,32], index: 9, kind: input, shape index: {}]   ;;  %s4174_s10 = inlined_call_operand.hbm [shape: f32[2,8,32], index: 10, kind: output, shape index: {}]  }
   0x1   :  { %4178 = sst [smem:[#allocation26_spill]] %s4164_s0 }
   0x2   :  { %4179 = sst [smem:[#allocation27_spill]] %s4166_s2 }
   0x3   :  { %4180 = sst [smem:[#allocation28_spill]] %s4168_s4 }
   0x4   :  { %4181 = sst [smem:[#allocation29_spill]] %s4170_s6 }
   0x5   :  { %4182 = sst [smem:[#allocation30_spill]] %s4172_s8 }
   0x6   :  { %15 = vsyncpa [#allocation6], 0 }
   0x7   :  { %17 = vsyncpa [#allocation6 + $0x1], 0 }
   0x8   :  { %18 = vsyncpa [#allocation9], 0 }
   0x9   :  { %20 = vsyncpa [#allocation9 + $0x1], 0 }
   0xa   :  { %21 = vsyncpa [#allocation12], 0 }
   0xb   :  { %22 = vsyncpa [#allocation15], 0 }
   0xc   :  { %23 = vsyncpa [#allocation7], 0 }
   0xd   :  { %25 = vsyncpa [#allocation7 + $0x1], 0  ;;  %s3730_s13 = smov 0   ;;  %s3732_s14 = smov 0  }
   0xe   :  { %s3734_s15 = smov 0   ;;  %s3736_s16 = smov 0  }
   0xf   :  { %s3738_s17 = smov 0   ;;  %s3740_s18 = smov 0  }
  0x10 LB: > { %4183 = sst [smem:[#allocation23_spill]] %s3649_s17  ;;  %s3761_s19 = sadd.s32 4294967295, %s3653_s18   ;;  %s3653_s18 = sphi %s3740_s18, %s31_s18   ;;  %s3649_s17 = sphi %s3738_s17, %s4208_s17   ;;  %s3645_s16 = sphi %s3736_s16, %s4207_s16   ;;  %s3641_s15 = sphi %s3734_s15, %s4211_s15   ;;  %s3637_s14 = sphi %s3732_s14, %s4210_s14   ;;  %s3633_s13 = sphi %s3730_s13, %s4209_s13  }
  0x11   : > { %p2959_p0 = scmp.ge.s32.totalorder %s3653_s18, 1  ;;  %p4175_p1 = scmp.eq.s32.totalorder %s3761_s19, 0 }
  0x12   : > { %p298_p2 = scmp.lt.s32.totalorder %s3653_s18, 3  ;;  %s3655_s21 = smov [#allocation10]  }
  0x13   : > { %s310_s22 = sshll.u32 %s3655_s21, 4  ;;  %s3656_s24 = smov [#allocation11]   ;;  %s311_s22 = int_to_ptr.vmem [resolvable:$true] %s310_s22 }
  0x14   : > { %p3766_p3 = pnand %p2959_p0, %p298_p2  ;;  %s326_s25 = sshll.u32 %s3656_s24, 4  ;;  %s327_s25 = int_to_ptr.vmem [resolvable:$true] %s326_s25 }
  0x15   : > { %s3657_s26 = smov [#allocation13]   ;;  %s3408_s28 = scalar_lea.vmem %s311_s22, 512 }
  0x16   : > { %p3266_p4 = pneg %p3766_p3  ;;  %s342_s27 = sshll.u32 %s3657_s26, 4  ;;  %s343_s27 = int_to_ptr.vmem [resolvable:$true] %s342_s27 }
  0x17   : > { %p3409_p8 = scmp.ne.s32.totalorder %s311_s22, %s3408_s28  ;;  %p3416_p11 = scmp.lt.s32.totalorder %s311_s22, %s311_s22 }
  0x18   : > { %p3775_p6 = pnand %p3266_p4, %p4175_p1  ;;  %p3417_p12 = scmp.lt.s32.totalorder %s3408_s28, %s3408_s28 }
  0x1a   : > { %p3399_p7 = pneg %p3775_p6  ;;  %p3418_p13 = por %p3417_p12, %p3416_p11 }
  0x1c   : > { %p3411_p9 = pnand %p3409_p8, %p3399_p7 }
  0x1e   : > { %p3412_p10 = pneg %p3411_p9 }
  0x20   : > { %p3419_p0 = pnand %p3418_p13, %p3412_p10 }
  0x22   : > { %3422 = shalt.err (!%p3419_p0)
}
  0x23   : > { %s3658_s29 = smov 128   ;;  %s3659_s30 = smov 8  }
  0x24   : > { %s4186_s2 = sld [smem:[#allocation27_spill]]  ;;  %s3434_s21 = scalar_lea.vmem %s327_s25, 512 }
  0x25   : > { %p3435_p2 = scmp.ne.s32.totalorder %s327_s25, %s3434_s21  ;;  %p3442_p9 = scmp.lt.s32.totalorder %s327_s25, %s327_s25 }
  0x26   : > { %p3443_p5 = scmp.lt.s32.totalorder %s3434_s21, %s3434_s21 }
  0x27   : > { %p3437_p4 = pnand %p3435_p2, %p3399_p7 }
  0x28   : > { %p3444_p11 = por %p3443_p5, %p3442_p9 }
  0x29   : > { %p3438_p8 = pneg %p3437_p4 }
  0x2a   : > { %3269 = dma.hbm_to_vmem [thread:$0]  (!%p3775_p6), %s4186_s2, 512, %s311_s22, [#allocation9], %s3658_s29, %s3658_s29, %s3659_s30  }
  0x2b   : > { %p3445_p10 = pnand %p3444_p11, %p3438_p8 }
  0x2d   : > { %3448 = shalt.err (!%p3445_p10)
}
  0x2e   : > { %s4187_s4 = sld [smem:[#allocation28_spill]]  ;;  %s3460_s22 = scalar_lea.vmem %s343_s27, 512 }
  0x2f   : > { %p3461_p12 = scmp.ne.s32.totalorder %s343_s27, %s3460_s22  ;;  %p3468_p2 = scmp.lt.s32.totalorder %s343_s27, %s343_s27 }
  0x30   : > { %p3469_p4 = scmp.lt.s32.totalorder %s3460_s22, %s3460_s22 }
  0x31   : > { %p3463_p13 = pnand %p3461_p12, %p3399_p7 }
  0x32   : > { %p3470_p1 = por %p3469_p4, %p3468_p2 }
  0x33   : > { %p3464_p0 = pneg %p3463_p13 }
  0x34   : > { %3272 = dma.hbm_to_vmem [thread:$0]  (!%p3775_p6), %s4187_s4, 512, %s327_s25, [#allocation12], %s3658_s29, %s3658_s29, %s3659_s30  }
  0x35   : > { %p3471_p5 = pnand %p3470_p1, %p3464_p0 }
  0x37   : > { %3474 = shalt.err (!%p3471_p5)
}
  0x38   : > { %s4188_s6 = sld [smem:[#allocation29_spill]]  ;;  %s3660_s25 = smov [#allocation14]  }
  0x39   : > { %s358_s12 = sshll.u32 %s3660_s25, 4  ;;  %s359_s12 = int_to_ptr.vmem [resolvable:$true] %s358_s12 }
  0x3a   : > { %s3486_s21 = scalar_lea.vmem %s359_s12, 512  ;;  %p3494_p10 = scmp.lt.s32.totalorder %s359_s12, %s359_s12 }
  0x3b   : > { %p3487_p8 = scmp.ne.s32.totalorder %s359_s12, %s3486_s21  ;;  %p3495_p12 = scmp.lt.s32.totalorder %s3486_s21, %s3486_s21 }
  0x3d   : > { %p3489_p9 = pnand %p3487_p8, %p3399_p7  ;;  %p3496_p1 = por %p3495_p12, %p3494_p10 }
  0x3e   : > { %3275 = dma.hbm_to_vmem [thread:$0]  (!%p3775_p6), %s4188_s6, 512, %s343_s27, [#allocation12], %s3658_s29, %s3658_s29, %s3659_s30  }
  0x3f   : > { %p3490_p11 = pneg %p3489_p9 }
  0x41   : > { %p3497_p13 = pnand %p3496_p1, %p3490_p11 }
  0x43   : > { %3500 = shalt.err (!%p3497_p13)
}
  0x44   : > { %s3661_s24 = smov 64   ;;  %s3662_s27 = smov 4  }
  0x45   : > { %s4189_s8 = sld [smem:[#allocation30_spill]]  ;;  %s2958_s26 = sadd.s32 4294967294, %s3653_s18  }
  0x46   : > { %s43_s22 = sadd.s32 1, %s3649_s17  ;;  %s52_s28 = sadd.s32 1, %s3641_s15 }
  0x47   : > { %p45_p7 = scmp.ge.s32.totalorder %s43_s22, 2  ;;  %p59_p0 = scmp.ne.s32.totalorder %s3641_s15, %s3637_s14 }
  0x48   : > { %p60_p2 = scmp.eq.s32.totalorder %s3653_s18, 0  ;;  %p65_p5 = scmp.ne.s32.totalorder %s3637_s14, %s3633_s13 }
  0x49   : > { %s4213_s22 = smov (%p45_p7, %s43_s22), 0  ;;  %p4192_p9 = scmp.eq.s32.totalorder %s3761_s19, 0 }
  0x4a   : > { %4190 = sst [smem:[#allocation24_spill]] %s4213_s22  ;;  %p3821_p4 = por %p60_p2, %p59_p0 }
  0x4b   : > { %3278 = dma.hbm_to_vmem [thread:$0]  (!%p3775_p6), %s4189_s8, 512, %s359_s12, [#allocation15], %s3661_s24, %s3661_s24, %s3662_s27  }
  0x4c   : > { %s47_s23 = ssub.s32 %s3649_s17, %s4213_s22  ;;  %p285_p6 = scmp.eq.s32.totalorder %s3761_s19, 1 }
  0x4d   : > { %p50_p8 = scmp.eq.s32.totalorder %s47_s23, 0  ;;  %p3832_p11 = por %p4192_p9, %p65_p5 }
  0x4e   : > { %p3836_p10 = por %p285_p6, %p59_p0  ;;  %p291_p12 = scmp.eq.s32.totalorder %s2958_s26, 1 }
  0x4f   : > { %s3841_s21 = scalar_select %p50_p8, %s3641_s15, %s52_s28  }
  0x50   : > { %p3843_p1 = por %p291_p12, %p65_p5  ;;  %p3294_p13 = scmp.lt.s32.totalorder %s3653_s18, 2 }
  0x51   : > { %4195 = sst [smem:[#allocation25_spill]] %s3841_s21  ;;  %s375_s27 = sand.u32 1, %s3641_s15  }
  0x52   : > { %s2966_s29 = sshll.u32 %s3649_s17, 7  ;;  %s2965_s30 = sshll.u32 %s375_s27, 3 }
  0x53   : > { %s4197_s0 = sld [smem:[#allocation26_spill]]  ;;  %s379_s6 = scalar_lea.vmem [#allocation5], %s2965_s30 }
  0x54   : > { %s387_s8 = sshll.u32 %s379_s6, 4  ;;  %p3855_p7 = pnand %p3294_p13, %p3821_p4  ;;  %s388_s8 = int_to_ptr.vmem [resolvable:$true] %s387_s8 }
  0x55   : > { %s3862_s21 = scalar_lea.hbm %s4165_s1, %s2966_s29  ;;  %s376_s17 = scalar_lea.sflag [#allocation6], %s375_s27 }
  0x56   : > { %p3503_p0 = pneg %p3855_p7  ;;  %s3514_s2 = scalar_lea.vmem %s388_s8, 128 }
  0x57   : > { %p3515_p2 = scmp.ne.s32.totalorder %s388_s8, %s3514_s2  ;;  %s3663_s6 = smov [#allocation5]  }
  0x58   : > { %s3519_s11 = sshll.u32 %s3663_s6, 4  ;;  %s3520_s11 = int_to_ptr.vmem [resolvable:$false] %s3519_s11 }
  0x59   : > { %s385_s4 = scalar_lea.hbm %s4197_s0, %s2966_s29  ;;  %p3517_p5 = pnand %p3515_p2, %p3503_p0 }
  0x5a   : > { %s3521_s23 = scalar_lea.vmem %s3520_s11, 256  ;;  %p3522_p6 = scmp.lt.s32.totalorder %s388_s8, %s3520_s11 }
  0x5b   : > { %p3518_p4 = pneg %p3517_p5  ;;  %p3523_p8 = scmp.lt.s32.totalorder %s3521_s23, %s3514_s2 }
  0x5d   : > { %p3524_p9 = por %p3523_p8, %p3522_p6 }
  0x5f   : > { %p3525_p12 = pnand %p3524_p9, %p3518_p4 }
  0x61   : > { %3528 = shalt.err (!%p3525_p12)
}
  0x62   : > { %3282 = dma.hbm_to_vmem [thread:$0]  (!%p3855_p7), %s385_s4, 128, %s388_s8, %s376_s17  }
  0x63   : > { %s394_s27 = sand.u32 1, %s3653_s18   ;;  %s398_s29 = scalar_lea.vmem [#allocation8], %s2965_s30 }
  0x64   : > { %s405_s26 = sshll.u32 %s398_s29, 4  ;;  %s395_s28 = scalar_lea.sflag [#allocation9], %s394_s27  ;;  %s406_s26 = int_to_ptr.vmem [resolvable:$true] %s405_s26 }
  0x65   : > { %s3542_s0 = scalar_lea.vmem %s406_s26, 128  ;;  %s3664_s2 = smov [#allocation8]  }
  0x66   : > { %p3543_p13 = scmp.ne.s32.totalorder %s406_s26, %s3542_s0  ;;  %s3547_s6 = sshll.u32 %s3664_s2, 4  ;;  %s3548_s6 = int_to_ptr.vmem [resolvable:$false] %s3547_s6 }
  0x67   : > { %s3549_s11 = scalar_lea.vmem %s3548_s6, 256  ;;  %p3550_p4 = scmp.lt.s32.totalorder %s406_s26, %s3548_s6 }
  0x68   : > { %p3545_p2 = pnand %p3543_p13, %p3503_p0  ;;  %p3551_p6 = scmp.lt.s32.totalorder %s3549_s11, %s3542_s0 }
  0x6a   : > { %p3546_p5 = pneg %p3545_p2  ;;  %p3552_p8 = por %p3551_p6, %p3550_p4 }
  0x6c   : > { %p3553_p9 = pnand %p3552_p8, %p3546_p5 }
  0x6e   : > { %3556 = shalt.err (!%p3553_p9)
}
  0x6f   : > { %3285 = dma.hbm_to_vmem [thread:$0]  (!%p3855_p7), %s3862_s21, 128, %s406_s26, %s395_s28  }
  0x70   : > { %414 = sbr.rel (%p3766_p3) target bundleno = 1244 (0x4dc), region = 60  ;;  %s3881_s4 = sand.u32 (!%p3766_p3), 1, %s3637_s14  }
  0x71   : > { %s3884_s8 = sshll.u32 (!%p3766_p3), %s3881_s4, 3  ;;  %s417_s0 = scalar_lea.sflag (!%p3766_p3), [#allocation6], %s3881_s4 }
  0x72   : > { %s420_s17 = scalar_lea.vmem (!%p3766_p3), [#allocation5], %s3884_s8 }
  0x75   : > { %3608 = dma.done.wait (%p3832_p11), %s417_s0, 128  }
  0x76   : > { %3610 = vsyncadd (%p3832_p11), %s417_s0, 4294967168  ;;  %s425_s20 = sand.u32 1, %s3761_s19   ;;  %s429_s21 = scalar_lea.vmem [#allocation8], %s3884_s8 }
  0x77   : > { %s426_s22 = scalar_lea.sflag [#allocation9], %s425_s20 }
  0x78   : > { %3612 = dma.done.wait (%p3832_p11), %s426_s22, 128  }
  0x79   : > { %3614 = vsyncadd (%p3832_p11), %s426_s22, 4294967168  ;;  %p4199_p3 = scmp.eq.s32.totalorder %s3761_s19, 0 }
  0x7b   : > { %3616 = dma.done.wait (%p4199_p3), [#allocation9], 512   ;;  %p4200_p7 = pmov %p4199_p3 }
  0x7c   : > { %p4201_p0 = pmov %p4199_p3 }
  0x7d   : > { %3618 = vsyncadd (%p4200_p7), [#allocation9], 4294966784 }
  0x7e   : > { %3620 = dma.done.wait (%p4201_p0), [#allocation12], 1024   ;;  %p4202_p12 = pmov %p4201_p0 }
  0x7f   : > { %p4203_p13 = pmov %p4201_p0 }
  0x80   : > { %3622 = vsyncadd (%p4202_p12), [#allocation12], 4294966272 }
  0x81   : > { %3624 = dma.done.wait (%p4203_p13), [#allocation15], 512   ;;  %p4204_p2 = pmov %p4201_p0 }
  0x82   : > { %v3665_v0 = vmov 0.0   ;;  %vm3666_vm0 = vmmov 0   ;;  %v495_v1 = vld [vmem:[#allocation11 + $0x18] sm:$0xff]  ;;  %v494_v2 = vld [vmem:[#allocation11 + $0x10] sm:$0xff]  ;;  %v493_v3 = vld [vmem:[#allocation11 + $0x8] sm:$0xff]  ;;  %vm503_vm1 = vcmask 261120  }
  0x83   : > { %3626 = vsyncadd (%p4204_p2), [#allocation15], 4294966784  ;;  %3091 = vmatprep.subr.mxu0 %v3665_v0  ;;  %3099 = vmatprep.mubr.msk.f32.mxu0 %vm3666_vm0, %v3665_v0  ;;  %v580_v4 = vld [vmem:[#allocation13 + $0x18] sm:$0xff]  ;;  %v579_v5 = vld [vmem:[#allocation13 + $0x10] sm:$0xff]  ;;  %vm658_vm2 = vcmask 31744   ;;  %s3667_s30 = smov 120  }
  0x84   : > { %3102 = vmatprep.subr.mxu1 %v3665_v0  ;;  %3110 = vmatprep.mubr.msk.f32.mxu1 %vm3666_vm0, %v3665_v0  ;;  %v492_v6 = vld [vmem:[#allocation11] sm:$0xff]  ;;  %v491_v7 = vld [vmem:[%s429_s21] sm:$0xff]  ;;  %v578_v9 = vld [vmem:[#allocation13 + $0x8] sm:$0xff]  ;;  %s3668_s23 = smov 124   ;;  %s3669_s26 = smov 116   ;;  %vm1489_vm3 = vcmask 64512  }
  0x85   : > { %3092 = vmatpush3.msra.mxu0 %v495_v1  ;;  %3103 = vmatpush3.msra.mxu1 %v580_v4  ;;  %v737_v8 = vld [vmem:[#allocation10 + $0x18] sm:$0xff]  ;;  %v736_v10 = vld [vmem:[#allocation10 + $0x10] sm:$0xff]  ;;  %v577_v11 = vld [vmem:[#allocation13] sm:$0xff]  ;;  %s3670_s28 = smov 112   ;;  %s3671_s2 = smov 108   ;;  %vm2168_vm4 = vcmask 1043456  }
  0x86   : > { %3093 = vmatprep.subr.mxu0 %v3665_v0  ;;  %3104 = vmatprep.subr.mxu1 %v3665_v0  ;;  %v735_v12 = vld [vmem:[#allocation10 + $0x8] sm:$0xff]  ;;  %v734_v13 = vld [vmem:[#allocation10] sm:$0xff]  ;;  %s3672_s6 = smov 104   ;;  %s3673_s11 = smov 100  }
  0x87   : > { %3094 = vmatpush3.msra.mxu0 %v494_v2  ;;  %3105 = vmatpush3.msra.mxu1 %v579_v5  ;;  %v733_v14 = vld [vmem:[%s420_s17] sm:$0xff]  ;;  %s3025_s21 = sshll.u32 %s3645_s16, 7  ;;  %s486_s19 = scalar_lea.vmem [#allocation16], %s3884_s8 }
  0x88   : > { %3095 = vmatprep.subr.mxu0 %v3665_v0  ;;  %3106 = vmatprep.subr.mxu1 %v3665_v0  ;;  %v2977_v15 = vld [vmem:[%s4169_s5] ss:$0 sm:$0xff]  ;;  %s2816_s25 = sshll.u32 %s486_s19, 4  ;;  %s2814_s27 = scalar_lea.hbm %s4174_s10, %s3025_s21  ;;  %s2817_s25 = int_to_ptr.vmem [resolvable:$true] %s2816_s25 }
  0x89   : > { %3096 = vmatpush3.msra.mxu0 %v493_v3  ;;  %3107 = vmatpush3.msra.mxu1 %v578_v9  ;;  %v2981_v19 = vld [vmem:[%s4167_s3] ss:$0 sm:$0xff]  ;;  %s2802_s29 = scalar_lea.sflag [#allocation7], %s3881_s4 }
  0x8a   : > { %3097 = vmatprep.subr.mxu0 %v3665_v0  ;;  %3108 = vmatprep.subr.mxu1 %v3665_v0  ;;  %v2979_v25 = vld [vmem:[%s4171_s7] ss:$0 sm:$0xff] }
  0x8b   : > { %3098 = vmatpush3.msra.mxu0 %v492_v6  ;;  %3109 = vmatpush3.msra.mxu1 %v577_v11 }
  0x8c   : > { %3100 = vmatmul.mubr.msk.f32.vlgmr.msra.gmra.mxu0 %vm503_vm1, %v491_v7  ;;  %3113 = vmatprep.subr.mxu0 %v3665_v0 }
  0x8d   : > { %3114 = vmatpush3.msra.mxu0 %v737_v8  ;;  %3121 = vmatprep.mubr.msk.f32.mxu0 %vm3666_vm0, %v3665_v0 }
  0x8e   : > { %3115 = vmatprep.subr.mxu0 %v3665_v0  ;;  %3111 = vmatmul.mubr.msk.f32.vlgmr.msra.gmra.mxu1 %vm503_vm1, %v491_v7 }
  0x8f   : > { %3116 = vmatpush3.msra.mxu0 %v736_v10  ;;  %3124 = vmatprep.subr.mxu1 %v3665_v0 }
  0x90   : > { %3117 = vmatprep.subr.mxu0 %v3665_v0  ;;  %3126 = vmatprep.mubr.msk.f32.mxu1 %vm3666_vm0, %v3665_v0 }
  0x91   : > { %3118 = vmatpush3.msra.mxu0 %v735_v12 }
  0x92   : > { %3119 = vmatprep.subr.mxu0 %v3665_v0 }
  0x93   : > { %3120 = vmatpush3.msra.mxu0 %v734_v13 }
  0x94   : > { %3122 = vmatmul.mubr.msk.f32.vlgmr.msra.gmra.mxu0 %vm503_vm1, %v733_v14  ;;  %3134 = vmatprep.subr.mxu0 %v3665_v0 }
  0x95   : > { %3136 = vmatprep.mubr.msk.f32.mxu0 %vm3666_vm0, %v3665_v0 }
 0x14c   : > { %v573_v16 = vpop.f32.mrf.mxu0 }
 0x14d   : > { %v574_v17 = vadd.f32 %v2977_v15, %v573_v16 }
 0x14e   : > { %v3101_v18 = vpop.f32.mrf.mxu0  ;;  %v654_v26 = vpop.f32.mrf.mxu1 }
 0x14f   : > { %659 = vst.msk [vmem:[#allocation3] sm:$0xff] %vm658_vm2, %v574_v17  ;;  %673 = vrot.lane.b32.xlu1 %v574_v17, %s3667_s30  ;;  %662 = vrot.lane.b32.xlu0 %v574_v17, %s3668_s23  ;;  %v3964_v27 = vadd.f32 %v2979_v25, %v654_v26 }
 0x150   : > { %v3112_v28 = vpop.f32.mrf.mxu1 }
 0x151   : > { %660 = vst.msk [vmem:[#allocation4] sm:$0xff] %vm658_vm2, %v3964_v27 }
 0x153   : > { %683 = vrot.lane.b32.xlu1 %v574_v17, %s3669_s26 }
 0x154   : > { %v815_v20 = vpop.f32.mrf.mxu0 }
 0x155   : > { %v816_v21 = vadd.f32 %v2981_v19, %v815_v20 }
 0x156   : > { %v3123_v22 = vpop.f32.mrf.mxu0  ;;  %v865_v23 = vld [vmem:[#allocation3] sm:$0xff] }
 0x157   : > { %820 = vst.msk [vmem:[#allocation2] sm:$0xff] %vm658_vm2, %v816_v21  ;;  %693 = vrot.lane.b32.xlu1 %v574_v17, %s3670_s28  ;;  %822 = vrot.lane.b32.xlu0 %v816_v21, %s3668_s23 }
 0x158   : > { %3125 = vmatpush3.xpose.msk.msra.mxu1 %vm658_vm2, %v865_v23  ;;  %v873_v55 = vld [vmem:[#allocation4] sm:$0xff] }
 0x159   : > { %3129 = vmatprep.subr.mxu1 %v3665_v0 }
 0x15b   : > { %703 = vrot.lane.b32.xlu1 %v574_v17, %s3671_s2  ;;  %827 = vrot.lane.b32.xlu0 %v816_v21, %s3667_s30 }
 0x15e   : > { %v857_v24 = vld [vmem:[#allocation2] sm:$0xff] }
 0x15f   : > { %713 = vrot.lane.b32.xlu1 %v574_v17, %s3672_s6  ;;  %832 = vrot.lane.b32.xlu0 %v816_v21, %s3669_s26 }
 0x160   : > { %3127 = vmatmul.mubr.msk.f32.vlgmr.msra.gmra.mxu1 %vm658_vm2, %v857_v24 }
 0x161   : > { %3131 = vmatprep.mubr.msk.f32.mxu1 %vm3666_vm0, %v3665_v0 }
 0x163   : > { %723 = vrot.lane.b32.xlu1 %v574_v17, %s3673_s11  ;;  %837 = vrot.lane.b32.xlu0 %v816_v21, %s3670_s28 }
 0x167   : > { %852 = vrot.lane.b32.xlu1 %v816_v21, %s3673_s11  ;;  %842 = vrot.lane.b32.xlu0 %v816_v21, %s3671_s2 }
 0x16b   : > { %847 = vrot.lane.b32.xlu0 %v816_v21, %s3672_s6  ;;  %668 = vrot.lane.b32.xlu1 %v3964_v27, %s3668_s23 }
 0x16f   : > { %678 = vrot.lane.b32.xlu0 %v3964_v27, %s3667_s30  ;;  %688 = vrot.lane.b32.xlu1 %v3964_v27, %s3669_s26  ;;  %s3557_s26 = scalar_lea.vmem %s2817_s25, 128 }
 0x170   : > { %p3558_p11 = scmp.ne.s32.totalorder %s2817_s25, %s3557_s26 }
 0x172   : > { %p3559_p5 = pnand %p3558_p11, %p3836_p10 }
 0x173   : > { %708 = vrot.lane.b32.xlu0 %v3964_v27, %s3671_s2  ;;  %698 = vrot.lane.b32.xlu1 %v3964_v27, %s3670_s28  ;;  %s3674_s28 = smov [#allocation16]  }
 0x174   : > { %p3560_p4 = pneg %p3559_p5  ;;  %s3561_s2 = sshll.u32 %s3674_s28, 4  ;;  %s3562_s2 = int_to_ptr.vmem [resolvable:$false] %s3561_s2 }
 0x175   : > { %s3563_s16 = scalar_lea.vmem %s3562_s2, 256  ;;  %p3564_p6 = scmp.lt.s32.totalorder %s2817_s25, %s3562_s2 }
 0x176   : > { %p3565_p8 = scmp.lt.s32.totalorder %s3563_s16, %s3557_s26 }
 0x178   : > { %p3566_p9 = por %p3565_p8, %p3564_p6 }
 0x17a   : > { %p3567_p3 = pnand %p3566_p9, %p3560_p4 }
 0x1c1   : > { %v674_v29 = vpop.permute.xlu1 %673  ;;  %v663_v30 = vpop.permute.xlu0 %662 }
 0x1c2   : > { %677 = vst.msk [vmem:[#allocation3 + $0x10] sm:$0xff] %vm658_vm2, %v674_v29  ;;  %666 = vst.msk [vmem:[#allocation3 + $0x8] sm:$0xff] %vm658_vm2, %v663_v30 }
 0x1c5   : > { %v684_v31 = vpop.permute.xlu1 %683 }
 0x1c6   : > { %687 = vst.msk [vmem:[#allocation3 + $0x18] sm:$0xff] %vm658_vm2, %v684_v31 }
 0x1c9   : > { %v694_v32 = vpop.permute.xlu1 %693  ;;  %v823_v33 = vpop.permute.xlu0 %822  ;;  %v866_v34 = vld [vmem:[#allocation3 + $0x8] sm:$0xff]  ;;  %v867_v35 = vld [vmem:[#allocation3 + $0x10] sm:$0xff] }
 0x1ca   : > { %697 = vst.msk [vmem:[#allocation3 + $0x20] sm:$0xff] %vm658_vm2, %v694_v32  ;;  %826 = vst.msk [vmem:[#allocation2 + $0x8] sm:$0xff] %vm658_vm2, %v823_v33  ;;  %3130 = vmatpush3.xpose.msk.msra.mxu1 %vm658_vm2, %v866_v34  ;;  %3135 = vmatpush3.xpose.msk.msra.mxu0 %vm658_vm2, %v867_v35 }
 0x1cb   : > { %3139 = vmatprep.subr.mxu1 %v3665_v0  ;;  %3144 = vmatprep.subr.mxu0 %v3665_v0 }
 0x1cd   : > { %v704_v36 = vpop.permute.xlu1 %703  ;;  %v828_v37 = vpop.permute.xlu0 %827  ;;  %v868_v41 = vld [vmem:[#allocation3 + $0x18] sm:$0xff] }
 0x1ce   : > { %707 = vst.msk [vmem:[#allocation3 + $0x28] sm:$0xff] %vm658_vm2, %v704_v36  ;;  %831 = vst.msk [vmem:[#allocation2 + $0x10] sm:$0xff] %vm658_vm2, %v828_v37 }
 0x1d1   : > { %v714_v38 = vpop.permute.xlu1 %713  ;;  %v833_v39 = vpop.permute.xlu0 %832  ;;  %v858_v40 = vld [vmem:[#allocation2 + $0x8] sm:$0xff]  ;;  %v869_v45 = vld [vmem:[#allocation3 + $0x20] sm:$0xff] }
 0x1d2   : > { %717 = vst.msk [vmem:[#allocation3 + $0x30] sm:$0xff] %vm658_vm2, %v714_v38  ;;  %836 = vst.msk [vmem:[#allocation2 + $0x18] sm:$0xff] %vm658_vm2, %v833_v39  ;;  %3132 = vmatmul.mubr.msk.f32.vlgmr.msra.gmra.mxu1 %vm658_vm2, %v858_v40 }
 0x1d3   : > { %3140 = vmatpush3.xpose.msk.msra.mxu1 %vm658_vm2, %v868_v41  ;;  %3141 = vmatprep.mubr.msk.f32.mxu1 %vm3666_vm0, %v3665_v0 }
 0x1d4   : > { %3149 = vmatprep.subr.mxu1 %v3665_v0 }
 0x1d5   : > { %v724_v42 = vpop.permute.xlu1 %723  ;;  %v838_v43 = vpop.permute.xlu0 %837  ;;  %v859_v44 = vld [vmem:[#allocation2 + $0x10] sm:$0xff]  ;;  %v870_v49 = vld [vmem:[#allocation3 + $0x28] sm:$0xff] }
 0x1d6   : > { %727 = vst.msk [vmem:[#allocation3 + $0x38] sm:$0xff] %vm658_vm2, %v724_v42  ;;  %841 = vst.msk [vmem:[#allocation2 + $0x20] sm:$0xff] %vm658_vm2, %v838_v43  ;;  %3137 = vmatmul.mubr.msk.f32.vlgmr.msra.gmra.mxu0 %vm658_vm2, %v859_v44 }
 0x1d7   : > { %3145 = vmatpush3.xpose.msk.msra.mxu0 %vm658_vm2, %v869_v45  ;;  %3146 = vmatprep.mubr.msk.f32.mxu0 %vm3666_vm0, %v3665_v0 }
 0x1d8   : > { %3154 = vmatprep.subr.mxu0 %v3665_v0 }
 0x1d9   : > { %v853_v46 = vpop.permute.xlu1 %852  ;;  %v843_v47 = vpop.permute.xlu0 %842  ;;  %v860_v48 = vld [vmem:[#allocation2 + $0x18] sm:$0xff]  ;;  %v871_v52 = vld [vmem:[#allocation3 + $0x30] sm:$0xff] }
 0x1da   : > { %856 = vst.msk [vmem:[#allocation2 + $0x38] sm:$0xff] %vm658_vm2, %v853_v46  ;;  %846 = vst.msk [vmem:[#allocation2 + $0x28] sm:$0xff] %vm658_vm2, %v843_v47  ;;  %3142 = vmatmul.mubr.msk.f32.vlgmr.msra.gmra.mxu1 %vm658_vm2, %v860_v48 }
 0x1db   : > { %3150 = vmatpush3.xpose.msk.msra.mxu1 %vm658_vm2, %v870_v49  ;;  %3151 = vmatprep.mubr.msk.f32.mxu1 %vm3666_vm0, %v3665_v0 }
 0x1dc   : > { %3159 = vmatprep.subr.mxu1 %v3665_v0 }
 0x1dd   : > { %v848_v50 = vpop.permute.xlu0 %847  ;;  %v861_v51 = vld [vmem:[#allocation2 + $0x20] sm:$0xff]  ;;  %v872_v54 = vld [vmem:[#allocation3 + $0x38] sm:$0xff]  ;;  %v669_v63 = vpop.permute.xlu1 %668 }
 0x1de   : > { %851 = vst.msk [vmem:[#allocation2 + $0x30] sm:$0xff] %vm658_vm2, %v848_v50  ;;  %3147 = vmatmul.mubr.msk.f32.vlgmr.msra.gmra.mxu0 %vm658_vm2, %v861_v51  ;;  %672 = vst.msk [vmem:[#allocation4 + $0x8] sm:$0xff] %vm658_vm2, %v669_v63 }
 0x1df   : > { %3155 = vmatpush3.xpose.msk.msra.mxu0 %vm658_vm2, %v871_v52  ;;  %3156 = vmatprep.mubr.msk.f32.mxu0 %vm3666_vm0, %v3665_v0 }
 0x1e0   : > { %3164 = vmatprep.subr.mxu0 %v3665_v0 }
 0x1e1   : > { %v862_v53 = vld [vmem:[#allocation2 + $0x28] sm:$0xff]  ;;  %v864_v57 = vld [vmem:[#allocation2 + $0x38] sm:$0xff]  ;;  %v679_v59 = vpop.permute.xlu0 %678  ;;  %v689_v1 = vpop.permute.xlu1 %688 }
 0x1e2   : > { %3152 = vmatmul.mubr.msk.f32.vlgmr.msra.gmra.mxu1 %vm658_vm2, %v862_v53  ;;  %682 = vst.msk [vmem:[#allocation4 + $0x10] sm:$0xff] %vm658_vm2, %v679_v59  ;;  %692 = vst.msk [vmem:[#allocation4 + $0x18] sm:$0xff] %vm658_vm2, %v689_v1 }
 0x1e3   : > { %3160 = vmatpush3.xpose.msk.msra.mxu1 %vm658_vm2, %v872_v54  ;;  %3161 = vmatprep.mubr.msk.f32.mxu1 %vm3666_vm0, %v3665_v0 }
 0x1e4   : > { %3169 = vmatprep.subr.mxu1 %v3665_v0 }
 0x1e5   : > { %v863_v56 = vld [vmem:[#allocation2 + $0x30] sm:$0xff]  ;;  %v709_v62 = vpop.permute.xlu0 %708  ;;  %v874_v2 = vld [vmem:[#allocation4 + $0x8] sm:$0xff]  ;;  %v699_v3 = vpop.permute.xlu1 %698 }
 0x1e6   : > { %3157 = vmatmul.mubr.msk.f32.vlgmr.msra.gmra.mxu0 %vm658_vm2, %v863_v56  ;;  %3162 = vmatmul.mubr.msk.f32.vlgmr.msra.gmra.mxu1 %vm658_vm2, %v864_v57  ;;  %712 = vst.msk [vmem:[#allocation4 + $0x28] sm:$0xff] %vm658_vm2, %v709_v62  ;;  %702 = vst.msk [vmem:[#allocation4 + $0x20] sm:$0xff] %vm658_vm2, %v699_v3 }
 0x1e7   : > { %3165 = vmatpush3.msra.mxu0 %v873_v55  ;;  %3166 = vmatprep.mubr.msk.f32.mxu0 %vm3666_vm0, %v3665_v0 }
 0x1e8   : > { %3174 = vmatprep.subr.mxu0 %v3665_v0  ;;  %3171 = vmatprep.mubr.msk.f32.mxu1 %vm3666_vm0, %v3665_v0 }
 0x1e9   : > { %3170 = vmatpush3.msra.mxu1 %v874_v2  ;;  %v875_v29 = vld [vmem:[#allocation4 + $0x10] sm:$0xff]  ;;  %v876_v47 = vld [vmem:[#allocation4 + $0x18] sm:$0xff] }
 0x1ea   : > { %3179 = vmatprep.subr.mxu1 %v3665_v0 }
 0x1ed   : > { %v877_v56 = vld [vmem:[#allocation4 + $0x20] sm:$0xff] }
 0x220   : > { %v953_v58 = vpop.f32.mrf.mxu1 }
 0x221   : > { %v1490_v60 = vsel %vm1489_vm3, %v953_v58, -inf }
 0x222   : > { %1491 = vmax.xlane.f32.xlu0 %v1490_v60  ;;  %v3128_v61 = vpop.f32.mrf.mxu1 }
 0x223   : > { %v878_v61 = vld [vmem:[#allocation4 + $0x28] sm:$0xff] }
 0x292   : > { %v1029_v4 = vpop.f32.mrf.mxu1 }
 0x293   : > { %v1493_v5 = vsel %vm1489_vm3, %v1029_v4, -inf }
 0x294   : > { %1494 = vmax.xlane.f32.xlu1 %v1493_v5  ;;  %v3133_v6 = vpop.f32.mrf.mxu1 }
 0x296   : > { %v1105_v7 = vpop.f32.mrf.mxu0 }
 0x297   : > { %v1496_v8 = vsel %vm1489_vm3, %v1105_v7, -inf }
 0x298   : > { %1497 = vmax.xlane.f32.xlu0 %v1496_v8  ;;  %v3138_v9 = vpop.f32.mrf.mxu0 }
 0x29a   : > { %v1181_v10 = vpop.f32.mrf.mxu1 }
 0x29b   : > { %v1499_v11 = vsel %vm1489_vm3, %v1181_v10, -inf }
 0x29c   : > { %v3143_v12 = vpop.f32.mrf.mxu1  ;;  %1500 = vmax.xlane.f32.xlu0 %v1499_v11 }
 0x29d   : > { %v2164_v12 = vld [vmem:[#allocation14 + $0x4] sm:$0xf] }
 0x29e   : > { %v1257_v13 = vpop.f32.mrf.mxu0 }
 0x29f   : > { %v1502_v14 = vsel %vm1489_vm3, %v1257_v13, -inf }
 0x2a0   : > { %1503 = vmax.xlane.f32.xlu1 %v1502_v14  ;;  %v3148_v15 = vpop.f32.mrf.mxu0 }
 0x2a2   : > { %v1333_v16 = vpop.f32.mrf.mxu1 }
 0x2a3   : > { %v1505_v17 = vsel %vm1489_vm3, %v1333_v16, -inf }
 0x2a4   : > { %v3153_v18 = vpop.f32.mrf.mxu1  ;;  %1506 = vmax.xlane.f32.xlu0 %v1505_v17 }
 0x2a6   : > { %v1409_v19 = vpop.f32.mrf.mxu0  ;;  %v1485_v20 = vpop.f32.mrf.mxu1 }
 0x2a7   : > { %v1511_v21 = vsel %vm1489_vm3, %v1485_v20, -inf  ;;  %v1508_v22 = vsel %vm1489_vm3, %v1409_v19, -inf }
 0x2a8   : > { %v3163_v23 = vpop.f32.mrf.mxu1  ;;  %1512 = vmax.xlane.f32.xlu0 %v1511_v21  ;;  %1509 = vmax.xlane.f32.xlu1 %v1508_v22  ;;  %v3158_v24 = vpop.f32.mrf.mxu0 }
 0x2ab   : > { %v1492_v25 = vpop.xlane.xlu0 %1491 }
 0x2ac   : > { %v1514_v26 = vsub.f32 %v953_v58, %v1492_v25 }
 0x2ae   : > { %v1522_v28 = vmul.f32 1.442695, %v1514_v26  ;;  %v2319_v26 = vld [vmem:[#allocation14 + $0x8] sm:$0xf] }
 0x2b0   : > { %3365 = vpow2.f32 %v1522_v28 }
 0x2b9   : > { %718 = vrot.lane.b32.xlu1 %v3964_v27, %s3672_s6 }
 0x2bd   : > { %v3366_v30 = vpop.eup %3365 }
 0x2be   : > { %3167 = vmatmul.mubr.msk.f32.vlgmr.msra.gmra.mxu0 %vm1489_vm3, %v3366_v30  ;;  %728 = vrot.lane.b32.xlu0 %v3964_v27, %s3673_s11  ;;  %v1538_v31 = vsel %vm1489_vm3, %v3366_v30, 0.0 }
 0x2bf   : > { %3175 = vmatpush3.msra.mxu0 %v875_v29  ;;  %3176 = vmatprep.mubr.msk.f32.mxu0 %vm3666_vm0, %v3665_v0 }
 0x2c0   : > { %3184 = vmatprep.subr.mxu0 %v3665_v0 }
 0x2dd   : > { %1539 = vadd.xlane.f32.xlu0 %v1538_v31 }
 0x31d   : > { %v1495_v32 = vpop.xlane.xlu1 %1494 }
 0x31e   : > { %v1515_v33 = vsub.f32 %v1029_v4, %v1495_v32 }
 0x320   : > { %v1524_v34 = vmul.f32 1.442695, %v1515_v33 }
 0x321   : > { %v1498_v35 = vpop.xlane.xlu0 %1497 }
 0x322   : > { %3367 = vpow2.f32 %v1524_v34  ;;  %v1516_v36 = vsub.f32 %v1105_v7, %v1498_v35  ;;  %v2162_v7 = vld [vmem:[#allocation14] sm:$0xf]  ;;  %v2477_v34 = vld [vmem:[#allocation14 + $0x10] sm:$0xf] }
 0x324   : > { %v1526_v37 = vmul.f32 1.442695, %v1516_v36 }
 0x325   : > { %v1501_v38 = vpop.xlane.xlu0 %1500 }
 0x326   : > { %3369 = vpow2.f32 %v1526_v37  ;;  %v1517_v39 = vsub.f32 %v1181_v10, %v1501_v38 }
 0x328   : > { %v1528_v27 = vmul.f32 1.442695, %v1517_v39  ;;  %v2556_v39 = vld [vmem:[#allocation14 + $0x14] sm:$0xf] }
 0x329   : > { %v1504_v40 = vpop.xlane.xlu1 %1503 }
 0x32a   : > { %3371 = vpow2.f32 %v1528_v27  ;;  %v1518_v41 = vsub.f32 %v1257_v13, %v1504_v40 }
 0x32c   : > { %v1530_v42 = vmul.f32 1.442695, %v1518_v41 }
 0x32d   : > { %v1507_v43 = vpop.xlane.xlu0 %1506 }
 0x32e   : > { %3373 = vpow2.f32 %v1530_v42  ;;  %v1519_v44 = vsub.f32 %v1333_v16, %v1507_v43  ;;  %v2398_v16 = vld [vmem:[#allocation14 + $0xc] sm:$0xf]  ;;  %v2635_v43 = vld [vmem:[#allocation14 + $0x18] sm:$0xf] }
 0x32f   : > { %v3368_v45 = vpop.eup %3367 }
 0x330   : > { %v1532_v46 = vmul.f32 1.442695, %v1519_v44  ;;  %3172 = vmatmul.mubr.msk.f32.vlgmr.msra.gmra.mxu1 %vm1489_vm3, %v3368_v45  ;;  %v1541_v48 = vsel %vm1489_vm3, %v3368_v45, 0.0 }
 0x331   : > { %3180 = vmatpush3.msra.mxu1 %v876_v47  ;;  %v1513_v49 = vpop.xlane.xlu0 %1512  ;;  %1542 = vadd.xlane.f32.xlu1 %v1541_v48  ;;  %v1510_v50 = vpop.xlane.xlu1 %1509  ;;  %v2714_v48 = vld [vmem:[#allocation14 + $0x1c] sm:$0xf] }
 0x332   : > { %3375 = vpow2.f32 %v1532_v46  ;;  %v1521_v51 = vsub.f32 %v1485_v20, %v1513_v49  ;;  %v1520_v52 = vsub.f32 %v1409_v19, %v1510_v50  ;;  %3181 = vmatprep.mubr.msk.f32.mxu1 %vm3666_vm0, %v3665_v0  ;;  %3189 = vmatprep.subr.mxu1 %v3665_v0 }
 0x333   : > { %v3370_v53 = vpop.eup %3369 }
 0x334   : > { %v1536_v54 = vmul.f32 1.442695, %v1521_v51  ;;  %v1534_v55 = vmul.f32 1.442695, %v1520_v52  ;;  %3177 = vmatmul.mubr.msk.f32.vlgmr.msra.gmra.mxu0 %vm1489_vm3, %v3370_v53  ;;  %v1544_v57 = vsel %vm1489_vm3, %v3370_v53, 0.0 }
 0x335   : > { %3185 = vmatpush3.msra.mxu0 %v877_v56  ;;  %1545 = vadd.xlane.f32.xlu0 %v1544_v57  ;;  %v729_v58 = vpop.permute.xlu0 %728  ;;  %v719_v59 = vpop.permute.xlu1 %718 }
 0x336   : > { %3377 = vpow2.f32 %v1536_v54  ;;  %732 = vst.msk [vmem:[#allocation4 + $0x38] sm:$0xff] %vm658_vm2, %v729_v58  ;;  %722 = vst.msk [vmem:[#allocation4 + $0x30] sm:$0xff] %vm658_vm2, %v719_v59  ;;  %3186 = vmatprep.mubr.msk.f32.mxu0 %vm3666_vm0, %v3665_v0  ;;  %3194 = vmatprep.subr.mxu0 %v3665_v0 }
 0x337   : > { %v3372_v60 = vpop.eup %3371  ;;  %3379 = vpow2.f32 %v1534_v55 }
 0x338   : > { %3182 = vmatmul.mubr.msk.f32.vlgmr.msra.gmra.mxu1 %vm1489_vm3, %v3372_v60  ;;  %v1547_v62 = vsel %vm1489_vm3, %v3372_v60, 0.0 }
 0x339   : > { %3190 = vmatpush3.msra.mxu1 %v878_v61  ;;  %1548 = vadd.xlane.f32.xlu1 %v1547_v62 }
 0x33a   : > { %3191 = vmatprep.mubr.msk.f32.mxu1 %vm3666_vm0, %v3665_v0  ;;  %3199 = vmatprep.subr.mxu1 %v3665_v0 }
 0x33b   : > { %v3374_v63 = vpop.eup %3373 }
 0x33c   : > { %3187 = vmatmul.mubr.msk.f32.vlgmr.msra.gmra.mxu0 %vm1489_vm3, %v3374_v63  ;;  %v1550_v1 = vsel %vm1489_vm3, %v3374_v63, 0.0 }
 0x33d   : > { %1551 = vadd.xlane.f32.xlu0 %v1550_v1  ;;  %v879_v2 = vld [vmem:[#allocation4 + $0x30] sm:$0xff]  ;;  %3196 = vmatprep.mubr.msk.f32.mxu0 %vm3666_vm0, %v3665_v0  ;;  %v880_v4 = vld [vmem:[#allocation4 + $0x38] sm:$0xff] }
 0x33e   : > { %3195 = vmatpush3.msra.mxu0 %v879_v2 }
 0x33f   : > { %v3376_v3 = vpop.eup %3375  ;;  %3204 = vmatprep.subr.mxu0 %v3665_v0 }
 0x340   : > { %3192 = vmatmul.mubr.msk.f32.vlgmr.msra.gmra.mxu1 %vm1489_vm3, %v3376_v3  ;;  %v1553_v5 = vsel %vm1489_vm3, %v3376_v3, 0.0 }
 0x341   : > { %3200 = vmatpush3.msra.mxu1 %v880_v4  ;;  %1554 = vadd.xlane.f32.xlu1 %v1553_v5 }
 0x342   : > { %3201 = vmatprep.mubr.msk.f32.mxu1 %vm3666_vm0, %v3665_v0  ;;  %3209 = vmatprep.subr.mxu1 %v3665_v0 }
 0x343   : > { %v3378_v6 = vpop.eup %3377 }
 0x344   : > { %v3380_v8 = vpop.eup %3379  ;;  %3202 = vmatmul.mubr.msk.f32.vlgmr.msra.gmra.mxu1 %vm1489_vm3, %v3378_v6  ;;  %v1559_v9 = vsel %vm1489_vm3, %v3378_v6, 0.0 }
 0x345   : > { %3197 = vmatmul.mubr.msk.f32.vlgmr.msra.gmra.mxu0 %vm1489_vm3, %v3380_v8  ;;  %1560 = vadd.xlane.f32.xlu1 %v1559_v9  ;;  %v1556_v10 = vsel %vm1489_vm3, %v3380_v8, 0.0 }
 0x346   : > { %1557 = vadd.xlane.f32.xlu0 %v1556_v10  ;;  %3210 = vmatpush3.msk.msra.mxu1 %vm2168_vm4, %v2162_v7 }
 0x347   : > { %3211 = vmatprep.mubr.msk.f32.mxu1 %vm3666_vm0, %v3665_v0  ;;  %3206 = vmatprep.mubr.msk.f32.mxu0 %vm3666_vm0, %v3665_v0 }
 0x348   : > { %3219 = vmatprep.subr.mxu1 %v3665_v0  ;;  %3205 = vmatpush3.msk.msra.mxu0 %vm2168_vm4, %v2164_v12 }
 0x349   : > { %3214 = vmatprep.subr.mxu0 %v3665_v0 }
 0x366   : > { %v1540_v11 = vpop.xlane.xlu0 %1539 }
 0x367   : > { %3381 = vrcp.f32 %v1540_v11 }
 0x374   : > { %v3382_v13 = vpop.eup %3381 }
 0x37e   : > { %v1631_v14 = vpop.f32.mrf.mxu0 }
 0x37f   : > { %v2154_v15 = vmul.f32 %v3382_v13, %v1631_v14 }
 0x380   : > { %v3168_v17 = vpop.f32.mrf.mxu0 }
 0x381   : > { %3212 = vmatmul.mubr.msk.f32.vlgmr.msra.gmra.mxu1 %vm658_vm2, %v2154_v15  ;;  %v3023_v15 = vld [vmem:[%s4173_s9] ss:$0 sm:$0xff] }
 0x382   : > { %3220 = vmatpush3.msk.msra.mxu1 %vm2168_vm4, %v2398_v16  ;;  %3221 = vmatprep.mubr.msk.f32.mxu1 %vm3666_vm0, %v3665_v0 }
 0x383   : > { %3229 = vmatprep.subr.mxu1 %v3665_v0 }
 0x3ba   : > { %v1543_v18 = vpop.xlane.xlu1 %1542 }
 0x3bb   : > { %3383 = vrcp.f32 %v1543_v18 }
 0x3be   : > { %v1546_v19 = vpop.xlane.xlu0 %1545 }
 0x3bf   : > { %3385 = vrcp.f32 %v1546_v19 }
 0x3c2   : > { %v1549_v20 = vpop.xlane.xlu1 %1548 }
 0x3c3   : > { %3387 = vrcp.f32 %v1549_v20 }
 0x3c6   : > { %v1552_v21 = vpop.xlane.xlu0 %1551 }
 0x3c7   : > { %3389 = vrcp.f32 %v1552_v21 }
 0x3c8   : > { %v3384_v23 = vpop.eup %3383 }
 0x3ca   : > { %v1555_v22 = vpop.xlane.xlu1 %1554 }
 0x3cb   : > { %3391 = vrcp.f32 %v1555_v22 }
 0x3cc   : > { %v3386_v29 = vpop.eup %3385 }
 0x3ce   : > { %v1561_v30 = vpop.xlane.xlu1 %1560 }
 0x3cf   : > { %v1558_v32 = vpop.xlane.xlu0 %1557  ;;  %3393 = vrcp.f32 %v1561_v30 }
 0x3d0   : > { %v3388_v36 = vpop.eup %3387  ;;  %3395 = vrcp.f32 %v1558_v32 }
 0x3d4   : > { %v3390_v40 = vpop.eup %3389 }
 0x3d8   : > { %v3392_v45 = vpop.eup %3391 }
 0x3dc   : > { %v3394_v50 = vpop.eup %3393 }
 0x3dd   : > { %v3396_v52 = vpop.eup %3395 }
 0x3f0   : > { %v1704_v24 = vpop.f32.mrf.mxu1 }
 0x3f1   : > { %v2155_v25 = vmul.f32 %v3384_v23, %v1704_v24 }
 0x3f2   : > { %v3173_v28 = vpop.f32.mrf.mxu1 }
 0x3f3   : > { %3207 = vmatmul.mubr.msk.f32.vlgmr.msra.gmra.mxu0 %vm658_vm2, %v2155_v25 }
 0x3f4   : > { %v1777_v31 = vpop.f32.mrf.mxu0  ;;  %3215 = vmatpush3.msk.msra.mxu0 %vm2168_vm4, %v2319_v26  ;;  %3216 = vmatprep.mubr.msk.f32.mxu0 %vm3666_vm0, %v3665_v0 }
 0x3f5   : > { %v2156_v33 = vmul.f32 %v3386_v29, %v1777_v31  ;;  %3224 = vmatprep.subr.mxu0 %v3665_v0 }
 0x3f6   : > { %v3178_v35 = vpop.f32.mrf.mxu0 }
 0x3f7   : > { %3217 = vmatmul.mubr.msk.f32.vlgmr.msra.gmra.mxu0 %vm658_vm2, %v2156_v33 }
 0x3f8   : > { %v1850_v37 = vpop.f32.mrf.mxu1  ;;  %3225 = vmatpush3.msk.msra.mxu0 %vm2168_vm4, %v2477_v34  ;;  %3226 = vmatprep.mubr.msk.f32.mxu0 %vm3666_vm0, %v3665_v0 }
 0x3f9   : > { %v2157_v38 = vmul.f32 %v3388_v36, %v1850_v37  ;;  %3234 = vmatprep.subr.mxu0 %v3665_v0 }
 0x3fa   : > { %v3183_v27 = vpop.f32.mrf.mxu1 }
 0x3fb   : > { %3222 = vmatmul.mubr.msk.f32.vlgmr.msra.gmra.mxu1 %vm658_vm2, %v2157_v38 }
 0x3fc   : > { %v1923_v41 = vpop.f32.mrf.mxu0  ;;  %3230 = vmatpush3.msk.msra.mxu1 %vm2168_vm4, %v2556_v39  ;;  %3231 = vmatprep.mubr.msk.f32.mxu1 %vm3666_vm0, %v3665_v0 }
 0x3fd   : > { %v2158_v42 = vmul.f32 %v3390_v40, %v1923_v41  ;;  %3239 = vmatprep.subr.mxu1 %v3665_v0 }
 0x3fe   : > { %v3188_v44 = vpop.f32.mrf.mxu0 }
 0x3ff   : > { %3227 = vmatmul.mubr.msk.f32.vlgmr.msra.gmra.mxu0 %vm658_vm2, %v2158_v42 }
 0x400   : > { %v1996_v46 = vpop.f32.mrf.mxu1  ;;  %3235 = vmatpush3.msk.msra.mxu0 %vm2168_vm4, %v2635_v43  ;;  %3236 = vmatprep.mubr.msk.f32.mxu0 %vm3666_vm0, %v3665_v0 }
 0x401   : > { %v2159_v47 = vmul.f32 %v3392_v45, %v1996_v46 }
 0x402   : > { %v3193_v49 = vpop.f32.mrf.mxu1 }
 0x403   : > { %3232 = vmatmul.mubr.msk.f32.vlgmr.msra.gmra.mxu1 %vm658_vm2, %v2159_v47 }
 0x404   : > { %v2142_v51 = vpop.f32.mrf.mxu1  ;;  %3240 = vmatpush3.msk.msra.mxu1 %vm2168_vm4, %v2714_v48  ;;  %3241 = vmatprep.mubr.msk.f32.mxu1 %vm3666_vm0, %v3665_v0 }
 0x405   : > { %v2069_v53 = vpop.f32.mrf.mxu0  ;;  %v2161_v54 = vmul.f32 %v3394_v50, %v2142_v51 }
 0x406   : > { %v2160_v55 = vmul.f32 %v3396_v52, %v2069_v53  ;;  %v3203_v56 = vpop.f32.mrf.mxu1 }
 0x407   : > { %v3198_v57 = vpop.f32.mrf.mxu0  ;;  %3242 = vmatmul.mubr.msk.f32.vlgmr.msra.gmra.mxu1 %vm658_vm2, %v2161_v54 }
 0x408   : > { %3237 = vmatmul.mubr.msk.f32.vlgmr.msra.gmra.mxu0 %vm658_vm2, %v2160_v55 }
 0x441   : > { %v2314_v58 = vpop.f32.mrf.mxu1 }
 0x443   : > { %v3213_v59 = vpop.f32.mrf.mxu1 }
 0x4b3   : > { %v2238_v60 = vpop.f32.mrf.mxu0 }
 0x4b4   : > { %v2315_v0 = vadd.f32 %v2314_v58, %v2238_v60 }
 0x4b5   : > { %v3208_v61 = vpop.f32.mrf.mxu0 }
 0x4b7   : > { %v2392_v62 = vpop.f32.mrf.mxu0 }
 0x4b8   : > { %v2396_v4 = vadd.f32 %v2392_v62, %v2315_v0 }
 0x4b9   : > { %v3218_v63 = vpop.f32.mrf.mxu0 }
 0x4bb   : > { %v2471_v1 = vpop.f32.mrf.mxu1 }
 0x4bc   : > { %v2475_v6 = vadd.f32 %v2471_v1, %v2396_v4 }
 0x4bd   : > { %v3223_v2 = vpop.f32.mrf.mxu1 }
 0x4bf   : > { %v2550_v3 = vpop.f32.mrf.mxu0 }
 0x4c0   : > { %v2554_v8 = vadd.f32 %v2550_v3, %v2475_v6 }
 0x4c1   : > { %v3228_v5 = vpop.f32.mrf.mxu0 }
 0x4c3   : > { %v2629_v7 = vpop.f32.mrf.mxu1 }
 0x4c4   : > { %v2633_v10 = vadd.f32 %v2629_v7, %v2554_v8 }
 0x4c5   : > { %v3233_v9 = vpop.f32.mrf.mxu1 }
 0x4c7   : > { %v2787_v11 = vpop.f32.mrf.mxu1 }
 0x4c8   : > { %v2708_v12 = vpop.f32.mrf.mxu0 }
 0x4c9   : > { %v2712_v13 = vadd.f32 %v2708_v12, %v2633_v10  ;;  %v3243_v14 = vpop.f32.mrf.mxu1 }
 0x4ca   : > { %v3238_v16 = vpop.f32.mrf.mxu0 }
 0x4cb   : > { %v2791_v17 = vadd.f32 %v2787_v11, %v2712_v13 }
 0x4cd   : > { %v2799_v18 = vadd.f32 %v3023_v15, %v2791_v17 }
 0x4cf   : > { %2800 = vst.msk [vmem:[%s486_s19] sm:$0xff] %vm503_vm1, %v2799_v18 }
 0x4d0   : > { %3570 = shalt.err (!%p3567_p3)
}
 0x4d1   : > { %s3571_s8 = scalar_lea.hbm %s2814_s27, 128  ;;  %s3575_s11 = scalar_lea.hbm %s4174_s10, 256 }
 0x4d2   : > { %p3572_p7 = scmp.ne.s32.totalorder %s2814_s27, %s3571_s8  ;;  %p3576_p13 = scmp.lt.s32.totalorder %s2814_s27, %s4174_s10 }
 0x4d3   : > { %p3577_p2 = scmp.lt.s32.totalorder %s3575_s11, %s3571_s8 }
 0x4d4   : > { %p3573_p0 = pnand %p3572_p7, %p3836_p10 }
 0x4d5   : > { %p3578_p11 = por %p3577_p2, %p3576_p13 }
 0x4d6   : > { %p3574_p12 = pneg %p3573_p0 }
 0x4d8   : > { %p3579_p5 = pnand %p3578_p11, %p3574_p12 }
 0x4da   : > { %3582 = shalt.err (!%p3579_p5)
}
 0x4db   : > { %3264 = dma.vmem_to_hbm [thread:$0]  (%p3836_p10), %s2817_s25, 128, %s2814_s27, %s2802_s29  }
 0x4dc PF: > { %s2828_s20 = sand.u32 1, %s3633_s13   ;;  %p4205_p4 = scmp.ge.s32.totalorder %s3653_s18, 2 }
 0x4dd   : > { %s2829_s22 = scalar_lea.sflag [#allocation7], %s2828_s20 }
 0x4de   : > { %p3287_p6 = pnand %p4205_p4, %p3843_p1 }
 0x4e0   : > { %p3288_p8 = pneg %p3287_p6 }
 0x4e2   : > { %3628 = dma.done.wait (%p3288_p8), %s2829_s22, 128  }
 0x4e3   : > { %3630 = vsyncadd (%p3288_p8), %s2829_s22, 4294967168  ;;  %s31_s18 = sadd.s32 1, %s3653_s18   ;;  %s4206_s21 = sld [smem:[#allocation25_spill]] }
 0x4e4   : > { %p28_p9 = scmp.ge.s32.totalorder %s31_s18, 4   ;;  %s4207_s16 = sld [smem:[#allocation23_spill]] }
 0x4e5   : > { %s4208_s17 = sld [smem:[#allocation24_spill]]  ;;  %s4209_s13 = smov %s3637_s14 }
 0x4e6   : > { %s4210_s14 = smov %s3641_s15  ;;  %30 = sbr.rel (!%p28_p9) target bundleno = 16 (0x10), region = 166 }
 0x4e9   : > { %s4211_s15 = smov %s4206_s21 }
 0x4eb   :  { %2834 = vsyncpa [#allocation6], 1 }
 0x4ec   :  { %2836 = vsyncpa [#allocation6 + $0x1], 1 }
 0x4ed   :  { %2837 = vsyncpa [#allocation9], 1 }
 0x4ee   :  { %2839 = vsyncpa [#allocation9 + $0x1], 1 }
 0x4ef   :  { %2840 = vsyncpa [#allocation12], 1 }
 0x4f0   :  { %2841 = vsyncpa [#allocation15], 1 }
 0x4f1   :  { %2842 = vsyncpa [#allocation7], 1 }
 0x4f2   :  { %2844 = vsyncpa [#allocation7 + $0x1], 1 }

// kernel: tpu_custom_call.1
= control target key start
LH: loop header
LB: loop body
LE: loop exit
PB: predicated region body
PF: predicated region fallthrough
CT: control target
= control target key end

     0   :  { %s4164_s0 = inlined_call_operand.hbm [shape: f32[2,8,32], index: 0, kind: input, shape index: {}]   ;;  %s4165_s1 = inlined_call_operand.hbm [shape: f32[2,8,32], index: 1, kind: input, shape index: {}]   ;;  %s4166_s2 = inlined_call_operand.hbm [shape: f32[32,32], index: 2, kind: input, shape index: {}]   ;;  %s4167_s3 = inlined_call_operand.vmem [shape: f32[1,32], index: 3, kind: input, shape index: {}]   ;;  %s4168_s4 = inlined_call_operand.hbm [shape: f32[32,32], index: 4, kind: input, shape index: {}]   ;;  %s4169_s5 = inlined_call_operand.vmem [shape: f32[1,32], index: 5, kind: input, shape index: {}]   ;;  %s4170_s6 = inlined_call_operand.hbm [shape: f32[32,32], index: 6, kind: input, shape index: {}]   ;;  %s4171_s7 = inlined_call_operand.vmem [shape: f32[1,32], index: 7, kind: input, shape index: {}]   ;;  %s4172_s8 = inlined_call_operand.hbm [shape: f32[8,4,32], index: 8, kind: input, shape index: {}]   ;;  %s4173_s9 = inlined_call_operand.vmem [shape: f32[1,32], index: 9, kind: input, shape index: {}]   ;;  %s4174_s10 = inlined_call_operand.hbm [shape: f32[2,8,32], index: 10, kind: output, shape index: {}]  }
   0x1   :  { %4178 = sst [smem:[#allocation26_spill]] %s4164_s0 }
   0x2   :  { %4179 = sst [smem:[#allocation27_spill]] %s4166_s2 }
   0x3   :  { %4180 = sst [smem:[#allocation28_spill]] %s4168_s4 }
   0x4   :  { %4181 = sst [smem:[#allocation29_spill]] %s4170_s6 }
   0x5   :  { %4182 = sst [smem:[#allocation30_spill]] %s4172_s8 }
   0x6   :  { %15 = vsyncpa [#allocation6], 0 }
   0x7   :  { %17 = vsyncpa [#allocation6 + $0x1], 0 }
   0x8   :  { %18 = vsyncpa [#allocation9], 0 }
   0x9   :  { %20 = vsyncpa [#allocation9 + $0x1], 0 }
   0xa   :  { %21 = vsyncpa [#allocation12], 0 }
   0xb   :  { %22 = vsyncpa [#allocation15], 0 }
   0xc   :  { %23 = vsyncpa [#allocation7], 0 }
   0xd   :  { %25 = vsyncpa [#allocation7 + $0x1], 0  ;;  %s3730_s13 = smov 0   ;;  %s3732_s14 = smov 0  }
   0xe   :  { %s3734_s15 = smov 0   ;;  %s3736_s16 = smov 0  }
   0xf   :  { %s3738_s17 = smov 0   ;;  %s3740_s18 = smov 0  }
  0x10 LB: > { %4183 = sst [smem:[#allocation23_spill]] %s3649_s17  ;;  %s3761_s19 = sadd.s32 4294967295, %s3653_s18   ;;  %s3653_s18 = sphi %s3740_s18, %s31_s18   ;;  %s3649_s17 = sphi %s3738_s17, %s4208_s17   ;;  %s3645_s16 = sphi %s3736_s16, %s4207_s16   ;;  %s3641_s15 = sphi %s3734_s15, %s4211_s15   ;;  %s3637_s14 = sphi %s3732_s14, %s4210_s14   ;;  %s3633_s13 = sphi %s3730_s13, %s4209_s13  }
  0x11   : > { %p2959_p0 = scmp.ge.s32.totalorder %s3653_s18, 1  ;;  %p4175_p1 = scmp.eq.s32.totalorder %s3761_s19, 0 }
  0x12   : > { %p298_p2 = scmp.lt.s32.totalorder %s3653_s18, 3  ;;  %s3655_s21 = smov [#allocation10]  }
  0x13   : > { %s310_s22 = sshll.u32 %s3655_s21, 4  ;;  %s3656_s24 = smov [#allocation11]   ;;  %s311_s22 = int_to_ptr.vmem [resolvable:$true] %s310_s22 }
  0x14   : > { %p3766_p3 = pnand %p2959_p0, %p298_p2  ;;  %s326_s25 = sshll.u32 %s3656_s24, 4  ;;  %s327_s25 = int_to_ptr.vmem [resolvable:$true] %s326_s25 }
  0x15   : > { %s3657_s26 = smov [#allocation13]   ;;  %s3408_s28 = scalar_lea.vmem %s311_s22, 512 }
  0x16   : > { %p3266_p4 = pneg %p3766_p3  ;;  %s342_s27 = sshll.u32 %s3657_s26, 4  ;;  %s343_s27 = int_to_ptr.vmem [resolvable:$true] %s342_s27 }
  0x17   : > { %p3409_p8 = scmp.ne.s32.totalorder %s311_s22, %s3408_s28  ;;  %p3416_p11 = scmp.lt.s32.totalorder %s311_s22, %s311_s22 }
  0x18   : > { %p3775_p6 = pnand %p3266_p4, %p4175_p1  ;;  %p3417_p12 = scmp.lt.s32.totalorder %s3408_s28, %s3408_s28 }
  0x1a   : > { %p3399_p7 = pneg %p3775_p6  ;;  %p3418_p13 = por %p3417_p12, %p3416_p11 }
  0x1c   : > { %p3411_p9 = pnand %p3409_p8, %p3399_p7 }
  0x1e   : > { %p3412_p10 = pneg %p3411_p9 }
  0x20   : > { %p3419_p0 = pnand %p3418_p13, %p3412_p10 }
  0x22   : > { %3422 = shalt.err (!%p3419_p0)
}
  0x23   : > { %s3658_s29 = smov 128   ;;  %s3659_s30 = smov 8  }
  0x24   : > { %s4186_s2 = sld [smem:[#allocation27_spill]]  ;;  %s3434_s21 = scalar_lea.vmem %s327_s25, 512 }
  0x25   : > { %p3435_p2 = scmp.ne.s32.totalorder %s327_s25, %s3434_s21  ;;  %p3442_p9 = scmp.lt.s32.totalorder %s327_s25, %s327_s25 }
  0x26   : > { %p3443_p5 = scmp.lt.s32.totalorder %s3434_s21, %s3434_s21 }
  0x27   : > { %p3437_p4 = pnand %p3435_p2, %p3399_p7 }
  0x28   : > { %p3444_p11 = por %p3443_p5, %p3442_p9 }
  0x29   : > { %p3438_p8 = pneg %p3437_p4 }
  0x2a   : > { %3269 = dma.hbm_to_vmem [thread:$0]  (!%p3775_p6), %s4186_s2, 512, %s311_s22, [#allocation9], %s3658_s29, %s3658_s29, %s3659_s30  }
  0x2b   : > { %p3445_p10 = pnand %p3444_p11, %p3438_p8 }
  0x2d   : > { %3448 = shalt.err (!%p3445_p10)
}
  0x2e   : > { %s4187_s4 = sld [smem:[#allocation28_spill]]  ;;  %s3460_s22 = scalar_lea.vmem %s343_s27, 512 }
  0x2f   : > { %p3461_p12 = scmp.ne.s32.totalorder %s343_s27, %s3460_s22  ;;  %p3468_p2 = scmp.lt.s32.totalorder %s343_s27, %s343_s27 }
  0x30   : > { %p3469_p4 = scmp.lt.s32.totalorder %s3460_s22, %s3460_s22 }
  0x31   : > { %p3463_p13 = pnand %p3461_p12, %p3399_p7 }
  0x32   : > { %p3470_p1 = por %p3469_p4, %p3468_p2 }
  0x33   : > { %p3464_p0 = pneg %p3463_p13 }
  0x34   : > { %3272 = dma.hbm_to_vmem [thread:$0]  (!%p3775_p6), %s4187_s4, 512, %s327_s25, [#allocation12], %s3658_s29, %s3658_s29, %s3659_s30  }
  0x35   : > { %p3471_p5 = pnand %p3470_p1, %p3464_p0 }
  0x37   : > { %3474 = shalt.err (!%p3471_p5)
}
  0x38   : > { %s4188_s6 = sld [smem:[#allocation29_spill]]  ;;  %s3660_s25 = smov [#allocation14]  }
  0x39   : > { %s358_s12 = sshll.u32 %s3660_s25, 4  ;;  %s359_s12 = int_to_ptr.vmem [resolvable:$true] %s358_s12 }
  0x3a   : > { %s3486_s21 = scalar_lea.vmem %s359_s12, 512  ;;  %p3494_p10 = scmp.lt.s32.totalorder %s359_s12, %s359_s12 }
  0x3b   : > { %p3487_p8 = scmp.ne.s32.totalorder %s359_s12, %s3486_s21  ;;  %p3495_p12 = scmp.lt.s32.totalorder %s3486_s21, %s3486_s21 }
  0x3d   : > { %p3489_p9 = pnand %p3487_p8, %p3399_p7  ;;  %p3496_p1 = por %p3495_p12, %p3494_p10 }
  0x3e   : > { %3275 = dma.hbm_to_vmem [thread:$0]  (!%p3775_p6), %s4188_s6, 512, %s343_s27, [#allocation12], %s3658_s29, %s3658_s29, %s3659_s30  }
  0x3f   : > { %p3490_p11 = pneg %p3489_p9 }
  0x41   : > { %p3497_p13 = pnand %p3496_p1, %p3490_p11 }
  0x43   : > { %3500 = shalt.err (!%p3497_p13)
}
  0x44   : > { %s3661_s24 = smov 64   ;;  %s3662_s27 = smov 4  }
  0x45   : > { %s4189_s8 = sld [smem:[#allocation30_spill]]  ;;  %s2958_s26 = sadd.s32 4294967294, %s3653_s18  }
  0x46   : > { %s43_s22 = sadd.s32 1, %s3649_s17  ;;  %s52_s28 = sadd.s32 1, %s3641_s15 }
  0x47   : > { %p45_p7 = scmp.ge.s32.totalorder %s43_s22, 2  ;;  %p59_p0 = scmp.ne.s32.totalorder %s3641_s15, %s3637_s14 }
  0x48   : > { %p60_p2 = scmp.eq.s32.totalorder %s3653_s18, 0  ;;  %p65_p5 = scmp.ne.s32.totalorder %s3637_s14, %s3633_s13 }
  0x49   : > { %s4213_s22 = smov (%p45_p7, %s43_s22), 0  ;;  %p4192_p9 = scmp.eq.s32.totalorder %s3761_s19, 0 }
  0x4a   : > { %4190 = sst [smem:[#allocation24_spill]] %s4213_s22  ;;  %p3821_p4 = por %p60_p2, %p59_p0 }
  0x4b   : > { %3278 = dma.hbm_to_vmem [thread:$0]  (!%p3775_p6), %s4189_s8, 512, %s359_s12, [#allocation15], %s3661_s24, %s3661_s24, %s3662_s27  }
  0x4c   : > { %s47_s23 = ssub.s32 %s3649_s17, %s4213_s22  ;;  %p285_p6 = scmp.eq.s32.totalorder %s3761_s19, 1 }
  0x4d   : > { %p50_p8 = scmp.eq.s32.totalorder %s47_s23, 0  ;;  %p3832_p11 = por %p4192_p9, %p65_p5 }
  0x4e   : > { %p3836_p10 = por %p285_p6, %p59_p0  ;;  %p291_p12 = scmp.eq.s32.totalorder %s2958_s26, 1 }
  0x4f   : > { %s3841_s21 = scalar_select %p50_p8, %s3641_s15, %s52_s28  }
  0x50   : > { %p3843_p1 = por %p291_p12, %p65_p5  ;;  %p3294_p13 = scmp.lt.s32.totalorder %s3653_s18, 2 }
  0x51   : > { %4195 = sst [smem:[#allocation25_spill]] %s3841_s21  ;;  %s375_s27 = sand.u32 1, %s3641_s15  }
  0x52   : > { %s2966_s29 = sshll.u32 %s3649_s17, 7  ;;  %s2965_s30 = sshll.u32 %s375_s27, 3 }
  0x53   : > { %s4197_s0 = sld [smem:[#allocation26_spill]]  ;;  %s379_s6 = scalar_lea.vmem [#allocation5], %s2965_s30 }
  0x54   : > { %s387_s8 = sshll.u32 %s379_s6, 4  ;;  %p3855_p7 = pnand %p3294_p13, %p3821_p4  ;;  %s388_s8 = int_to_ptr.vmem [resolvable:$true] %s387_s8 }
  0x55   : > { %s3862_s21 = scalar_lea.hbm %s4165_s1, %s2966_s29  ;;  %s376_s17 = scalar_lea.sflag [#allocation6], %s375_s27 }
  0x56   : > { %p3503_p0 = pneg %p3855_p7  ;;  %s3514_s2 = scalar_lea.vmem %s388_s8, 128 }
  0x57   : > { %p3515_p2 = scmp.ne.s32.totalorder %s388_s8, %s3514_s2  ;;  %s3663_s6 = smov [#allocation5]  }
  0x58   : > { %s3519_s11 = sshll.u32 %s3663_s6, 4  ;;  %s3520_s11 = int_to_ptr.vmem [resolvable:$false] %s3519_s11 }
  0x59   : > { %s385_s4 = scalar_lea.hbm %s4197_s0, %s2966_s29  ;;  %p3517_p5 = pnand %p3515_p2, %p3503_p0 }
  0x5a   : > { %s3521_s23 = scalar_lea.vmem %s3520_s11, 256  ;;  %p3522_p6 = scmp.lt.s32.totalorder %s388_s8, %s3520_s11 }
  0x5b   : > { %p3518_p4 = pneg %p3517_p5  ;;  %p3523_p8 = scmp.lt.s32.totalorder %s3521_s23, %s3514_s2 }
  0x5d   : > { %p3524_p9 = por %p3523_p8, %p3522_p6 }
  0x5f   : > { %p3525_p12 = pnand %p3524_p9, %p3518_p4 }
  0x61   : > { %3528 = shalt.err (!%p3525_p12)
}
  0x62   : > { %3282 = dma.hbm_to_vmem [thread:$0]  (!%p3855_p7), %s385_s4, 128, %s388_s8, %s376_s17  }
  0x63   : > { %s394_s27 = sand.u32 1, %s3653_s18   ;;  %s398_s29 = scalar_lea.vmem [#allocation8], %s2965_s30 }
  0x64   : > { %s405_s26 = sshll.u32 %s398_s29, 4  ;;  %s395_s28 = scalar_lea.sflag [#allocation9], %s394_s27  ;;  %s406_s26 = int_to_ptr.vmem [resolvable:$true] %s405_s26 }
  0x65   : > { %s3542_s0 = scalar_lea.vmem %s406_s26, 128  ;;  %s3664_s2 = smov [#allocation8]  }
  0x66   : > { %p3543_p13 = scmp.ne.s32.totalorder %s406_s26, %s3542_s0  ;;  %s3547_s6 = sshll.u32 %s3664_s2, 4  ;;  %s3548_s6 = int_to_ptr.vmem [resolvable:$false] %s3547_s6 }
  0x67   : > { %s3549_s11 = scalar_lea.vmem %s3548_s6, 256  ;;  %p3550_p4 = scmp.lt.s32.totalorder %s406_s26, %s3548_s6 }
  0x68   : > { %p3545_p2 = pnand %p3543_p13, %p3503_p0  ;;  %p3551_p6 = scmp.lt.s32.totalorder %s3549_s11, %s3542_s0 }
  0x6a   : > { %p3546_p5 = pneg %p3545_p2  ;;  %p3552_p8 = por %p3551_p6, %p3550_p4 }
  0x6c   : > { %p3553_p9 = pnand %p3552_p8, %p3546_p5 }
  0x6e   : > { %3556 = shalt.err (!%p3553_p9)
}
  0x6f   : > { %3285 = dma.hbm_to_vmem [thread:$0]  (!%p3855_p7), %s3862_s21, 128, %s406_s26, %s395_s28  }
  0x70   : > { %414 = sbr.rel (%p3766_p3) target bundleno = 1244 (0x4dc), region = 60  ;;  %s3881_s4 = sand.u32 (!%p3766_p3), 1, %s3637_s14  }
  0x71   : > { %s3884_s8 = sshll.u32 (!%p3766_p3), %s3881_s4, 3  ;;  %s417_s0 = scalar_lea.sflag (!%p3766_p3), [#allocation6], %s3881_s4 }
  0x72   : > { %s420_s17 = scalar_lea.vmem (!%p3766_p3), [#allocation5], %s3884_s8 }
  0x75   : > { %3608 = dma.done.wait (%p3832_p11), %s417_s0, 128  }
  0x76   : > { %3610 = vsyncadd (%p3832_p11), %s417_s0, 4294967168  ;;  %s425_s20 = sand.u32 1, %s3761_s19   ;;  %s429_s21 = scalar_lea.vmem [#allocation8], %s3884_s8 }
  0x77   : > { %s426_s22 = scalar_lea.sflag [#allocation9], %s425_s20 }
  0x78   : > { %3612 = dma.done.wait (%p3832_p11), %s426_s22, 128  }
  0x79   : > { %3614 = vsyncadd (%p3832_p11), %s426_s22, 4294967168  ;;  %p4199_p3 = scmp.eq.s32.totalorder %s3761_s19, 0 }
  0x7b   : > { %3616 = dma.done.wait (%p4199_p3), [#allocation9], 512   ;;  %p4200_p7 = pmov %p4199_p3 }
  0x7c   : > { %p4201_p0 = pmov %p4199_p3 }
  0x7d   : > { %3618 = vsyncadd (%p4200_p7), [#allocation9], 4294966784 }
  0x7e   : > { %3620 = dma.done.wait (%p4201_p0), [#allocation12], 1024   ;;  %p4202_p12 = pmov %p4201_p0 }
  0x7f   : > { %p4203_p13 = pmov %p4201_p0 }
  0x80   : > { %3622 = vsyncadd (%p4202_p12), [#allocation12], 4294966272 }
  0x81   : > { %3624 = dma.done.wait (%p4203_p13), [#allocation15], 512   ;;  %p4204_p2 = pmov %p4201_p0 }
  0x82   : > { %v3665_v0 = vmov 0.0   ;;  %vm3666_vm0 = vmmov 0   ;;  %v495_v1 = vld [vmem:[#allocation11 + $0x18] sm:$0xff]  ;;  %v494_v2 = vld [vmem:[#allocation11 + $0x10] sm:$0xff]  ;;  %v493_v3 = vld [vmem:[#allocation11 + $0x8] sm:$0xff]  ;;  %vm503_vm1 = vcmask 261120  }
  0x83   : > { %3626 = vsyncadd (%p4204_p2), [#allocation15], 4294966784  ;;  %3091 = vmatprep.subr.mxu0 %v3665_v0  ;;  %3099 = vmatprep.mubr.msk.f32.mxu0 %vm3666_vm0, %v3665_v0  ;;  %v580_v4 = vld [vmem:[#allocation13 + $0x18] sm:$0xff]  ;;  %v579_v5 = vld [vmem:[#allocation13 + $0x10] sm:$0xff]  ;;  %vm658_vm2 = vcmask 31744   ;;  %s3667_s30 = smov 120  }
  0x84   : > { %3102 = vmatprep.subr.mxu1 %v3665_v0  ;;  %3110 = vmatprep.mubr.msk.f32.mxu1 %vm3666_vm0, %v3665_v0  ;;  %v492_v6 = vld [vmem:[#allocation11] sm:$0xff]  ;;  %v491_v7 = vld [vmem:[%s429_s21] sm:$0xff]  ;;  %v578_v9 = vld [vmem:[#allocation13 + $0x8] sm:$0xff]  ;;  %s3668_s23 = smov 124   ;;  %s3669_s26 = smov 116   ;;  %vm1489_vm3 = vcmask 64512  }
  0x85   : > { %3092 = vmatpush3.msra.mxu0 %v495_v1  ;;  %3103 = vmatpush3.msra.mxu1 %v580_v4  ;;  %v737_v8 = vld [vmem:[#allocation10 + $0x18] sm:$0xff]  ;;  %v736_v10 = vld [vmem:[#allocation10 + $0x10] sm:$0xff]  ;;  %v577_v11 = vld [vmem:[#allocation13] sm:$0xff]  ;;  %s3670_s28 = smov 112   ;;  %s3671_s2 = smov 108   ;;  %vm2168_vm4 = vcmask 1043456  }
  0x86   : > { %3093 = vmatprep.subr.mxu0 %v3665_v0  ;;  %3104 = vmatprep.subr.mxu1 %v3665_v0  ;;  %v735_v12 = vld [vmem:[#allocation10 + $0x8] sm:$0xff]  ;;  %v734_v13 = vld [vmem:[#allocation10] sm:$0xff]  ;;  %s3672_s6 = smov 104   ;;  %s3673_s11 = smov 100  }
  0x87   : > { %3094 = vmatpush3.msra.mxu0 %v494_v2  ;;  %3105 = vmatpush3.msra.mxu1 %v579_v5  ;;  %v733_v14 = vld [vmem:[%s420_s17] sm:$0xff]  ;;  %s3025_s21 = sshll.u32 %s3645_s16, 7  ;;  %s486_s19 = scalar_lea.vmem [#allocation16], %s3884_s8 }
  0x88   : > { %3095 = vmatprep.subr.mxu0 %v3665_v0  ;;  %3106 = vmatprep.subr.mxu1 %v3665_v0  ;;  %v2977_v15 = vld [vmem:[%s4169_s5] ss:$0 sm:$0xff]  ;;  %s2816_s25 = sshll.u32 %s486_s19, 4  ;;  %s2814_s27 = scalar_lea.hbm %s4174_s10, %s3025_s21  ;;  %s2817_s25 = int_to_ptr.vmem [resolvable:$true] %s2816_s25 }
  0x89   : > { %3096 = vmatpush3.msra.mxu0 %v493_v3  ;;  %3107 = vmatpush3.msra.mxu1 %v578_v9  ;;  %v2981_v19 = vld [vmem:[%s4167_s3] ss:$0 sm:$0xff]  ;;  %s2802_s29 = scalar_lea.sflag [#allocation7], %s3881_s4 }
  0x8a   : > { %3097 = vmatprep.subr.mxu0 %v3665_v0  ;;  %3108 = vmatprep.subr.mxu1 %v3665_v0  ;;  %v2979_v25 = vld [vmem:[%s4171_s7] ss:$0 sm:$0xff] }
  0x8b   : > { %3098 = vmatpush3.msra.mxu0 %v492_v6  ;;  %3109 = vmatpush3.msra.mxu1 %v577_v11 }
  0x8c   : > { %3100 = vmatmul.mubr.msk.f32.vlgmr.msra.gmra.mxu0 %vm503_vm1, %v491_v7  ;;  %3113 = vmatprep.subr.mxu0 %v3665_v0 }
  0x8d   : > { %3114 = vmatpush3.msra.mxu0 %v737_v8  ;;  %3121 = vmatprep.mubr.msk.f32.mxu0 %vm3666_vm0, %v3665_v0 }
  0x8e   : > { %3115 = vmatprep.subr.mxu0 %v3665_v0  ;;  %3111 = vmatmul.mubr.msk.f32.vlgmr.msra.gmra.mxu1 %vm503_vm1, %v491_v7 }
  0x8f   : > { %3116 = vmatpush3.msra.mxu0 %v736_v10  ;;  %3124 = vmatprep.subr.mxu1 %v3665_v0 }
  0x90   : > { %3117 = vmatprep.subr.mxu0 %v3665_v0  ;;  %3126 = vmatprep.mubr.msk.f32.mxu1 %vm3666_vm0, %v3665_v0 }
  0x91   : > { %3118 = vmatpush3.msra.mxu0 %v735_v12 }
  0x92   : > { %3119 = vmatprep.subr.mxu0 %v3665_v0 }
  0x93   : > { %3120 = vmatpush3.msra.mxu0 %v734_v13 }
  0x94   : > { %3122 = vmatmul.mubr.msk.f32.vlgmr.msra.gmra.mxu0 %vm503_vm1, %v733_v14  ;;  %3134 = vmatprep.subr.mxu0 %v3665_v0 }
  0x95   : > { %3136 = vmatprep.mubr.msk.f32.mxu0 %vm3666_vm0, %v3665_v0 }
 0x14c   : > { %v573_v16 = vpop.f32.mrf.mxu0 }
 0x14d   : > { %v574_v17 = vadd.f32 %v2977_v15, %v573_v16 }
 0x14e   : > { %v3101_v18 = vpop.f32.mrf.mxu0  ;;  %v654_v26 = vpop.f32.mrf.mxu1 }
 0x14f   : > { %659 = vst.msk [vmem:[#allocation3] sm:$0xff] %vm658_vm2, %v574_v17  ;;  %673 = vrot.lane.b32.xlu1 %v574_v17, %s3667_s30  ;;  %662 = vrot.lane.b32.xlu0 %v574_v17, %s3668_s23  ;;  %v3964_v27 = vadd.f32 %v2979_v25, %v654_v26 }
 0x150   : > { %v3112_v28 = vpop.f32.mrf.mxu1 }
 0x151   : > { %660 = vst.msk [vmem:[#allocation4] sm:$0xff] %vm658_vm2, %v3964_v27 }
 0x153   : > { %683 = vrot.lane.b32.xlu1 %v574_v17, %s3669_s26 }
 0x154   : > { %v815_v20 = vpop.f32.mrf.mxu0 }
 0x155   : > { %v816_v21 = vadd.f32 %v2981_v19, %v815_v20 }
 0x156   : > { %v3123_v22 = vpop.f32.mrf.mxu0  ;;  %v865_v23 = vld [vmem:[#allocation3] sm:$0xff] }
 0x157   : > { %820 = vst.msk [vmem:[#allocation2] sm:$0xff] %vm658_vm2, %v816_v21  ;;  %693 = vrot.lane.b32.xlu1 %v574_v17, %s3670_s28  ;;  %822 = vrot.lane.b32.xlu0 %v816_v21, %s3668_s23 }
 0x158   : > { %3125 = vmatpush3.xpose.msk.msra.mxu1 %vm658_vm2, %v865_v23  ;;  %v873_v55 = vld [vmem:[#allocation4] sm:$0xff] }
 0x159   : > { %3129 = vmatprep.subr.mxu1 %v3665_v0 }
 0x15b   : > { %703 = vrot.lane.b32.xlu1 %v574_v17, %s3671_s2  ;;  %827 = vrot.lane.b32.xlu0 %v816_v21, %s3667_s30 }
 0x15e   : > { %v857_v24 = vld [vmem:[#allocation2] sm:$0xff] }
 0x15f   : > { %713 = vrot.lane.b32.xlu1 %v574_v17, %s3672_s6  ;;  %832 = vrot.lane.b32.xlu0 %v816_v21, %s3669_s26 }
 0x160   : > { %3127 = vmatmul.mubr.msk.f32.vlgmr.msra.gmra.mxu1 %vm658_vm2, %v857_v24 }
 0x161   : > { %3131 = vmatprep.mubr.msk.f32.mxu1 %vm3666_vm0, %v3665_v0 }
 0x163   : > { %723 = vrot.lane.b32.xlu1 %v574_v17, %s3673_s11  ;;  %837 = vrot.lane.b32.xlu0 %v816_v21, %s3670_s28 }
 0x167   : > { %852 = vrot.lane.b32.xlu1 %v816_v21, %s3673_s11  ;;  %842 = vrot.lane.b32.xlu0 %v816_v21, %s3671_s2 }
 0x16b   : > { %847 = vrot.lane.b32.xlu0 %v816_v21, %s3672_s6  ;;  %668 = vrot.lane.b32.xlu1 %v3964_v27, %s3668_s23 }
 0x16f   : > { %678 = vrot.lane.b32.xlu0 %v3964_v27, %s3667_s30  ;;  %688 = vrot.lane.b32.xlu1 %v3964_v27, %s3669_s26  ;;  %s3557_s26 = scalar_lea.vmem %s2817_s25, 128 }
 0x170   : > { %p3558_p11 = scmp.ne.s32.totalorder %s2817_s25, %s3557_s26 }
 0x172   : > { %p3559_p5 = pnand %p3558_p11, %p3836_p10 }
 0x173   : > { %708 = vrot.lane.b32.xlu0 %v3964_v27, %s3671_s2  ;;  %698 = vrot.lane.b32.xlu1 %v3964_v27, %s3670_s28  ;;  %s3674_s28 = smov [#allocation16]  }
 0x174   : > { %p3560_p4 = pneg %p3559_p5  ;;  %s3561_s2 = sshll.u32 %s3674_s28, 4  ;;  %s3562_s2 = int_to_ptr.vmem [resolvable:$false] %s3561_s2 }
 0x175   : > { %s3563_s16 = scalar_lea.vmem %s3562_s2, 256  ;;  %p3564_p6 = scmp.lt.s32.totalorder %s2817_s25, %s3562_s2 }
 0x176   : > { %p3565_p8 = scmp.lt.s32.totalorder %s3563_s16, %s3557_s26 }
 0x178   : > { %p3566_p9 = por %p3565_p8, %p3564_p6 }
 0x17a   : > { %p3567_p3 = pnand %p3566_p9, %p3560_p4 }
 0x1c1   : > { %v674_v29 = vpop.permute.xlu1 %673  ;;  %v663_v30 = vpop.permute.xlu0 %662 }
 0x1c2   : > { %677 = vst.msk [vmem:[#allocation3 + $0x10] sm:$0xff] %vm658_vm2, %v674_v29  ;;  %666 = vst.msk [vmem:[#allocation3 + $0x8] sm:$0xff] %vm658_vm2, %v663_v30 }
 0x1c5   : > { %v684_v31 = vpop.permute.xlu1 %683 }
 0x1c6   : > { %687 = vst.msk [vmem:[#allocation3 + $0x18] sm:$0xff] %vm658_vm2, %v684_v31 }
 0x1c9   : > { %v694_v32 = vpop.permute.xlu1 %693  ;;  %v823_v33 = vpop.permute.xlu0 %822  ;;  %v866_v34 = vld [vmem:[#allocation3 + $0x8] sm:$0xff]  ;;  %v867_v35 = vld [vmem:[#allocation3 + $0x10] sm:$0xff] }
 0x1ca   : > { %697 = vst.msk [vmem:[#allocation3 + $0x20] sm:$0xff] %vm658_vm2, %v694_v32  ;;  %826 = vst.msk [vmem:[#allocation2 + $0x8] sm:$0xff] %vm658_vm2, %v823_v33  ;;  %3130 = vmatpush3.xpose.msk.msra.mxu1 %vm658_vm2, %v866_v34  ;;  %3135 = vmatpush3.xpose.msk.msra.mxu0 %vm658_vm2, %v867_v35 }
 0x1cb   : > { %3139 = vmatprep.subr.mxu1 %v3665_v0  ;;  %3144 = vmatprep.subr.mxu0 %v3665_v0 }
 0x1cd   : > { %v704_v36 = vpop.permute.xlu1 %703  ;;  %v828_v37 = vpop.permute.xlu0 %827  ;;  %v868_v41 = vld [vmem:[#allocation3 + $0x18] sm:$0xff] }
 0x1ce   : > { %707 = vst.msk [vmem:[#allocation3 + $0x28] sm:$0xff] %vm658_vm2, %v704_v36  ;;  %831 = vst.msk [vmem:[#allocation2 + $0x10] sm:$0xff] %vm658_vm2, %v828_v37 }
 0x1d1   : > { %v714_v38 = vpop.permute.xlu1 %713  ;;  %v833_v39 = vpop.permute.xlu0 %832  ;;  %v858_v40 = vld [vmem:[#allocation2 + $0x8] sm:$0xff]  ;;  %v869_v45 = vld [vmem:[#allocation3 + $0x20] sm:$0xff] }
 0x1d2   : > { %717 = vst.msk [vmem:[#allocation3 + $0x30] sm:$0xff] %vm658_vm2, %v714_v38  ;;  %836 = vst.msk [vmem:[#allocation2 + $0x18] sm:$0xff] %vm658_vm2, %v833_v39  ;;  %3132 = vmatmul.mubr.msk.f32.vlgmr.msra.gmra.mxu1 %vm658_vm2, %v858_v40 }
 0x1d3   : > { %3140 = vmatpush3.xpose.msk.msra.mxu1 %vm658_vm2, %v868_v41  ;;  %3141 = vmatprep.mubr.msk.f32.mxu1 %vm3666_vm0, %v3665_v0 }
 0x1d4   : > { %3149 = vmatprep.subr.mxu1 %v3665_v0 }
 0x1d5   : > { %v724_v42 = vpop.permute.xlu1 %723  ;;  %v838_v43 = vpop.permute.xlu0 %837  ;;  %v859_v44 = vld [vmem:[#allocation2 + $0x10] sm:$0xff]  ;;  %v870_v49 = vld [vmem:[#allocation3 + $0x28] sm:$0xff] }
 0x1d6   : > { %727 = vst.msk [vmem:[#allocation3 + $0x38] sm:$0xff] %vm658_vm2, %v724_v42  ;;  %841 = vst.msk [vmem:[#allocation2 + $0x20] sm:$0xff] %vm658_vm2, %v838_v43  ;;  %3137 = vmatmul.mubr.msk.f32.vlgmr.msra.gmra.mxu0 %vm658_vm2, %v859_v44 }
 0x1d7   : > { %3145 = vmatpush3.xpose.msk.msra.mxu0 %vm658_vm2, %v869_v45  ;;  %3146 = vmatprep.mubr.msk.f32.mxu0 %vm3666_vm0, %v3665_v0 }
 0x1d8   : > { %3154 = vmatprep.subr.mxu0 %v3665_v0 }
 0x1d9   : > { %v853_v46 = vpop.permute.xlu1 %852  ;;  %v843_v47 = vpop.permute.xlu0 %842  ;;  %v860_v48 = vld [vmem:[#allocation2 + $0x18] sm:$0xff]  ;;  %v871_v52 = vld [vmem:[#allocation3 + $0x30] sm:$0xff] }
 0x1da   : > { %856 = vst.msk [vmem:[#allocation2 + $0x38] sm:$0xff] %vm658_vm2, %v853_v46  ;;  %846 = vst.msk [vmem:[#allocation2 + $0x28] sm:$0xff] %vm658_vm2, %v843_v47  ;;  %3142 = vmatmul.mubr.msk.f32.vlgmr.msra.gmra.mxu1 %vm658_vm2, %v860_v48 }
 0x1db   : > { %3150 = vmatpush3.xpose.msk.msra.mxu1 %vm658_vm2, %v870_v49  ;;  %3151 = vmatprep.mubr.msk.f32.mxu1 %vm3666_vm0, %v3665_v0 }
 0x1dc   : > { %3159 = vmatprep.subr.mxu1 %v3665_v0 }
 0x1dd   : > { %v848_v50 = vpop.permute.xlu0 %847  ;;  %v861_v51 = vld [vmem:[#allocation2 + $0x20] sm:$0xff]  ;;  %v872_v54 = vld [vmem:[#allocation3 + $0x38] sm:$0xff]  ;;  %v669_v63 = vpop.permute.xlu1 %668 }
 0x1de   : > { %851 = vst.msk [vmem:[#allocation2 + $0x30] sm:$0xff] %vm658_vm2, %v848_v50  ;;  %3147 = vmatmul.mubr.msk.f32.vlgmr.msra.gmra.mxu0 %vm658_vm2, %v861_v51  ;;  %672 = vst.msk [vmem:[#allocation4 + $0x8] sm:$0xff] %vm658_vm2, %v669_v63 }
 0x1df   : > { %3155 = vmatpush3.xpose.msk.msra.mxu0 %vm658_vm2, %v871_v52  ;;  %3156 = vmatprep.mubr.msk.f32.mxu0 %vm3666_vm0, %v3665_v0 }
 0x1e0   : > { %3164 = vmatprep.subr.mxu0 %v3665_v0 }
 0x1e1   : > { %v862_v53 = vld [vmem:[#allocation2 + $0x28] sm:$0xff]  ;;  %v864_v57 = vld [vmem:[#allocation2 + $0x38] sm:$0xff]  ;;  %v679_v59 = vpop.permute.xlu0 %678  ;;  %v689_v1 = vpop.permute.xlu1 %688 }
 0x1e2   : > { %3152 = vmatmul.mubr.msk.f32.vlgmr.msra.gmra.mxu1 %vm658_vm2, %v862_v53  ;;  %682 = vst.msk [vmem:[#allocation4 + $0x10] sm:$0xff] %vm658_vm2, %v679_v59  ;;  %692 = vst.msk [vmem:[#allocation4 + $0x18] sm:$0xff] %vm658_vm2, %v689_v1 }
 0x1e3   : > { %3160 = vmatpush3.xpose.msk.msra.mxu1 %vm658_vm2, %v872_v54  ;;  %3161 = vmatprep.mubr.msk.f32.mxu1 %vm3666_vm0, %v3665_v0 }
 0x1e4   : > { %3169 = vmatprep.subr.mxu1 %v3665_v0 }
 0x1e5   : > { %v863_v56 = vld [vmem:[#allocation2 + $0x30] sm:$0xff]  ;;  %v709_v62 = vpop.permute.xlu0 %708  ;;  %v874_v2 = vld [vmem:[#allocation4 + $0x8] sm:$0xff]  ;;  %v699_v3 = vpop.permute.xlu1 %698 }
 0x1e6   : > { %3157 = vmatmul.mubr.msk.f32.vlgmr.msra.gmra.mxu0 %vm658_vm2, %v863_v56  ;;  %3162 = vmatmul.mubr.msk.f32.vlgmr.msra.gmra.mxu1 %vm658_vm2, %v864_v57  ;;  %712 = vst.msk [vmem:[#allocation4 + $0x28] sm:$0xff] %vm658_vm2, %v709_v62  ;;  %702 = vst.msk [vmem:[#allocation4 + $0x20] sm:$0xff] %vm658_vm2, %v699_v3 }
 0x1e7   : > { %3165 = vmatpush3.msra.mxu0 %v873_v55  ;;  %3166 = vmatprep.mubr.msk.f32.mxu0 %vm3666_vm0, %v3665_v0 }
 0x1e8   : > { %3174 = vmatprep.subr.mxu0 %v3665_v0  ;;  %3171 = vmatprep.mubr.msk.f32.mxu1 %vm3666_vm0, %v3665_v0 }
 0x1e9   : > { %3170 = vmatpush3.msra.mxu1 %v874_v2  ;;  %v875_v29 = vld [vmem:[#allocation4 + $0x10] sm:$0xff]  ;;  %v876_v47 = vld [vmem:[#allocation4 + $0x18] sm:$0xff] }
 0x1ea   : > { %3179 = vmatprep.subr.mxu1 %v3665_v0 }
 0x1ed   : > { %v877_v56 = vld [vmem:[#allocation4 + $0x20] sm:$0xff] }
 0x220   : > { %v953_v58 = vpop.f32.mrf.mxu1 }
 0x221   : > { %v1490_v60 = vsel %vm1489_vm3, %v953_v58, -inf }
 0x222   : > { %1491 = vmax.xlane.f32.xlu0 %v1490_v60  ;;  %v3128_v61 = vpop.f32.mrf.mxu1 }
 0x223   : > { %v878_v61 = vld [vmem:[#allocation4 + $0x28] sm:$0xff] }
 0x292   : > { %v1029_v4 = vpop.f32.mrf.mxu1 }
 0x293   : > { %v1493_v5 = vsel %vm1489_vm3, %v1029_v4, -inf }
 0x294   : > { %1494 = vmax.xlane.f32.xlu1 %v1493_v5  ;;  %v3133_v6 = vpop.f32.mrf.mxu1 }
 0x296   : > { %v1105_v7 = vpop.f32.mrf.mxu0 }
 0x297   : > { %v1496_v8 = vsel %vm1489_vm3, %v1105_v7, -inf }
 0x298   : > { %1497 = vmax.xlane.f32.xlu0 %v1496_v8  ;;  %v3138_v9 = vpop.f32.mrf.mxu0 }
 0x29a   : > { %v1181_v10 = vpop.f32.mrf.mxu1 }
 0x29b   : > { %v1499_v11 = vsel %vm1489_vm3, %v1181_v10, -inf }
 0x29c   : > { %v3143_v12 = vpop.f32.mrf.mxu1  ;;  %1500 = vmax.xlane.f32.xlu0 %v1499_v11 }
 0x29d   : > { %v2164_v12 = vld [vmem:[#allocation14 + $0x4] sm:$0xf] }
 0x29e   : > { %v1257_v13 = vpop.f32.mrf.mxu0 }
 0x29f   : > { %v1502_v14 = vsel %vm1489_vm3, %v1257_v13, -inf }
 0x2a0   : > { %1503 = vmax.xlane.f32.xlu1 %v1502_v14  ;;  %v3148_v15 = vpop.f32.mrf.mxu0 }
 0x2a2   : > { %v1333_v16 = vpop.f32.mrf.mxu1 }
 0x2a3   : > { %v1505_v17 = vsel %vm1489_vm3, %v1333_v16, -inf }
 0x2a4   : > { %v3153_v18 = vpop.f32.mrf.mxu1  ;;  %1506 = vmax.xlane.f32.xlu0 %v1505_v17 }
 0x2a6   : > { %v1409_v19 = vpop.f32.mrf.mxu0  ;;  %v1485_v20 = vpop.f32.mrf.mxu1 }
 0x2a7   : > { %v1511_v21 = vsel %vm1489_vm3, %v1485_v20, -inf  ;;  %v1508_v22 = vsel %vm1489_vm3, %v1409_v19, -inf }
 0x2a8   : > { %v3163_v23 = vpop.f32.mrf.mxu1  ;;  %1512 = vmax.xlane.f32.xlu0 %v1511_v21  ;;  %1509 = vmax.xlane.f32.xlu1 %v1508_v22  ;;  %v3158_v24 = vpop.f32.mrf.mxu0 }
 0x2ab   : > { %v1492_v25 = vpop.xlane.xlu0 %1491 }
 0x2ac   : > { %v1514_v26 = vsub.f32 %v953_v58, %v1492_v25 }
 0x2ae   : > { %v1522_v28 = vmul.f32 1.442695, %v1514_v26  ;;  %v2319_v26 = vld [vmem:[#allocation14 + $0x8] sm:$0xf] }
 0x2b0   : > { %3365 = vpow2.f32 %v1522_v28 }
 0x2b9   : > { %718 = vrot.lane.b32.xlu1 %v3964_v27, %s3672_s6 }
 0x2bd   : > { %v3366_v30 = vpop.eup %3365 }
 0x2be   : > { %3167 = vmatmul.mubr.msk.f32.vlgmr.msra.gmra.mxu0 %vm1489_vm3, %v3366_v30  ;;  %728 = vrot.lane.b32.xlu0 %v3964_v27, %s3673_s11  ;;  %v1538_v31 = vsel %vm1489_vm3, %v3366_v30, 0.0 }
 0x2bf   : > { %3175 = vmatpush3.msra.mxu0 %v875_v29  ;;  %3176 = vmatprep.mubr.msk.f32.mxu0 %vm3666_vm0, %v3665_v0 }
 0x2c0   : > { %3184 = vmatprep.subr.mxu0 %v3665_v0 }
 0x2dd   : > { %1539 = vadd.xlane.f32.xlu0 %v1538_v31 }
 0x31d   : > { %v1495_v32 = vpop.xlane.xlu1 %1494 }
 0x31e   : > { %v1515_v33 = vsub.f32 %v1029_v4, %v1495_v32 }
 0x320   : > { %v1524_v34 = vmul.f32 1.442695, %v1515_v33 }
 0x321   : > { %v1498_v35 = vpop.xlane.xlu0 %1497 }
 0x322   : > { %3367 = vpow2.f32 %v1524_v34  ;;  %v1516_v36 = vsub.f32 %v1105_v7, %v1498_v35  ;;  %v2162_v7 = vld [vmem:[#allocation14] sm:$0xf]  ;;  %v2477_v34 = vld [vmem:[#allocation14 + $0x10] sm:$0xf] }
 0x324   : > { %v1526_v37 = vmul.f32 1.442695, %v1516_v36 }
 0x325   : > { %v1501_v38 = vpop.xlane.xlu0 %1500 }
 0x326   : > { %3369 = vpow2.f32 %v1526_v37  ;;  %v1517_v39 = vsub.f32 %v1181_v10, %v1501_v38 }
 0x328   : > { %v1528_v27 = vmul.f32 1.442695, %v1517_v39  ;;  %v2556_v39 = vld [vmem:[#allocation14 + $0x14] sm:$0xf] }
 0x329   : > { %v1504_v40 = vpop.xlane.xlu1 %1503 }
 0x32a   : > { %3371 = vpow2.f32 %v1528_v27  ;;  %v1518_v41 = vsub.f32 %v1257_v13, %v1504_v40 }
 0x32c   : > { %v1530_v42 = vmul.f32 1.442695, %v1518_v41 }
 0x32d   : > { %v1507_v43 = vpop.xlane.xlu0 %1506 }
 0x32e   : > { %3373 = vpow2.f32 %v1530_v42  ;;  %v1519_v44 = vsub.f32 %v1333_v16, %v1507_v43  ;;  %v2398_v16 = vld [vmem:[#allocation14 + $0xc] sm:$0xf]  ;;  %v2635_v43 = vld [vmem:[#allocation14 + $0x18] sm:$0xf] }
 0x32f   : > { %v3368_v45 = vpop.eup %3367 }
 0x330   : > { %v1532_v46 = vmul.f32 1.442695, %v1519_v44  ;;  %3172 = vmatmul.mubr.msk.f32.vlgmr.msra.gmra.mxu1 %vm1489_vm3, %v3368_v45  ;;  %v1541_v48 = vsel %vm1489_vm3, %v3368_v45, 0.0 }
 0x331   : > { %3180 = vmatpush3.msra.mxu1 %v876_v47  ;;  %v1513_v49 = vpop.xlane.xlu0 %1512  ;;  %1542 = vadd.xlane.f32.xlu1 %v1541_v48  ;;  %v1510_v50 = vpop.xlane.xlu1 %1509  ;;  %v2714_v48 = vld [vmem:[#allocation14 + $0x1c] sm:$0xf] }
 0x332   : > { %3375 = vpow2.f32 %v1532_v46  ;;  %v1521_v51 = vsub.f32 %v1485_v20, %v1513_v49  ;;  %v1520_v52 = vsub.f32 %v1409_v19, %v1510_v50  ;;  %3181 = vmatprep.mubr.msk.f32.mxu1 %vm3666_vm0, %v3665_v0  ;;  %3189 = vmatprep.subr.mxu1 %v3665_v0 }
 0x333   : > { %v3370_v53 = vpop.eup %3369 }
 0x334   : > { %v1536_v54 = vmul.f32 1.442695, %v1521_v51  ;;  %v1534_v55 = vmul.f32 1.442695, %v1520_v52  ;;  %3177 = vmatmul.mubr.msk.f32.vlgmr.msra.gmra.mxu0 %vm1489_vm3, %v3370_v53  ;;  %v1544_v57 = vsel %vm1489_vm3, %v3370_v53, 0.0 }
 0x335   : > { %3185 = vmatpush3.msra.mxu0 %v877_v56  ;;  %1545 = vadd.xlane.f32.xlu0 %v1544_v57  ;;  %v729_v58 = vpop.permute.xlu0 %728  ;;  %v719_v59 = vpop.permute.xlu1 %718 }
 0x336   : > { %3377 = vpow2.f32 %v1536_v54  ;;  %732 = vst.msk [vmem:[#allocation4 + $0x38] sm:$0xff] %vm658_vm2, %v729_v58  ;;  %722 = vst.msk [vmem:[#allocation4 + $0x30] sm:$0xff] %vm658_vm2, %v719_v59  ;;  %3186 = vmatprep.mubr.msk.f32.mxu0 %vm3666_vm0, %v3665_v0  ;;  %3194 = vmatprep.subr.mxu0 %v3665_v0 }
 0x337   : > { %v3372_v60 = vpop.eup %3371  ;;  %3379 = vpow2.f32 %v1534_v55 }
 0x338   : > { %3182 = vmatmul.mubr.msk.f32.vlgmr.msra.gmra.mxu1 %vm1489_vm3, %v3372_v60  ;;  %v1547_v62 = vsel %vm1489_vm3, %v3372_v60, 0.0 }
 0x339   : > { %3190 = vmatpush3.msra.mxu1 %v878_v61  ;;  %1548 = vadd.xlane.f32.xlu1 %v1547_v62 }
 0x33a   : > { %3191 = vmatprep.mubr.msk.f32.mxu1 %vm3666_vm0, %v3665_v0  ;;  %3199 = vmatprep.subr.mxu1 %v3665_v0 }
 0x33b   : > { %v3374_v63 = vpop.eup %3373 }
 0x33c   : > { %3187 = vmatmul.mubr.msk.f32.vlgmr.msra.gmra.mxu0 %vm1489_vm3, %v3374_v63  ;;  %v1550_v1 = vsel %vm1489_vm3, %v3374_v63, 0.0 }
 0x33d   : > { %1551 = vadd.xlane.f32.xlu0 %v1550_v1  ;;  %v879_v2 = vld [vmem:[#allocation4 + $0x30] sm:$0xff]  ;;  %3196 = vmatprep.mubr.msk.f32.mxu0 %vm3666_vm0, %v3665_v0  ;;  %v880_v4 = vld [vmem:[#allocation4 + $0x38] sm:$0xff] }
 0x33e   : > { %3195 = vmatpush3.msra.mxu0 %v879_v2 }
 0x33f   : > { %v3376_v3 = vpop.eup %3375  ;;  %3204 = vmatprep.subr.mxu0 %v3665_v0 }
 0x340   : > { %3192 = vmatmul.mubr.msk.f32.vlgmr.msra.gmra.mxu1 %vm1489_vm3, %v3376_v3  ;;  %v1553_v5 = vsel %vm1489_vm3, %v3376_v3, 0.0 }
 0x341   : > { %3200 = vmatpush3.msra.mxu1 %v880_v4  ;;  %1554 = vadd.xlane.f32.xlu1 %v1553_v5 }
 0x342   : > { %3201 = vmatprep.mubr.msk.f32.mxu1 %vm3666_vm0, %v3665_v0  ;;  %3209 = vmatprep.subr.mxu1 %v3665_v0 }
 0x343   : > { %v3378_v6 = vpop.eup %3377 }
 0x344   : > { %v3380_v8 = vpop.eup %3379  ;;  %3202 = vmatmul.mubr.msk.f32.vlgmr.msra.gmra.mxu1 %vm1489_vm3, %v3378_v6  ;;  %v1559_v9 = vsel %vm1489_vm3, %v3378_v6, 0.0 }
 0x345   : > { %3197 = vmatmul.mubr.msk.f32.vlgmr.msra.gmra.mxu0 %vm1489_vm3, %v3380_v8  ;;  %1560 = vadd.xlane.f32.xlu1 %v1559_v9  ;;  %v1556_v10 = vsel %vm1489_vm3, %v3380_v8, 0.0 }
 0x346   : > { %1557 = vadd.xlane.f32.xlu0 %v1556_v10  ;;  %3210 = vmatpush3.msk.msra.mxu1 %vm2168_vm4, %v2162_v7 }
 0x347   : > { %3211 = vmatprep.mubr.msk.f32.mxu1 %vm3666_vm0, %v3665_v0  ;;  %3206 = vmatprep.mubr.msk.f32.mxu0 %vm3666_vm0, %v3665_v0 }
 0x348   : > { %3219 = vmatprep.subr.mxu1 %v3665_v0  ;;  %3205 = vmatpush3.msk.msra.mxu0 %vm2168_vm4, %v2164_v12 }
 0x349   : > { %3214 = vmatprep.subr.mxu0 %v3665_v0 }
 0x366   : > { %v1540_v11 = vpop.xlane.xlu0 %1539 }
 0x367   : > { %3381 = vrcp.f32 %v1540_v11 }
 0x374   : > { %v3382_v13 = vpop.eup %3381 }
 0x37e   : > { %v1631_v14 = vpop.f32.mrf.mxu0 }
 0x37f   : > { %v2154_v15 = vmul.f32 %v3382_v13, %v1631_v14 }
 0x380   : > { %v3168_v17 = vpop.f32.mrf.mxu0 }
 0x381   : > { %3212 = vmatmul.mubr.msk.f32.vlgmr.msra.gmra.mxu1 %vm658_vm2, %v2154_v15  ;;  %v3023_v15 = vld [vmem:[%s4173_s9] ss:$0 sm:$0xff] }
 0x382   : > { %3220 = vmatpush3.msk.msra.mxu1 %vm2168_vm4, %v2398_v16  ;;  %3221 = vmatprep.mubr.msk.f32.mxu1 %vm3666_vm0, %v3665_v0 }
 0x383   : > { %3229 = vmatprep.subr.mxu1 %v3665_v0 }
 0x3ba   : > { %v1543_v18 = vpop.xlane.xlu1 %1542 }
 0x3bb   : > { %3383 = vrcp.f32 %v1543_v18 }
 0x3be   : > { %v1546_v19 = vpop.xlane.xlu0 %1545 }
 0x3bf   : > { %3385 = vrcp.f32 %v1546_v19 }
 0x3c2   : > { %v1549_v20 = vpop.xlane.xlu1 %1548 }
 0x3c3   : > { %3387 = vrcp.f32 %v1549_v20 }
 0x3c6   : > { %v1552_v21 = vpop.xlane.xlu0 %1551 }
 0x3c7   : > { %3389 = vrcp.f32 %v1552_v21 }
 0x3c8   : > { %v3384_v23 = vpop.eup %3383 }
 0x3ca   : > { %v1555_v22 = vpop.xlane.xlu1 %1554 }
 0x3cb   : > { %3391 = vrcp.f32 %v1555_v22 }
 0x3cc   : > { %v3386_v29 = vpop.eup %3385 }
 0x3ce   : > { %v1561_v30 = vpop.xlane.xlu1 %1560 }
 0x3cf   : > { %v1558_v32 = vpop.xlane.xlu0 %1557  ;;  %3393 = vrcp.f32 %v1561_v30 }
 0x3d0   : > { %v3388_v36 = vpop.eup %3387  ;;  %3395 = vrcp.f32 %v1558_v32 }
 0x3d4   : > { %v3390_v40 = vpop.eup %3389 }
 0x3d8   : > { %v3392_v45 = vpop.eup %3391 }
 0x3dc   : > { %v3394_v50 = vpop.eup %3393 }
 0x3dd   : > { %v3396_v52 = vpop.eup %3395 }
 0x3f0   : > { %v1704_v24 = vpop.f32.mrf.mxu1 }
 0x3f1   : > { %v2155_v25 = vmul.f32 %v3384_v23, %v1704_v24 }
 0x3f2   : > { %v3173_v28 = vpop.f32.mrf.mxu1 }
 0x3f3   : > { %3207 = vmatmul.mubr.msk.f32.vlgmr.msra.gmra.mxu0 %vm658_vm2, %v2155_v25 }
 0x3f4   : > { %v1777_v31 = vpop.f32.mrf.mxu0  ;;  %3215 = vmatpush3.msk.msra.mxu0 %vm2168_vm4, %v2319_v26  ;;  %3216 = vmatprep.mubr.msk.f32.mxu0 %vm3666_vm0, %v3665_v0 }
 0x3f5   : > { %v2156_v33 = vmul.f32 %v3386_v29, %v1777_v31  ;;  %3224 = vmatprep.subr.mxu0 %v3665_v0 }
 0x3f6   : > { %v3178_v35 = vpop.f32.mrf.mxu0 }
 0x3f7   : > { %3217 = vmatmul.mubr.msk.f32.vlgmr.msra.gmra.mxu0 %vm658_vm2, %v2156_v33 }
 0x3f8   : > { %v1850_v37 = vpop.f32.mrf.mxu1  ;;  %3225 = vmatpush3.msk.msra.mxu0 %vm2168_vm4, %v2477_v34  ;;  %3226 = vmatprep.mubr.msk.f32.mxu0 %vm3666_vm0, %v3665_v0 }
 0x3f9   : > { %v2157_v38 = vmul.f32 %v3388_v36, %v1850_v37  ;;  %3234 = vmatprep.subr.mxu0 %v3665_v0 }
 0x3fa   : > { %v3183_v27 = vpop.f32.mrf.mxu1 }
 0x3fb   : > { %3222 = vmatmul.mubr.msk.f32.vlgmr.msra.gmra.mxu1 %vm658_vm2, %v2157_v38 }
 0x3fc   : > { %v1923_v41 = vpop.f32.mrf.mxu0  ;;  %3230 = vmatpush3.msk.msra.mxu1 %vm2168_vm4, %v2556_v39  ;;  %3231 = vmatprep.mubr.msk.f32.mxu1 %vm3666_vm0, %v3665_v0 }
 0x3fd   : > { %v2158_v42 = vmul.f32 %v3390_v40, %v1923_v41  ;;  %3239 = vmatprep.subr.mxu1 %v3665_v0 }
 0x3fe   : > { %v3188_v44 = vpop.f32.mrf.mxu0 }
 0x3ff   : > { %3227 = vmatmul.mubr.msk.f32.vlgmr.msra.gmra.mxu0 %vm658_vm2, %v2158_v42 }
 0x400   : > { %v1996_v46 = vpop.f32.mrf.mxu1  ;;  %3235 = vmatpush3.msk.msra.mxu0 %vm2168_vm4, %v2635_v43  ;;  %3236 = vmatprep.mubr.msk.f32.mxu0 %vm3666_vm0, %v3665_v0 }
 0x401   : > { %v2159_v47 = vmul.f32 %v3392_v45, %v1996_v46 }
 0x402   : > { %v3193_v49 = vpop.f32.mrf.mxu1 }
 0x403   : > { %3232 = vmatmul.mubr.msk.f32.vlgmr.msra.gmra.mxu1 %vm658_vm2, %v2159_v47 }
 0x404   : > { %v2142_v51 = vpop.f32.mrf.mxu1  ;;  %3240 = vmatpush3.msk.msra.mxu1 %vm2168_vm4, %v2714_v48  ;;  %3241 = vmatprep.mubr.msk.f32.mxu1 %vm3666_vm0, %v3665_v0 }
 0x405   : > { %v2069_v53 = vpop.f32.mrf.mxu0  ;;  %v2161_v54 = vmul.f32 %v3394_v50, %v2142_v51 }
 0x406   : > { %v2160_v55 = vmul.f32 %v3396_v52, %v2069_v53  ;;  %v3203_v56 = vpop.f32.mrf.mxu1 }
 0x407   : > { %v3198_v57 = vpop.f32.mrf.mxu0  ;;  %3242 = vmatmul.mubr.msk.f32.vlgmr.msra.gmra.mxu1 %vm658_vm2, %v2161_v54 }
 0x408   : > { %3237 = vmatmul.mubr.msk.f32.vlgmr.msra.gmra.mxu0 %vm658_vm2, %v2160_v55 }
 0x441   : > { %v2314_v58 = vpop.f32.mrf.mxu1 }
 0x443   : > { %v3213_v59 = vpop.f32.mrf.mxu1 }
 0x4b3   : > { %v2238_v60 = vpop.f32.mrf.mxu0 }
 0x4b4   : > { %v2315_v0 = vadd.f32 %v2314_v58, %v2238_v60 }
 0x4b5   : > { %v3208_v61 = vpop.f32.mrf.mxu0 }
 0x4b7   : > { %v2392_v62 = vpop.f32.mrf.mxu0 }
 0x4b8   : > { %v2396_v4 = vadd.f32 %v2392_v62, %v2315_v0 }
 0x4b9   : > { %v3218_v63 = vpop.f32.mrf.mxu0 }
 0x4bb   : > { %v2471_v1 = vpop.f32.mrf.mxu1 }
 0x4bc   : > { %v2475_v6 = vadd.f32 %v2471_v1, %v2396_v4 }
 0x4bd   : > { %v3223_v2 = vpop.f32.mrf.mxu1 }
 0x4bf   : > { %v2550_v3 = vpop.f32.mrf.mxu0 }
 0x4c0   : > { %v2554_v8 = vadd.f32 %v2550_v3, %v2475_v6 }
 0x4c1   : > { %v3228_v5 = vpop.f32.mrf.mxu0 }
 0x4c3   : > { %v2629_v7 = vpop.f32.mrf.mxu1 }
 0x4c4   : > { %v2633_v10 = vadd.f32 %v2629_v7, %v2554_v8 }
 0x4c5   : > { %v3233_v9 = vpop.f32.mrf.mxu1 }
 0x4c7   : > { %v2787_v11 = vpop.f32.mrf.mxu1 }
 0x4c8   : > { %v2708_v12 = vpop.f32.mrf.mxu0 }
 0x4c9   : > { %v2712_v13 = vadd.f32 %v2708_v12, %v2633_v10  ;;  %v3243_v14 = vpop.f32.mrf.mxu1 }
 0x4ca   : > { %v3238_v16 = vpop.f32.mrf.mxu0 }
 0x4cb   : > { %v2791_v17 = vadd.f32 %v2787_v11, %v2712_v13 }
 0x4cd   : > { %v2799_v18 = vadd.f32 %v3023_v15, %v2791_v17 }
 0x4cf   : > { %2800 = vst.msk [vmem:[%s486_s19] sm:$0xff] %vm503_vm1, %v2799_v18 }
 0x4d0   : > { %3570 = shalt.err (!%p3567_p3)
}
 0x4d1   : > { %s3571_s8 = scalar_lea.hbm %s2814_s27, 128  ;;  %s3575_s11 = scalar_lea.hbm %s4174_s10, 256 }
 0x4d2   : > { %p3572_p7 = scmp.ne.s32.totalorder %s2814_s27, %s3571_s8  ;;  %p3576_p13 = scmp.lt.s32.totalorder %s2814_s27, %s4174_s10 }
 0x4d3   : > { %p3577_p2 = scmp.lt.s32.totalorder %s3575_s11, %s3571_s8 }
 0x4d4   : > { %p3573_p0 = pnand %p3572_p7, %p3836_p10 }
 0x4d5   : > { %p3578_p11 = por %p3577_p2, %p3576_p13 }
 0x4d6   : > { %p3574_p12 = pneg %p3573_p0 }
 0x4d8   : > { %p3579_p5 = pnand %p3578_p11, %p3574_p12 }
 0x4da   : > { %3582 = shalt.err (!%p3579_p5)
}
 0x4db   : > { %3264 = dma.vmem_to_hbm [thread:$0]  (%p3836_p10), %s2817_s25, 128, %s2814_s27, %s2802_s29  }
 0x4dc PF: > { %s2828_s20 = sand.u32 1, %s3633_s13   ;;  %p4205_p4 = scmp.ge.s32.totalorder %s3653_s18, 2 }
 0x4dd   : > { %s2829_s22 = scalar_lea.sflag [#allocation7], %s2828_s20 }
 0x4de   : > { %p3287_p6 = pnand %p4205_p4, %p3843_p1 }
 0x4e0   : > { %p3288_p8 = pneg %p3287_p6 }
 0x4e2   : > { %3628 = dma.done.wait (%p3288_p8), %s2829_s22, 128  }
 0x4e3   : > { %3630 = vsyncadd (%p3288_p8), %s2829_s22, 4294967168  ;;  %s31_s18 = sadd.s32 1, %s3653_s18   ;;  %s4206_s21 = sld [smem:[#allocation25_spill]] }
 0x4e4   : > { %p28_p9 = scmp.ge.s32.totalorder %s31_s18, 4   ;;  %s4207_s16 = sld [smem:[#allocation23_spill]] }
 0x4e5   : > { %s4208_s17 = sld [smem:[#allocation24_spill]]  ;;  %s4209_s13 = smov %s3637_s14 }
 0x4e6   : > { %s4210_s14 = smov %s3641_s15  ;;  %30 = sbr.rel (!%p28_p9) target bundleno = 16 (0x10), region = 166 }
 0x4e9   : > { %s4211_s15 = smov %s4206_s21 }
 0x4eb   :  { %2834 = vsyncpa [#allocation6], 1 }
 0x4ec   :  { %2836 = vsyncpa [#allocation6 + $0x1], 1 }
 0x4ed   :  { %2837 = vsyncpa [#allocation9], 1 }
 0x4ee   :  { %2839 = vsyncpa [#allocation9 + $0x1], 1 }
 0x4ef   :  { %2840 = vsyncpa [#allocation12], 1 }
 0x4f0   :  { %2841 = vsyncpa [#allocation15], 1 }
 0x4f1   :  { %2842 = vsyncpa [#allocation7], 1 }
 0x4f2   :  { %2844 = vsyncpa [#allocation7 + $0x1], 1 }

</bundles_post_ra>
